<compile_context>
chip_gen: v6e
topology: v6e:2x2x1
jax: 0.10.0
libtpu: 0.0.40
codegen_flags: <defaults>
</compile_context>

<pallas_src>
from math import sqrt

import jax
import jax.numpy as jnp
from jax.experimental import pallas as pl
from jax.experimental.pallas import tpu as pltpu

KSIZE = 5          # default kernel_sizes=(5,5)
PAD = 2            # default paddings=(2,2)
NEG_SLOPE = 0.01   # torch.nn.LeakyReLU default negative_slope


# --------------------------- fused forward kernel ---------------------------
def _fused_encoder_kernel(w1_ref, b1_ref, w2_ref, b2_ref,    # SMEM conv params
                          x_ref, fcw_ref, fcb_ref,           # VMEM inputs
                          o_ref,                             # VMEM output
                          pad_ref, flat_ref):                # VMEM scratch
    """conv5x5+LReLU -> conv5x5+LReLU -> flatten -> Linear, all in VMEM."""
    BN = x_ref.shape[0]
    H = x_ref.shape[2]
    W = x_ref.shape[3]

    # In-kernel zero padding: zero the (BN, H+4, W+4) scratch every step (a few
    # hundred elements -> negligible) so the PAD-wide border is zero for both
    # conv layers on every grid step / TensorCore.  Only the interior is
    # rewritten below.
    pad_ref[...] = jnp.zeros_like(pad_ref)
    pad_ref[:, PAD:PAD + H, PAD:PAD + W] = x_ref[:, 0, :, :]

    def conv5x5_lrelu(w_ref, b_ref):
        # Single full-tile load, then 25 statically-shifted views of the value
        # (cross-correlation == PyTorch Conv2d).  The per-dh slab is hoisted so
        # the 5 lane shifts reuse one sublane-shifted slab.  Shifts never cross
        # the padded tile edge, so no wrap/seam masking is required.
        xp = pad_ref[...]
        acc = jnp.zeros((BN, H, W), jnp.float32)
        for dh in range(KSIZE):
            slab = xp[:, dh:dh + H, :]                     # (BN, H, W+2*PAD)
            for dw in range(KSIZE):
                acc = acc + w_ref[dh * KSIZE + dw] * slab[:, :, dw:dw + W]
        acc = acc + b_ref[0]
        return jnp.where(acc > 0, acc, NEG_SLOPE * acc)     # LeakyReLU(0.01)

    h = conv5x5_lrelu(w1_ref, b1_ref)
    pad_ref[:, PAD:PAD + H, PAD:PAD + W] = h                 # border still zero
    h = conv5x5_lrelu(w2_ref, b2_ref)

    # Row-major flatten (BN, H, W) -> (BN, H*W) into a lane-dense VMEM scratch
    # (H static slice-stores; avoids an in-kernel reshape relayout).
    for r in range(H):
        flat_ref[:, r * W:(r + 1) * W] = h[:, r, :]

    # nn.Dropout(p=0) is the identity.  Final Linear = one small MXU pass.
    # Output last dim L is small (one masked store); padding L to 128 plus a
    # wrapper-side slice would cost more than the single masked vst it saves.
    o_ref[...] = (
        jnp.dot(flat_ref[...], fcw_ref[...], preferred_element_type=jnp.float32)
        + fcb_ref[...]
    ).astype(o_ref.dtype)


def _pick_batch_block(n, batch_block):
    """Whole batch when small; otherwise a multiple-of-8 block (sublane rule)."""
    if n <= batch_block:
        return n
    return max(8, (batch_block // 8) * 8)


def cnn_encoder_forward(x_nchw, conv_w, conv_b, fc_w, fc_b, *, batch_block=128):
    """Fused forward. x_nchw: (N, 1, H, W) f32 -> (N, L) f32."""
    N, C, H, W = x_nchw.shape
    assert C == 1, "default CNNEncoder config has channels=(1,1)"
    F = H * W
    L = fc_w.shape[1]
    assert fc_w.shape[0] == F, "FC weight does not match flattened activation"
    Hp, Wp = H + 2 * PAD, W + 2 * PAD

    BN = _pick_batch_block(N, batch_block)
    grid = (pl.cdiv(N, BN),)

    # Advisory roofline hint for XLA's scheduler.
    flops = 2 * (2 * N * H * W * KSIZE * KSIZE) + 2 * N * F * L
    bytes_accessed = 4 * (x_nchw.size + fc_w.size + fc_b.size + N * L
                          + 2 * (KSIZE * KSIZE + 1))

    return pl.pallas_call(
        _fused_encoder_kernel,
        out_shape=jax.ShapeDtypeStruct((N, L), jnp.float32),
        grid=grid,
        in_specs=[
            pl.BlockSpec(memory_space=pltpu.MemorySpace.SMEM),       # conv1 w (25,)
            pl.BlockSpec(memory_space=pltpu.MemorySpace.SMEM),       # conv1 b (1,)
            pl.BlockSpec(memory_space=pltpu.MemorySpace.SMEM),       # conv2 w (25,)
            pl.BlockSpec(memory_space=pltpu.MemorySpace.SMEM),       # conv2 b (1,)
            pl.BlockSpec((BN, 1, H, W), lambda i: (i, 0, 0, 0)),     # x (NCHW)
            pl.BlockSpec((F, L), lambda i: (0, 0)),                  # fc weight (resident)
            pl.BlockSpec((1, L), lambda i: (0, 0)),                  # fc bias   (resident)
        ],
        out_specs=pl.BlockSpec((BN, L), lambda i: (i, 0)),
        scratch_shapes=[
            pltpu.VMEM((BN, Hp, Wp), jnp.float32),   # padded activation (reused)
            pltpu.VMEM((BN, F), jnp.float32),        # flattened activation
        ],
        compiler_params=pltpu.CompilerParams(
            dimension_semantics=("parallel",)),
        cost_estimate=pl.CostEstimate(
            flops=flops, transcendentals=0, bytes_accessed=bytes_accessed),
    )(conv_w[0], conv_b[0], conv_w[1], conv_b[1], x_nchw, fc_w, fc_b)


# ------------------------------ module wrapper -------------------------------
class CNNEncoderPallas:
    """Non-variational CNNEncoder with default args: channels=(1,1), k=5, s=1, p=2."""
    # TODO(synk): variational head (fc_mu/fc_var) not implemented; default
    # CNNEncoder(variational=False) forward path only.

    def __init__(self, latent_dimensions, feature_size, key):
        self.latent_dimensions = latent_dimensions
        H = feature_size[0]
        linear_in = 1 * H * H  # reference module assumes square feature maps

        k0, k1, k2, k3, k4, k5 = jax.random.split(key, 6)
        # Conv2d default init: U(-1/sqrt(fan_in), 1/sqrt(fan_in)), fan_in = 1*5*5
        cbound = 1.0 / sqrt(1 * KSIZE * KSIZE)
        self.conv_w = [
            jax.random.uniform(k0, (KSIZE * KSIZE,), jnp.float32, -cbound, cbound),
            jax.random.uniform(k1, (KSIZE * KSIZE,), jnp.float32, -cbound, cbound),
        ]
        self.conv_b = [
            jax.random.uniform(k2, (1,), jnp.float32, -cbound, cbound),
            jax.random.uniform(k3, (1,), jnp.float32, -cbound, cbound),
        ]
        # Linear default init: U(-1/sqrt(fan_in), 1/sqrt(fan_in))
        lbound = 1.0 / sqrt(linear_in)
        self.fc_w = jax.random.uniform(
            k4, (linear_in, latent_dimensions), jnp.float32, -lbound, lbound)
        self.fc_b = jax.random.uniform(
            k5, (1, latent_dimensions), jnp.float32, -lbound, lbound)

    def __call__(self, x_nchw, *, batch_block=128):
        N, C, H, W = x_nchw.shape
        assert C == 1
        assert H == W, "reference CNNEncoder assumes square feature maps"
        return cnn_encoder_forward(
            x_nchw, self.conv_w, self.conv_b, self.fc_w, self.fc_b,
            batch_block=batch_block)


# ------------------------------ pure-JAX reference ---------------------------
def _reference_forward(x_nchw, conv_w, conv_b, fc_w, fc_b):
    x = x_nchw[:, 0, :, :]
    N, H, W = x.shape
    for w_flat, b in zip(conv_w, conv_b):
        xp = jnp.pad(x, ((0, 0), (PAD, PAD), (PAD, PAD)))
        acc = jnp.zeros((N, H, W), jnp.float32)
        for dh in range(KSIZE):
            for dw in range(KSIZE):
                acc = acc + w_flat[dh * KSIZE + dw] * xp[:, dh:dh + H, dw:dw + W]
        acc = acc + b[0]
        x = jnp.where(acc > 0, acc, NEG_SLOPE * acc)
    flat = x.reshape(N, H * W)
    return flat @ fc_w + fc_b


if __name__ == "__main__":
    key = jax.random.PRNGKey(0)
    k_params, k_data, k_data2 = jax.random.split(key, 3)

    latent_dimensions = 8
    feature_size = (16, 16)
    enc = CNNEncoderPallas(latent_dimensions, feature_size, k_params)

    # Small batch: single grid step.
    x = jax.random.normal(k_data, (2, 1, 16, 16), jnp.float32)  # NCHW, C=1
    out = enc(x)
    jax.block_until_ready(out)
    assert out.shape == (2, latent_dimensions), out.shape
    ref = _reference_forward(x, enc.conv_w, enc.conv_b, enc.fc_w, enc.fc_b)
    max_err = float(jnp.max(jnp.abs(out - ref)))
    assert jnp.allclose(out, ref, rtol=1e-2, atol=1e-2), max_err

    # Larger batch: exercises the batch grid (2 steps, partial final block).
    x2 = jax.random.normal(k_data2, (10, 1, 16, 16), jnp.float32)
    out2 = enc(x2, batch_block=8)
    jax.block_until_ready(out2)
    assert out2.shape == (10, latent_dimensions), out2.shape
    ref2 = _reference_forward(x2, enc.conv_w, enc.conv_b, enc.fc_w, enc.fc_b)
    max_err2 = float(jnp.max(jnp.abs(out2 - ref2)))
    assert jnp.allclose(out2, ref2, rtol=1e-2, atol=1e-2), max_err2

    print("KERNEL_OK")
</pallas_src>

<mosaic_0001>
module attributes {stable_mosaic.version = 11 : i64} {
  func.func @_fused_encoder_kernel(%arg0: i32, %arg1: memref<25xf32, #tpu.memory_space<smem>>, %arg2: memref<1xf32, #tpu.memory_space<smem>>, %arg3: memref<25xf32, #tpu.memory_space<smem>>, %arg4: memref<1xf32, #tpu.memory_space<smem>>, %arg5: memref<2x1x16x16xf32, #tpu.memory_space<vmem>>, %arg6: memref<256x8xf32, #tpu.memory_space<vmem>>, %arg7: memref<1x8xf32, #tpu.memory_space<vmem>>, %arg8: memref<2x8xf32, #tpu.memory_space<vmem>>, %arg9: memref<2x20x20xf32, #tpu.memory_space<vmem>>, %arg10: memref<2x256xf32, #tpu.memory_space<vmem>>) attributes {dimension_semantics = [#tpu.dimension_semantics<parallel>], iteration_bounds = array<i64: 1>, scalar_prefetch = 0 : i64, scratch_operands = 2 : i64, tpu.core_type = #tpu.core_type<tc>, window_params = [{transform_indices = @transform_0, window_bounds = array<i64: 25>}, {transform_indices = @transform_1, window_bounds = array<i64: 1>}, {transform_indices = @transform_2, window_bounds = array<i64: 25>}, {transform_indices = @transform_3, window_bounds = array<i64: 1>}, {transform_indices = @transform_4, window_bounds = array<i64: 2, 1, 16, 16>}, {pipeline_mode = #tpu.pipeline_mode<synchronous>, transform_indices = @transform_5, window_bounds = array<i64: 256, 8>}, {pipeline_mode = #tpu.pipeline_mode<synchronous>, transform_indices = @transform_6, window_bounds = array<i64: 1, 8>}, {transform_indices = @transform_7, window_bounds = array<i64: 2, 8>}]} {
    %cst = arith.constant 0.000000e+00 : f32
    %0 = vector.broadcast %cst : f32 to vector<2x20x20xf32>
    %c0 = arith.constant 0 : index
    %c0_0 = arith.constant 0 : index
    %c0_1 = arith.constant 0 : index
    %1 = vector.load %arg9[%c0, %c0_0, %c0_1] : memref<2x20x20xf32, #tpu.memory_space<vmem>>, vector<2x20x20xf32>
    tpu.vector_store %arg9[%c0, %c0_0, %c0_1], %0 {strides = array<i32>} : memref<2x20x20xf32, #tpu.memory_space<vmem>>, vector<2x20x20xf32>,
    %c0_2 = arith.constant 0 : index
    %c0_3 = arith.constant 0 : index
    %c0_4 = arith.constant 0 : index
    %c0_5 = arith.constant 0 : index
    %2 = vector.load %arg5[%c0_2, %c0_3, %c0_4, %c0_5] : memref<2x1x16x16xf32, #tpu.memory_space<vmem>>, vector<2x1x16x16xf32>
    %3 = vector.shape_cast %2 : vector<2x1x16x16xf32> to vector<2x16x16xf32>
    %c0_6 = arith.constant 0 : index
    %c2 = arith.constant 2 : index
    %c2_7 = arith.constant 2 : index
    %4 = vector.load %arg9[%c0_6, %c2, %c2_7] : memref<2x20x20xf32, #tpu.memory_space<vmem>>, vector<2x16x16xf32>
    tpu.vector_store %arg9[%c0_6, %c2, %c2_7], %3 {strides = array<i32>} : memref<2x20x20xf32, #tpu.memory_space<vmem>>, vector<2x16x16xf32>,
    %c0_8 = arith.constant 0 : index
    %c0_9 = arith.constant 0 : index
    %c0_10 = arith.constant 0 : index
    %5 = vector.load %arg9[%c0_8, %c0_9, %c0_10] : memref<2x20x20xf32, #tpu.memory_space<vmem>>, vector<2x20x20xf32>
    %cst_11 = arith.constant 0.000000e+00 : f32
    %6 = vector.broadcast %cst_11 : f32 to vector<2x16x16xf32>
    %7 = vector.extract_strided_slice %5 {offsets = [0, 0, 0], sizes = [2, 16, 20], strides = [1, 1, 1]} : vector<2x20x20xf32> to vector<2x16x20xf32>
    %c0_12 = arith.constant 0 : index
    %8 = memref.load %arg1[%c0_12] : memref<25xf32, #tpu.memory_space<smem>>
    %9 = vector.extract_strided_slice %7 {offsets = [0, 0, 0], sizes = [2, 16, 16], strides = [1, 1, 1]} : vector<2x16x20xf32> to vector<2x16x16xf32>
    %10 = vector.broadcast %8 : f32 to vector<2x16x16xf32>
    %11 = arith.mulf %10, %9 : vector<2x16x16xf32>
    %12 = arith.addf %6, %11 : vector<2x16x16xf32>
    %c1 = arith.constant 1 : index
    %13 = memref.load %arg1[%c1] : memref<25xf32, #tpu.memory_space<smem>>
    %14 = vector.extract_strided_slice %7 {offsets = [0, 0, 1], sizes = [2, 16, 16], strides = [1, 1, 1]} : vector<2x16x20xf32> to vector<2x16x16xf32>
    %15 = vector.broadcast %13 : f32 to vector<2x16x16xf32>
    %16 = arith.mulf %15, %14 : vector<2x16x16xf32>
    %17 = arith.addf %12, %16 : vector<2x16x16xf32>
    %c2_13 = arith.constant 2 : index
    %18 = memref.load %arg1[%c2_13] : memref<25xf32, #tpu.memory_space<smem>>
    %19 = vector.extract_strided_slice %7 {offsets = [0, 0, 2], sizes = [2, 16, 16], strides = [1, 1, 1]} : vector<2x16x20xf32> to vector<2x16x16xf32>
    %20 = vector.broadcast %18 : f32 to vector<2x16x16xf32>
    %21 = arith.mulf %20, %19 : vector<2x16x16xf32>
    %22 = arith.addf %17, %21 : vector<2x16x16xf32>
    %c3 = arith.constant 3 : index
    %23 = memref.load %arg1[%c3] : memref<25xf32, #tpu.memory_space<smem>>
    %24 = vector.extract_strided_slice %7 {offsets = [0, 0, 3], sizes = [2, 16, 16], strides = [1, 1, 1]} : vector<2x16x20xf32> to vector<2x16x16xf32>
    %25 = vector.broadcast %23 : f32 to vector<2x16x16xf32>
    %26 = arith.mulf %25, %24 : vector<2x16x16xf32>
    %27 = arith.addf %22, %26 : vector<2x16x16xf32>
    %c4 = arith.constant 4 : index
    %28 = memref.load %arg1[%c4] : memref<25xf32, #tpu.memory_space<smem>>
    %29 = vector.extract_strided_slice %7 {offsets = [0, 0, 4], sizes = [2, 16, 16], strides = [1, 1, 1]} : vector<2x16x20xf32> to vector<2x16x16xf32>
    %30 = vector.broadcast %28 : f32 to vector<2x16x16xf32>
    %31 = arith.mulf %30, %29 : vector<2x16x16xf32>
    %32 = arith.addf %27, %31 : vector<2x16x16xf32>
    %33 = vector.extract_strided_slice %5 {offsets = [0, 1, 0], sizes = [2, 16, 20], strides = [1, 1, 1]} : vector<2x20x20xf32> to vector<2x16x20xf32>
    %c5 = arith.constant 5 : index
    %34 = memref.load %arg1[%c5] : memref<25xf32, #tpu.memory_space<smem>>
    %35 = vector.extract_strided_slice %33 {offsets = [0, 0, 0], sizes = [2, 16, 16], strides = [1, 1, 1]} : vector<2x16x20xf32> to vector<2x16x16xf32>
    %36 = vector.broadcast %34 : f32 to vector<2x16x16xf32>
    %37 = arith.mulf %36, %35 : vector<2x16x16xf32>
    %38 = arith.addf %32, %37 : vector<2x16x16xf32>
    %c6 = arith.constant 6 : index
    %39 = memref.load %arg1[%c6] : memref<25xf32, #tpu.memory_space<smem>>
    %40 = vector.extract_strided_slice %33 {offsets = [0, 0, 1], sizes = [2, 16, 16], strides = [1, 1, 1]} : vector<2x16x20xf32> to vector<2x16x16xf32>
    %41 = vector.broadcast %39 : f32 to vector<2x16x16xf32>
    %42 = arith.mulf %41, %40 : vector<2x16x16xf32>
    %43 = arith.addf %38, %42 : vector<2x16x16xf32>
    %c7 = arith.constant 7 : index
    %44 = memref.load %arg1[%c7] : memref<25xf32, #tpu.memory_space<smem>>
    %45 = vector.extract_strided_slice %33 {offsets = [0, 0, 2], sizes = [2, 16, 16], strides = [1, 1, 1]} : vector<2x16x20xf32> to vector<2x16x16xf32>
    %46 = vector.broadcast %44 : f32 to vector<2x16x16xf32>
    %47 = arith.mulf %46, %45 : vector<2x16x16xf32>
    %48 = arith.addf %43, %47 : vector<2x16x16xf32>
    %c8 = arith.constant 8 : index
    %49 = memref.load %arg1[%c8] : memref<25xf32, #tpu.memory_space<smem>>
    %50 = vector.extract_strided_slice %33 {offsets = [0, 0, 3], sizes = [2, 16, 16], strides = [1, 1, 1]} : vector<2x16x20xf32> to vector<2x16x16xf32>
    %51 = vector.broadcast %49 : f32 to vector<2x16x16xf32>
    %52 = arith.mulf %51, %50 : vector<2x16x16xf32>
    %53 = arith.addf %48, %52 : vector<2x16x16xf32>
    %c9 = arith.constant 9 : index
    %54 = memref.load %arg1[%c9] : memref<25xf32, #tpu.memory_space<smem>>
    %55 = vector.extract_strided_slice %33 {offsets = [0, 0, 4], sizes = [2, 16, 16], strides = [1, 1, 1]} : vector<2x16x20xf32> to vector<2x16x16xf32>
    %56 = vector.broadcast %54 : f32 to vector<2x16x16xf32>
    %57 = arith.mulf %56, %55 : vector<2x16x16xf32>
    %58 = arith.addf %53, %57 : vector<2x16x16xf32>
    %59 = vector.extract_strided_slice %5 {offsets = [0, 2, 0], sizes = [2, 16, 20], strides = [1, 1, 1]} : vector<2x20x20xf32> to vector<2x16x20xf32>
    %c10 = arith.constant 10 : index
    %60 = memref.load %arg1[%c10] : memref<25xf32, #tpu.memory_space<smem>>
    %61 = vector.extract_strided_slice %59 {offsets = [0, 0, 0], sizes = [2, 16, 16], strides = [1, 1, 1]} : vector<2x16x20xf32> to vector<2x16x16xf32>
    %62 = vector.broadcast %60 : f32 to vector<2x16x16xf32>
    %63 = arith.mulf %62, %61 : vector<2x16x16xf32>
    %64 = arith.addf %58, %63 : vector<2x16x16xf32>
    %c11 = arith.constant 11 : index
    %65 = memref.load %arg1[%c11] : memref<25xf32, #tpu.memory_space<smem>>
    %66 = vector.extract_strided_slice %59 {offsets = [0, 0, 1], sizes = [2, 16, 16], strides = [1, 1, 1]} : vector<2x16x20xf32> to vector<2x16x16xf32>
    %67 = vector.broadcast %65 : f32 to vector<2x16x16xf32>
    %68 = arith.mulf %67, %66 : vector<2x16x16xf32>
    %69 = arith.addf %64, %68 : vector<2x16x16xf32>
    %c12 = arith.constant 12 : index
    %70 = memref.load %arg1[%c12] : memref<25xf32, #tpu.memory_space<smem>>
    %71 = vector.extract_strided_slice %59 {offsets = [0, 0, 2], sizes = [2, 16, 16], strides = [1, 1, 1]} : vector<2x16x20xf32> to vector<2x16x16xf32>
    %72 = vector.broadcast %70 : f32 to vector<2x16x16xf32>
    %73 = arith.mulf %72, %71 : vector<2x16x16xf32>
    %74 = arith.addf %69, %73 : vector<2x16x16xf32>
    %c13 = arith.constant 13 : index
    %75 = memref.load %arg1[%c13] : memref<25xf32, #tpu.memory_space<smem>>
    %76 = vector.extract_strided_slice %59 {offsets = [0, 0, 3], sizes = [2, 16, 16], strides = [1, 1, 1]} : vector<2x16x20xf32> to vector<2x16x16xf32>
    %77 = vector.broadcast %75 : f32 to vector<2x16x16xf32>
    %78 = arith.mulf %77, %76 : vector<2x16x16xf32>
    %79 = arith.addf %74, %78 : vector<2x16x16xf32>
    %c14 = arith.constant 14 : index
    %80 = memref.load %arg1[%c14] : memref<25xf32, #tpu.memory_space<smem>>
    %81 = vector.extract_strided_slice %59 {offsets = [0, 0, 4], sizes = [2, 16, 16], strides = [1, 1, 1]} : vector<2x16x20xf32> to vector<2x16x16xf32>
    %82 = vector.broadcast %80 : f32 to vector<2x16x16xf32>
    %83 = arith.mulf %82, %81 : vector<2x16x16xf32>
    %84 = arith.addf %79, %83 : vector<2x16x16xf32>
    %85 = vector.extract_strided_slice %5 {offsets = [0, 3, 0], sizes = [2, 16, 20], strides = [1, 1, 1]} : vector<2x20x20xf32> to vector<2x16x20xf32>
    %c15 = arith.constant 15 : index
    %86 = memref.load %arg1[%c15] : memref<25xf32, #tpu.memory_space<smem>>
    %87 = vector.extract_strided_slice %85 {offsets = [0, 0, 0], sizes = [2, 16, 16], strides = [1, 1, 1]} : vector<2x16x20xf32> to vector<2x16x16xf32>
    %88 = vector.broadcast %86 : f32 to vector<2x16x16xf32>
    %89 = arith.mulf %88, %87 : vector<2x16x16xf32>
    %90 = arith.addf %84, %89 : vector<2x16x16xf32>
    %c16 = arith.constant 16 : index
    %91 = memref.load %arg1[%c16] : memref<25xf32, #tpu.memory_space<smem>>
    %92 = vector.extract_strided_slice %85 {offsets = [0, 0, 1], sizes = [2, 16, 16], strides = [1, 1, 1]} : vector<2x16x20xf32> to vector<2x16x16xf32>
    %93 = vector.broadcast %91 : f32 to vector<2x16x16xf32>
    %94 = arith.mulf %93, %92 : vector<2x16x16xf32>
    %95 = arith.addf %90, %94 : vector<2x16x16xf32>
    %c17 = arith.constant 17 : index
    %96 = memref.load %arg1[%c17] : memref<25xf32, #tpu.memory_space<smem>>
    %97 = vector.extract_strided_slice %85 {offsets = [0, 0, 2], sizes = [2, 16, 16], strides = [1, 1, 1]} : vector<2x16x20xf32> to vector<2x16x16xf32>
    %98 = vector.broadcast %96 : f32 to vector<2x16x16xf32>
    %99 = arith.mulf %98, %97 : vector<2x16x16xf32>
    %100 = arith.addf %95, %99 : vector<2x16x16xf32>
    %c18 = arith.constant 18 : index
    %101 = memref.load %arg1[%c18] : memref<25xf32, #tpu.memory_space<smem>>
    %102 = vector.extract_strided_slice %85 {offsets = [0, 0, 3], sizes = [2, 16, 16], strides = [1, 1, 1]} : vector<2x16x20xf32> to vector<2x16x16xf32>
    %103 = vector.broadcast %101 : f32 to vector<2x16x16xf32>
    %104 = arith.mulf %103, %102 : vector<2x16x16xf32>
    %105 = arith.addf %100, %104 : vector<2x16x16xf32>
    %c19 = arith.constant 19 : index
    %106 = memref.load %arg1[%c19] : memref<25xf32, #tpu.memory_space<smem>>
    %107 = vector.extract_strided_slice %85 {offsets = [0, 0, 4], sizes = [2, 16, 16], strides = [1, 1, 1]} : vector<2x16x20xf32> to vector<2x16x16xf32>
    %108 = vector.broadcast %106 : f32 to vector<2x16x16xf32>
    %109 = arith.mulf %108, %107 : vector<2x16x16xf32>
    %110 = arith.addf %105, %109 : vector<2x16x16xf32>
    %111 = vector.extract_strided_slice %5 {offsets = [0, 4, 0], sizes = [2, 16, 20], strides = [1, 1, 1]} : vector<2x20x20xf32> to vector<2x16x20xf32>
    %c20 = arith.constant 20 : index
    %112 = memref.load %arg1[%c20] : memref<25xf32, #tpu.memory_space<smem>>
    %113 = vector.extract_strided_slice %111 {offsets = [0, 0, 0], sizes = [2, 16, 16], strides = [1, 1, 1]} : vector<2x16x20xf32> to vector<2x16x16xf32>
    %114 = vector.broadcast %112 : f32 to vector<2x16x16xf32>
    %115 = arith.mulf %114, %113 : vector<2x16x16xf32>
    %116 = arith.addf %110, %115 : vector<2x16x16xf32>
    %c21 = arith.constant 21 : index
    %117 = memref.load %arg1[%c21] : memref<25xf32, #tpu.memory_space<smem>>
    %118 = vector.extract_strided_slice %111 {offsets = [0, 0, 1], sizes = [2, 16, 16], strides = [1, 1, 1]} : vector<2x16x20xf32> to vector<2x16x16xf32>
    %119 = vector.broadcast %117 : f32 to vector<2x16x16xf32>
    %120 = arith.mulf %119, %118 : vector<2x16x16xf32>
    %121 = arith.addf %116, %120 : vector<2x16x16xf32>
    %c22 = arith.constant 22 : index
    %122 = memref.load %arg1[%c22] : memref<25xf32, #tpu.memory_space<smem>>
    %123 = vector.extract_strided_slice %111 {offsets = [0, 0, 2], sizes = [2, 16, 16], strides = [1, 1, 1]} : vector<2x16x20xf32> to vector<2x16x16xf32>
    %124 = vector.broadcast %122 : f32 to vector<2x16x16xf32>
    %125 = arith.mulf %124, %123 : vector<2x16x16xf32>
    %126 = arith.addf %121, %125 : vector<2x16x16xf32>
    %c23 = arith.constant 23 : index
    %127 = memref.load %arg1[%c23] : memref<25xf32, #tpu.memory_space<smem>>
    %128 = vector.extract_strided_slice %111 {offsets = [0, 0, 3], sizes = [2, 16, 16], strides = [1, 1, 1]} : vector<2x16x20xf32> to vector<2x16x16xf32>
    %129 = vector.broadcast %127 : f32 to vector<2x16x16xf32>
    %130 = arith.mulf %129, %128 : vector<2x16x16xf32>
    %131 = arith.addf %126, %130 : vector<2x16x16xf32>
    %c24 = arith.constant 24 : index
    %132 = memref.load %arg1[%c24] : memref<25xf32, #tpu.memory_space<smem>>
    %133 = vector.extract_strided_slice %111 {offsets = [0, 0, 4], sizes = [2, 16, 16], strides = [1, 1, 1]} : vector<2x16x20xf32> to vector<2x16x16xf32>
    %134 = vector.broadcast %132 : f32 to vector<2x16x16xf32>
    %135 = arith.mulf %134, %133 : vector<2x16x16xf32>
    %136 = arith.addf %131, %135 : vector<2x16x16xf32>
    %c0_14 = arith.constant 0 : index
    %137 = memref.load %arg2[%c0_14] : memref<1xf32, #tpu.memory_space<smem>>
    %138 = vector.broadcast %137 : f32 to vector<2x16x16xf32>
    %139 = arith.addf %136, %138 : vector<2x16x16xf32>
    %cst_15 = arith.constant 0.000000e+00 : f32
    %140 = vector.broadcast %cst_15 : f32 to vector<2x16x16xf32>
    %141 = arith.cmpf ogt, %139, %140 : vector<2x16x16xf32>
    %cst_16 = arith.constant 0.00999999977 : f32
    %142 = vector.broadcast %cst_16 : f32 to vector<2x16x16xf32>
    %143 = arith.mulf %142, %139 : vector<2x16x16xf32>
    %144 = arith.select %141, %139, %143 : vector<2x16x16xi1>, vector<2x16x16xf32>
    %c0_17 = arith.constant 0 : index
    %c2_18 = arith.constant 2 : index
    %c2_19 = arith.constant 2 : index
    %145 = vector.load %arg9[%c0_17, %c2_18, %c2_19] : memref<2x20x20xf32, #tpu.memory_space<vmem>>, vector<2x16x16xf32>
    tpu.vector_store %arg9[%c0_17, %c2_18, %c2_19], %144 {strides = array<i32>} : memref<2x20x20xf32, #tpu.memory_space<vmem>>, vector<2x16x16xf32>,
    %c0_20 = arith.constant 0 : index
    %c0_21 = arith.constant 0 : index
    %c0_22 = arith.constant 0 : index
    %146 = vector.load %arg9[%c0_20, %c0_21, %c0_22] : memref<2x20x20xf32, #tpu.memory_space<vmem>>, vector<2x20x20xf32>
    %cst_23 = arith.constant 0.000000e+00 : f32
    %147 = vector.broadcast %cst_23 : f32 to vector<2x16x16xf32>
    %148 = vector.extract_strided_slice %146 {offsets = [0, 0, 0], sizes = [2, 16, 20], strides = [1, 1, 1]} : vector<2x20x20xf32> to vector<2x16x20xf32>
    %c0_24 = arith.constant 0 : index
    %149 = memref.load %arg3[%c0_24] : memref<25xf32, #tpu.memory_space<smem>>
    %150 = vector.extract_strided_slice %148 {offsets = [0, 0, 0], sizes = [2, 16, 16], strides = [1, 1, 1]} : vector<2x16x20xf32> to vector<2x16x16xf32>
    %151 = vector.broadcast %149 : f32 to vector<2x16x16xf32>
    %152 = arith.mulf %151, %150 : vector<2x16x16xf32>
    %153 = arith.addf %147, %152 : vector<2x16x16xf32>
    %c1_25 = arith.constant 1 : index
    %154 = memref.load %arg3[%c1_25] : memref<25xf32, #tpu.memory_space<smem>>
    %155 = vector.extract_strided_slice %148 {offsets = [0, 0, 1], sizes = [2, 16, 16], strides = [1, 1, 1]} : vector<2x16x20xf32> to vector<2x16x16xf32>
    %156 = vector.broadcast %154 : f32 to vector<2x16x16xf32>
    %157 = arith.mulf %156, %155 : vector<2x16x16xf32>
    %158 = arith.addf %153, %157 : vector<2x16x16xf32>
    %c2_26 = arith.constant 2 : index
    %159 = memref.load %arg3[%c2_26] : memref<25xf32, #tpu.memory_space<smem>>
    %160 = vector.extract_strided_slice %148 {offsets = [0, 0, 2], sizes = [2, 16, 16], strides = [1, 1, 1]} : vector<2x16x20xf32> to vector<2x16x16xf32>
    %161 = vector.broadcast %159 : f32 to vector<2x16x16xf32>
    %162 = arith.mulf %161, %160 : vector<2x16x16xf32>
    %163 = arith.addf %158, %162 : vector<2x16x16xf32>
    %c3_27 = arith.constant 3 : index
    %164 = memref.load %arg3[%c3_27] : memref<25xf32, #tpu.memory_space<smem>>
    %165 = vector.extract_strided_slice %148 {offsets = [0, 0, 3], sizes = [2, 16, 16], strides = [1, 1, 1]} : vector<2x16x20xf32> to vector<2x16x16xf32>
    %166 = vector.broadcast %164 : f32 to vector<2x16x16xf32>
    %167 = arith.mulf %166, %165 : vector<2x16x16xf32>
    %168 = arith.addf %163, %167 : vector<2x16x16xf32>
    %c4_28 = arith.constant 4 : index
    %169 = memref.load %arg3[%c4_28] : memref<25xf32, #tpu.memory_space<smem>>
    %170 = vector.extract_strided_slice %148 {offsets = [0, 0, 4], sizes = [2, 16, 16], strides = [1, 1, 1]} : vector<2x16x20xf32> to vector<2x16x16xf32>
    %171 = vector.broadcast %169 : f32 to vector<2x16x16xf32>
    %172 = arith.mulf %171, %170 : vector<2x16x16xf32>
    %173 = arith.addf %168, %172 : vector<2x16x16xf32>
    %174 = vector.extract_strided_slice %146 {offsets = [0, 1, 0], sizes = [2, 16, 20], strides = [1, 1, 1]} : vector<2x20x20xf32> to vector<2x16x20xf32>
    %c5_29 = arith.constant 5 : index
    %175 = memref.load %arg3[%c5_29] : memref<25xf32, #tpu.memory_space<smem>>
    %176 = vector.extract_strided_slice %174 {offsets = [0, 0, 0], sizes = [2, 16, 16], strides = [1, 1, 1]} : vector<2x16x20xf32> to vector<2x16x16xf32>
    %177 = vector.broadcast %175 : f32 to vector<2x16x16xf32>
    %178 = arith.mulf %177, %176 : vector<2x16x16xf32>
    %179 = arith.addf %173, %178 : vector<2x16x16xf32>
    %c6_30 = arith.constant 6 : index
    %180 = memref.load %arg3[%c6_30] : memref<25xf32, #tpu.memory_space<smem>>
    %181 = vector.extract_strided_slice %174 {offsets = [0, 0, 1], sizes = [2, 16, 16], strides = [1, 1, 1]} : vector<2x16x20xf32> to vector<2x16x16xf32>
    %182 = vector.broadcast %180 : f32 to vector<2x16x16xf32>
    %183 = arith.mulf %182, %181 : vector<2x16x16xf32>
    %184 = arith.addf %179, %183 : vector<2x16x16xf32>
    %c7_31 = arith.constant 7 : index
    %185 = memref.load %arg3[%c7_31] : memref<25xf32, #tpu.memory_space<smem>>
    %186 = vector.extract_strided_slice %174 {offsets = [0, 0, 2], sizes = [2, 16, 16], strides = [1, 1, 1]} : vector<2x16x20xf32> to vector<2x16x16xf32>
    %187 = vector.broadcast %185 : f32 to vector<2x16x16xf32>
    %188 = arith.mulf %187, %186 : vector<2x16x16xf32>
    %189 = arith.addf %184, %188 : vector<2x16x16xf32>
    %c8_32 = arith.constant 8 : index
    %190 = memref.load %arg3[%c8_32] : memref<25xf32, #tpu.memory_space<smem>>
    %191 = vector.extract_strided_slice %174 {offsets = [0, 0, 3], sizes = [2, 16, 16], strides = [1, 1, 1]} : vector<2x16x20xf32> to vector<2x16x16xf32>
    %192 = vector.broadcast %190 : f32 to vector<2x16x16xf32>
    %193 = arith.mulf %192, %191 : vector<2x16x16xf32>
    %194 = arith.addf %189, %193 : vector<2x16x16xf32>
    %c9_33 = arith.constant 9 : index
    %195 = memref.load %arg3[%c9_33] : memref<25xf32, #tpu.memory_space<smem>>
    %196 = vector.extract_strided_slice %174 {offsets = [0, 0, 4], sizes = [2, 16, 16], strides = [1, 1, 1]} : vector<2x16x20xf32> to vector<2x16x16xf32>
    %197 = vector.broadcast %195 : f32 to vector<2x16x16xf32>
    %198 = arith.mulf %197, %196 : vector<2x16x16xf32>
    %199 = arith.addf %194, %198 : vector<2x16x16xf32>
    %200 = vector.extract_strided_slice %146 {offsets = [0, 2, 0], sizes = [2, 16, 20], strides = [1, 1, 1]} : vector<2x20x20xf32> to vector<2x16x20xf32>
    %c10_34 = arith.constant 10 : index
    %201 = memref.load %arg3[%c10_34] : memref<25xf32, #tpu.memory_space<smem>>
    %202 = vector.extract_strided_slice %200 {offsets = [0, 0, 0], sizes = [2, 16, 16], strides = [1, 1, 1]} : vector<2x16x20xf32> to vector<2x16x16xf32>
    %203 = vector.broadcast %201 : f32 to vector<2x16x16xf32>
    %204 = arith.mulf %203, %202 : vector<2x16x16xf32>
    %205 = arith.addf %199, %204 : vector<2x16x16xf32>
    %c11_35 = arith.constant 11 : index
    %206 = memref.load %arg3[%c11_35] : memref<25xf32, #tpu.memory_space<smem>>
    %207 = vector.extract_strided_slice %200 {offsets = [0, 0, 1], sizes = [2, 16, 16], strides = [1, 1, 1]} : vector<2x16x20xf32> to vector<2x16x16xf32>
    %208 = vector.broadcast %206 : f32 to vector<2x16x16xf32>
    %209 = arith.mulf %208, %207 : vector<2x16x16xf32>
    %210 = arith.addf %205, %209 : vector<2x16x16xf32>
    %c12_36 = arith.constant 12 : index
    %211 = memref.load %arg3[%c12_36] : memref<25xf32, #tpu.memory_space<smem>>
    %212 = vector.extract_strided_slice %200 {offsets = [0, 0, 2], sizes = [2, 16, 16], strides = [1, 1, 1]} : vector<2x16x20xf32> to vector<2x16x16xf32>
    %213 = vector.broadcast %211 : f32 to vector<2x16x16xf32>
    %214 = arith.mulf %213, %212 : vector<2x16x16xf32>
    %215 = arith.addf %210, %214 : vector<2x16x16xf32>
    %c13_37 = arith.constant 13 : index
    %216 = memref.load %arg3[%c13_37] : memref<25xf32, #tpu.memory_space<smem>>
    %217 = vector.extract_strided_slice %200 {offsets = [0, 0, 3], sizes = [2, 16, 16], strides = [1, 1, 1]} : vector<2x16x20xf32> to vector<2x16x16xf32>
    %218 = vector.broadcast %216 : f32 to vector<2x16x16xf32>
    %219 = arith.mulf %218, %217 : vector<2x16x16xf32>
    %220 = arith.addf %215, %219 : vector<2x16x16xf32>
    %c14_38 = arith.constant 14 : index
    %221 = memref.load %arg3[%c14_38] : memref<25xf32, #tpu.memory_space<smem>>
    %222 = vector.extract_strided_slice %200 {offsets = [0, 0, 4], sizes = [2, 16, 16], strides = [1, 1, 1]} : vector<2x16x20xf32> to vector<2x16x16xf32>
    %223 = vector.broadcast %221 : f32 to vector<2x16x16xf32>
    %224 = arith.mulf %223, %222 : vector<2x16x16xf32>
    %225 = arith.addf %220, %224 : vector<2x16x16xf32>
    %226 = vector.extract_strided_slice %146 {offsets = [0, 3, 0], sizes = [2, 16, 20], strides = [1, 1, 1]} : vector<2x20x20xf32> to vector<2x16x20xf32>
    %c15_39 = arith.constant 15 : index
    %227 = memref.load %arg3[%c15_39] : memref<25xf32, #tpu.memory_space<smem>>
    %228 = vector.extract_strided_slice %226 {offsets = [0, 0, 0], sizes = [2, 16, 16], strides = [1, 1, 1]} : vector<2x16x20xf32> to vector<2x16x16xf32>
    %229 = vector.broadcast %227 : f32 to vector<2x16x16xf32>
    %230 = arith.mulf %229, %228 : vector<2x16x16xf32>
    %231 = arith.addf %225, %230 : vector<2x16x16xf32>
    %c16_40 = arith.constant 16 : index
    %232 = memref.load %arg3[%c16_40] : memref<25xf32, #tpu.memory_space<smem>>
    %233 = vector.extract_strided_slice %226 {offsets = [0, 0, 1], sizes = [2, 16, 16], strides = [1, 1, 1]} : vector<2x16x20xf32> to vector<2x16x16xf32>
    %234 = vector.broadcast %232 : f32 to vector<2x16x16xf32>
    %235 = arith.mulf %234, %233 : vector<2x16x16xf32>
    %236 = arith.addf %231, %235 : vector<2x16x16xf32>
    %c17_41 = arith.constant 17 : index
    %237 = memref.load %arg3[%c17_41] : memref<25xf32, #tpu.memory_space<smem>>
    %238 = vector.extract_strided_slice %226 {offsets = [0, 0, 2], sizes = [2, 16, 16], strides = [1, 1, 1]} : vector<2x16x20xf32> to vector<2x16x16xf32>
    %239 = vector.broadcast %237 : f32 to vector<2x16x16xf32>
    %240 = arith.mulf %239, %238 : vector<2x16x16xf32>
    %241 = arith.addf %236, %240 : vector<2x16x16xf32>
    %c18_42 = arith.constant 18 : index
    %242 = memref.load %arg3[%c18_42] : memref<25xf32, #tpu.memory_space<smem>>
    %243 = vector.extract_strided_slice %226 {offsets = [0, 0, 3], sizes = [2, 16, 16], strides = [1, 1, 1]} : vector<2x16x20xf32> to vector<2x16x16xf32>
    %244 = vector.broadcast %242 : f32 to vector<2x16x16xf32>
    %245 = arith.mulf %244, %243 : vector<2x16x16xf32>
    %246 = arith.addf %241, %245 : vector<2x16x16xf32>
    %c19_43 = arith.constant 19 : index
    %247 = memref.load %arg3[%c19_43] : memref<25xf32, #tpu.memory_space<smem>>
    %248 = vector.extract_strided_slice %226 {offsets = [0, 0, 4], sizes = [2, 16, 16], strides = [1, 1, 1]} : vector<2x16x20xf32> to vector<2x16x16xf32>
    %249 = vector.broadcast %247 : f32 to vector<2x16x16xf32>
    %250 = arith.mulf %249, %248 : vector<2x16x16xf32>
    %251 = arith.addf %246, %250 : vector<2x16x16xf32>
    %252 = vector.extract_strided_slice %146 {offsets = [0, 4, 0], sizes = [2, 16, 20], strides = [1, 1, 1]} : vector<2x20x20xf32> to vector<2x16x20xf32>
    %c20_44 = arith.constant 20 : index
    %253 = memref.load %arg3[%c20_44] : memref<25xf32, #tpu.memory_space<smem>>
    %254 = vector.extract_strided_slice %252 {offsets = [0, 0, 0], sizes = [2, 16, 16], strides = [1, 1, 1]} : vector<2x16x20xf32> to vector<2x16x16xf32>
    %255 = vector.broadcast %253 : f32 to vector<2x16x16xf32>
    %256 = arith.mulf %255, %254 : vector<2x16x16xf32>
    %257 = arith.addf %251, %256 : vector<2x16x16xf32>
    %c21_45 = arith.constant 21 : index
    %258 = memref.load %arg3[%c21_45] : memref<25xf32, #tpu.memory_space<smem>>
    %259 = vector.extract_strided_slice %252 {offsets = [0, 0, 1], sizes = [2, 16, 16], strides = [1, 1, 1]} : vector<2x16x20xf32> to vector<2x16x16xf32>
    %260 = vector.broadcast %258 : f32 to vector<2x16x16xf32>
    %261 = arith.mulf %260, %259 : vector<2x16x16xf32>
    %262 = arith.addf %257, %261 : vector<2x16x16xf32>
    %c22_46 = arith.constant 22 : index
    %263 = memref.load %arg3[%c22_46] : memref<25xf32, #tpu.memory_space<smem>>
    %264 = vector.extract_strided_slice %252 {offsets = [0, 0, 2], sizes = [2, 16, 16], strides = [1, 1, 1]} : vector<2x16x20xf32> to vector<2x16x16xf32>
    %265 = vector.broadcast %263 : f32 to vector<2x16x16xf32>
    %266 = arith.mulf %265, %264 : vector<2x16x16xf32>
    %267 = arith.addf %262, %266 : vector<2x16x16xf32>
    %c23_47 = arith.constant 23 : index
    %268 = memref.load %arg3[%c23_47] : memref<25xf32, #tpu.memory_space<smem>>
    %269 = vector.extract_strided_slice %252 {offsets = [0, 0, 3], sizes = [2, 16, 16], strides = [1, 1, 1]} : vector<2x16x20xf32> to vector<2x16x16xf32>
    %270 = vector.broadcast %268 : f32 to vector<2x16x16xf32>
    %271 = arith.mulf %270, %269 : vector<2x16x16xf32>
    %272 = arith.addf %267, %271 : vector<2x16x16xf32>
    %c24_48 = arith.constant 24 : index
    %273 = memref.load %arg3[%c24_48] : memref<25xf32, #tpu.memory_space<smem>>
    %274 = vector.extract_strided_slice %252 {offsets = [0, 0, 4], sizes = [2, 16, 16], strides = [1, 1, 1]} : vector<2x16x20xf32> to vector<2x16x16xf32>
    %275 = vector.broadcast %273 : f32 to vector<2x16x16xf32>
    %276 = arith.mulf %275, %274 : vector<2x16x16xf32>
    %277 = arith.addf %272, %276 : vector<2x16x16xf32>
    %c0_49 = arith.constant 0 : index
    %278 = memref.load %arg4[%c0_49] : memref<1xf32, #tpu.memory_space<smem>>
    %279 = vector.broadcast %278 : f32 to vector<2x16x16xf32>
    %280 = arith.addf %277, %279 : vector<2x16x16xf32>
    %cst_50 = arith.constant 0.000000e+00 : f32
    %281 = vector.broadcast %cst_50 : f32 to vector<2x16x16xf32>
    %282 = arith.cmpf ogt, %280, %281 : vector<2x16x16xf32>
    %cst_51 = arith.constant 0.00999999977 : f32
    %283 = vector.broadcast %cst_51 : f32 to vector<2x16x16xf32>
    %284 = arith.mulf %283, %280 : vector<2x16x16xf32>
    %285 = arith.select %282, %280, %284 : vector<2x16x16xi1>, vector<2x16x16xf32>
    %286 = vector.extract_strided_slice %285 {offsets = [0, 0, 0], sizes = [2, 1, 16], strides = [1, 1, 1]} : vector<2x16x16xf32> to vector<2x1x16xf32>
    %287 = vector.shape_cast %286 : vector<2x1x16xf32> to vector<2x16xf32>
    %c0_52 = arith.constant 0 : index
    %c0_53 = arith.constant 0 : index
    %288 = vector.load %arg10[%c0_52, %c0_53] : memref<2x256xf32, #tpu.memory_space<vmem>>, vector<2x16xf32>
    tpu.vector_store %arg10[%c0_52, %c0_53], %287 {strides = array<i32>} : memref<2x256xf32, #tpu.memory_space<vmem>>, vector<2x16xf32>,
    %289 = vector.extract_strided_slice %285 {offsets = [0, 1, 0], sizes = [2, 1, 16], strides = [1, 1, 1]} : vector<2x16x16xf32> to vector<2x1x16xf32>
    %290 = vector.shape_cast %289 : vector<2x1x16xf32> to vector<2x16xf32>
    %c0_54 = arith.constant 0 : index
    %c16_55 = arith.constant 16 : index
    %291 = vector.load %arg10[%c0_54, %c16_55] : memref<2x256xf32, #tpu.memory_space<vmem>>, vector<2x16xf32>
    tpu.vector_store %arg10[%c0_54, %c16_55], %290 {strides = array<i32>} : memref<2x256xf32, #tpu.memory_space<vmem>>, vector<2x16xf32>,
    %292 = vector.extract_strided_slice %285 {offsets = [0, 2, 0], sizes = [2, 1, 16], strides = [1, 1, 1]} : vector<2x16x16xf32> to vector<2x1x16xf32>
    %293 = vector.shape_cast %292 : vector<2x1x16xf32> to vector<2x16xf32>
    %c0_56 = arith.constant 0 : index
    %c32 = arith.constant 32 : index
    %294 = vector.load %arg10[%c0_56, %c32] : memref<2x256xf32, #tpu.memory_space<vmem>>, vector<2x16xf32>
    tpu.vector_store %arg10[%c0_56, %c32], %293 {strides = array<i32>} : memref<2x256xf32, #tpu.memory_space<vmem>>, vector<2x16xf32>,
    %295 = vector.extract_strided_slice %285 {offsets = [0, 3, 0], sizes = [2, 1, 16], strides = [1, 1, 1]} : vector<2x16x16xf32> to vector<2x1x16xf32>
    %296 = vector.shape_cast %295 : vector<2x1x16xf32> to vector<2x16xf32>
    %c0_57 = arith.constant 0 : index
    %c48 = arith.constant 48 : index
    %297 = vector.load %arg10[%c0_57, %c48] : memref<2x256xf32, #tpu.memory_space<vmem>>, vector<2x16xf32>
    tpu.vector_store %arg10[%c0_57, %c48], %296 {strides = array<i32>} : memref<2x256xf32, #tpu.memory_space<vmem>>, vector<2x16xf32>,
    %298 = vector.extract_strided_slice %285 {offsets = [0, 4, 0], sizes = [2, 1, 16], strides = [1, 1, 1]} : vector<2x16x16xf32> to vector<2x1x16xf32>
    %299 = vector.shape_cast %298 : vector<2x1x16xf32> to vector<2x16xf32>
    %c0_58 = arith.constant 0 : index
    %c64 = arith.constant 64 : index
    %300 = vector.load %arg10[%c0_58, %c64] : memref<2x256xf32, #tpu.memory_space<vmem>>, vector<2x16xf32>
    tpu.vector_store %arg10[%c0_58, %c64], %299 {strides = array<i32>} : memref<2x256xf32, #tpu.memory_space<vmem>>, vector<2x16xf32>,
    %301 = vector.extract_strided_slice %285 {offsets = [0, 5, 0], sizes = [2, 1, 16], strides = [1, 1, 1]} : vector<2x16x16xf32> to vector<2x1x16xf32>
    %302 = vector.shape_cast %301 : vector<2x1x16xf32> to vector<2x16xf32>
    %c0_59 = arith.constant 0 : index
    %c80 = arith.constant 80 : index
    %303 = vector.load %arg10[%c0_59, %c80] : memref<2x256xf32, #tpu.memory_space<vmem>>, vector<2x16xf32>
    tpu.vector_store %arg10[%c0_59, %c80], %302 {strides = array<i32>} : memref<2x256xf32, #tpu.memory_space<vmem>>, vector<2x16xf32>,
    %304 = vector.extract_strided_slice %285 {offsets = [0, 6, 0], sizes = [2, 1, 16], strides = [1, 1, 1]} : vector<2x16x16xf32> to vector<2x1x16xf32>
    %305 = vector.shape_cast %304 : vector<2x1x16xf32> to vector<2x16xf32>
    %c0_60 = arith.constant 0 : index
    %c96 = arith.constant 96 : index
    %306 = vector.load %arg10[%c0_60, %c96] : memref<2x256xf32, #tpu.memory_space<vmem>>, vector<2x16xf32>
    tpu.vector_store %arg10[%c0_60, %c96], %305 {strides = array<i32>} : memref<2x256xf32, #tpu.memory_space<vmem>>, vector<2x16xf32>,
    %307 = vector.extract_strided_slice %285 {offsets = [0, 7, 0], sizes = [2, 1, 16], strides = [1, 1, 1]} : vector<2x16x16xf32> to vector<2x1x16xf32>
    %308 = vector.shape_cast %307 : vector<2x1x16xf32> to vector<2x16xf32>
    %c0_61 = arith.constant 0 : index
    %c112 = arith.constant 112 : index
    %309 = vector.load %arg10[%c0_61, %c112] : memref<2x256xf32, #tpu.memory_space<vmem>>, vector<2x16xf32>
    tpu.vector_store %arg10[%c0_61, %c112], %308 {strides = array<i32>} : memref<2x256xf32, #tpu.memory_space<vmem>>, vector<2x16xf32>,
    %310 = vector.extract_strided_slice %285 {offsets = [0, 8, 0], sizes = [2, 1, 16], strides = [1, 1, 1]} : vector<2x16x16xf32> to vector<2x1x16xf32>
    %311 = vector.shape_cast %310 : vector<2x1x16xf32> to vector<2x16xf32>
    %c0_62 = arith.constant 0 : index
    %c128 = arith.constant 128 : index
    %312 = vector.load %arg10[%c0_62, %c128] : memref<2x256xf32, #tpu.memory_space<vmem>>, vector<2x16xf32>
    tpu.vector_store %arg10[%c0_62, %c128], %311 {strides = array<i32>} : memref<2x256xf32, #tpu.memory_space<vmem>>, vector<2x16xf32>,
    %313 = vector.extract_strided_slice %285 {offsets = [0, 9, 0], sizes = [2, 1, 16], strides = [1, 1, 1]} : vector<2x16x16xf32> to vector<2x1x16xf32>
    %314 = vector.shape_cast %313 : vector<2x1x16xf32> to vector<2x16xf32>
    %c0_63 = arith.constant 0 : index
    %c144 = arith.constant 144 : index
    %315 = vector.load %arg10[%c0_63, %c144] : memref<2x256xf32, #tpu.memory_space<vmem>>, vector<2x16xf32>
    tpu.vector_store %arg10[%c0_63, %c144], %314 {strides = array<i32>} : memref<2x256xf32, #tpu.memory_space<vmem>>, vector<2x16xf32>,
    %316 = vector.extract_strided_slice %285 {offsets = [0, 10, 0], sizes = [2, 1, 16], strides = [1, 1, 1]} : vector<2x16x16xf32> to vector<2x1x16xf32>
    %317 = vector.shape_cast %316 : vector<2x1x16xf32> to vector<2x16xf32>
    %c0_64 = arith.constant 0 : index
    %c160 = arith.constant 160 : index
    %318 = vector.load %arg10[%c0_64, %c160] : memref<2x256xf32, #tpu.memory_space<vmem>>, vector<2x16xf32>
    tpu.vector_store %arg10[%c0_64, %c160], %317 {strides = array<i32>} : memref<2x256xf32, #tpu.memory_space<vmem>>, vector<2x16xf32>,
    %319 = vector.extract_strided_slice %285 {offsets = [0, 11, 0], sizes = [2, 1, 16], strides = [1, 1, 1]} : vector<2x16x16xf32> to vector<2x1x16xf32>
    %320 = vector.shape_cast %319 : vector<2x1x16xf32> to vector<2x16xf32>
    %c0_65 = arith.constant 0 : index
    %c176 = arith.constant 176 : index
    %321 = vector.load %arg10[%c0_65, %c176] : memref<2x256xf32, #tpu.memory_space<vmem>>, vector<2x16xf32>
    tpu.vector_store %arg10[%c0_65, %c176], %320 {strides = array<i32>} : memref<2x256xf32, #tpu.memory_space<vmem>>, vector<2x16xf32>,
    %322 = vector.extract_strided_slice %285 {offsets = [0, 12, 0], sizes = [2, 1, 16], strides = [1, 1, 1]} : vector<2x16x16xf32> to vector<2x1x16xf32>
    %323 = vector.shape_cast %322 : vector<2x1x16xf32> to vector<2x16xf32>
    %c0_66 = arith.constant 0 : index
    %c192 = arith.constant 192 : index
    %324 = vector.load %arg10[%c0_66, %c192] : memref<2x256xf32, #tpu.memory_space<vmem>>, vector<2x16xf32>
    tpu.vector_store %arg10[%c0_66, %c192], %323 {strides = array<i32>} : memref<2x256xf32, #tpu.memory_space<vmem>>, vector<2x16xf32>,
    %325 = vector.extract_strided_slice %285 {offsets = [0, 13, 0], sizes = [2, 1, 16], strides = [1, 1, 1]} : vector<2x16x16xf32> to vector<2x1x16xf32>
    %326 = vector.shape_cast %325 : vector<2x1x16xf32> to vector<2x16xf32>
    %c0_67 = arith.constant 0 : index
    %c208 = arith.constant 208 : index
    %327 = vector.load %arg10[%c0_67, %c208] : memref<2x256xf32, #tpu.memory_space<vmem>>, vector<2x16xf32>
    tpu.vector_store %arg10[%c0_67, %c208], %326 {strides = array<i32>} : memref<2x256xf32, #tpu.memory_space<vmem>>, vector<2x16xf32>,
    %328 = vector.extract_strided_slice %285 {offsets = [0, 14, 0], sizes = [2, 1, 16], strides = [1, 1, 1]} : vector<2x16x16xf32> to vector<2x1x16xf32>
    %329 = vector.shape_cast %328 : vector<2x1x16xf32> to vector<2x16xf32>
    %c0_68 = arith.constant 0 : index
    %c224 = arith.constant 224 : index
    %330 = vector.load %arg10[%c0_68, %c224] : memref<2x256xf32, #tpu.memory_space<vmem>>, vector<2x16xf32>
    tpu.vector_store %arg10[%c0_68, %c224], %329 {strides = array<i32>} : memref<2x256xf32, #tpu.memory_space<vmem>>, vector<2x16xf32>,
    %331 = vector.extract_strided_slice %285 {offsets = [0, 15, 0], sizes = [2, 1, 16], strides = [1, 1, 1]} : vector<2x16x16xf32> to vector<2x1x16xf32>
    %332 = vector.shape_cast %331 : vector<2x1x16xf32> to vector<2x16xf32>
    %c0_69 = arith.constant 0 : index
    %c240 = arith.constant 240 : index
    %333 = vector.load %arg10[%c0_69, %c240] : memref<2x256xf32, #tpu.memory_space<vmem>>, vector<2x16xf32>
    tpu.vector_store %arg10[%c0_69, %c240], %332 {strides = array<i32>} : memref<2x256xf32, #tpu.memory_space<vmem>>, vector<2x16xf32>,
    %c0_70 = arith.constant 0 : index
    %c0_71 = arith.constant 0 : index
    %334 = vector.load %arg10[%c0_70, %c0_71] : memref<2x256xf32, #tpu.memory_space<vmem>>, vector<2x256xf32>
    %c0_72 = arith.constant 0 : index
    %c0_73 = arith.constant 0 : index
    %335 = vector.load %arg6[%c0_72, %c0_73] : memref<256x8xf32, #tpu.memory_space<vmem>>, vector<256x8xf32>
    %cst_74 = arith.constant dense<0.000000e+00> : vector<2x8xf32>
    %336 = tpu.matmul %334, %335, %cst_74 {dimension_numbers = #tpu.dot_dimension_numbers<[1], [0], [0], [1], [0, 0, 1, 1], [], []>} : vector<2x256xf32>, vector<256x8xf32>, vector<2x8xf32> -> vector<2x8xf32>
    %c0_75 = arith.constant 0 : index
    %c0_76 = arith.constant 0 : index
    %337 = vector.load %arg7[%c0_75, %c0_76] : memref<1x8xf32, #tpu.memory_space<vmem>>, vector<1x8xf32>
    %338 = vector.broadcast %337 : vector<1x8xf32> to vector<2x8xf32>
    %339 = arith.addf %336, %338 : vector<2x8xf32>
    %c0_77 = arith.constant 0 : index
    %c0_78 = arith.constant 0 : index
    %340 = vector.load %arg8[%c0_77, %c0_78] : memref<2x8xf32, #tpu.memory_space<vmem>>, vector<2x8xf32>
    tpu.vector_store %arg8[%c0_77, %c0_78], %339 {strides = array<i32>} : memref<2x8xf32, #tpu.memory_space<vmem>>, vector<2x8xf32>,
    return
  }
  func.func @transform_0(%arg0: i32) -> i32 {
    %c0_i32 = arith.constant 0 : i32
    %c0_i32_0 = arith.constant 0 : i32
    return %c0_i32 : i32
  }
  func.func @transform_1(%arg0: i32) -> i32 {
    %c0_i32 = arith.constant 0 : i32
    %c0_i32_0 = arith.constant 0 : i32
    return %c0_i32 : i32
  }
  func.func @transform_2(%arg0: i32) -> i32 {
    %c0_i32 = arith.constant 0 : i32
    %c0_i32_0 = arith.constant 0 : i32
    return %c0_i32 : i32
  }
  func.func @transform_3(%arg0: i32) -> i32 {
    %c0_i32 = arith.constant 0 : i32
    %c0_i32_0 = arith.constant 0 : i32
    return %c0_i32 : i32
  }
  func.func @transform_4(%arg0: i32) -> (i32, i32, i32, i32) {
    %c0_i32 = arith.constant 0 : i32
    %c0_i32_0 = arith.constant 0 : i32
    %c0_i32_1 = arith.constant 0 : i32
    %c0_i32_2 = arith.constant 0 : i32
    return %arg0, %c0_i32, %c0_i32_0, %c0_i32_1 : i32, i32, i32, i32
  }
  func.func @transform_5(%arg0: i32) -> (i32, i32) {
    %c0_i32 = arith.constant 0 : i32
    %c0_i32_0 = arith.constant 0 : i32
    %c0_i32_1 = arith.constant 0 : i32
    return %c0_i32, %c0_i32_0 : i32, i32
  }
  func.func @transform_6(%arg0: i32) -> (i32, i32) {
    %c0_i32 = arith.constant 0 : i32
    %c0_i32_0 = arith.constant 0 : i32
    %c0_i32_1 = arith.constant 0 : i32
    return %c0_i32, %c0_i32_0 : i32, i32
  }
  func.func @transform_7(%arg0: i32) -> (i32, i32) {
    %c0_i32 = arith.constant 0 : i32
    %c0_i32_0 = arith.constant 0 : i32
    return %arg0, %c0_i32 : i32, i32
  }
}

</mosaic_0001>

<bundles_post_ra>
// kernel: tpu_custom_call.1
= control target key start
LH: loop header
LB: loop body
LE: loop exit
PB: predicated region body
PF: predicated region fallthrough
CT: control target
= control target key end

     0   :  { %14 = vsyncpa [#allocation8], 0  ;;  %s3751_s0 = inlined_call_operand.vmem [shape: f32[25], index: 0, kind: input, shape index: {}]   ;;  %s3752_s1 = inlined_call_operand.<no memory space> [shape: f32[1], index: 1, kind: input, shape index: {}]   ;;  %s3753_s2 = inlined_call_operand.vmem [shape: f32[25], index: 2, kind: input, shape index: {}]   ;;  %s3754_s3 = inlined_call_operand.<no memory space> [shape: f32[1], index: 3, kind: input, shape index: {}]   ;;  %s3755_s4 = inlined_call_operand.vmem [shape: f32[2,1,16,16], index: 4, kind: input, shape index: {}]   ;;  %s3756_s5 = inlined_call_operand.vmem [shape: f32[256,8], index: 5, kind: input, shape index: {}]   ;;  %s3757_s6 = inlined_call_operand.vmem [shape: f32[1,8], index: 6, kind: input, shape index: {}]   ;;  %s3758_s7 = inlined_call_operand.hbm [shape: f32[2,8], index: 7, kind: output, shape index: {}]  }
   0x1   :  { %15 = vsyncpa [#allocation10], 0 }
   0x2   :  { %16 = vsyncpa [#allocation7], 0  ;;  %s23_s26 = sshll.u32 %s3751_s0, 4  ;;  %s35_s29 = sshll.u32 %s3753_s2, 4  ;;  %s24_s26 = int_to_ptr.vmem [resolvable:$true] %s23_s26  ;;  %s36_s29 = int_to_ptr.vmem [resolvable:$true] %s35_s29 }
   0x3   :  { %s2434_s30 = scalar_lea.vmem %s24_s26, 16  ;;  %p2439_p1 = scmp.lt.s32.totalorder %s24_s26, %s24_s26 }
   0x4   :  { %p2435_p0 = scmp.ne.s32.totalorder %s24_s26, %s2434_s30  ;;  %p2440_p2 = scmp.lt.s32.totalorder %s2434_s30, %s2434_s30 }
   0x6   :  { %p2441_p3 = por %p2440_p2, %p2439_p1 }
   0x8   :  { %p2442_p4 = pnand %p2441_p3, %p2435_p0 }
   0xa   :  { %2445 = shalt.err (!%p2442_p4)
}
   0xb   :  { %s2484_s8 = smov [#allocation6]   ;;  %s2446_s9 = scalar_lea.vmem %s36_s29, 16 }
   0xc   :  { %26 = dma.vmem_to_smem %s24_s26, 16, %s2484_s8, [#allocation8]  }
   0xd   :  { %p2447_p5 = scmp.ne.s32.totalorder %s36_s29, %s2446_s9  ;;  %p2451_p6 = scmp.lt.s32.totalorder %s36_s29, %s36_s29 }
   0xe   :  { %p2452_p7 = scmp.lt.s32.totalorder %s2446_s9, %s2446_s9 }
  0x10   :  { %p2453_p8 = por %p2452_p7, %p2451_p6 }
  0x12   :  { %p2454_p9 = pnand %p2453_p8, %p2447_p5 }
  0x14   :  { %2457 = shalt.err (!%p2454_p9)
}
  0x15   :  { %s2485_s0 = smov [#allocation9]  }
  0x16   :  { %38 = dma.vmem_to_smem %s36_s29, 16, %s2485_s0, [#allocation10]  }
  0x17   :  { %2478 = dma.done.wait [#allocation8], 16  }
  0x18   :  { %2479 = vsyncadd [#allocation8], 4294967280 }
  0x19   :  { %2480 = dma.done.wait [#allocation10], 16  }
  0x1a   :  { %2481 = vsyncadd [#allocation10], 4294967280 }
  0x1b   :  { %53 = sfence }
  0x1c   :  { %v64_v0 = vld [vmem:[%s3755_s4 + $0x10] sm:$0xff]  ;;  %v62_v1 = vld [vmem:[%s3755_s4] sm:$0xff]  ;;  %vm54_vm0 = vcmask 162816   ;;  %s2486_s13 = smov 2   ;;  %vm57_vm1 = vcmask 158720   ;;  %v65_v2 = vld [vmem:[%s3755_s4 + $0x18] sm:$0xff] }
  0x1d   :  { %74 = vrot.lane.b32.xlu0 %v64_v0, %s2486_s13  ;;  %70 = vrot.lane.b32.xlu1 %v62_v1, %s2486_s13  ;;  %v63_v3 = vld [vmem:[%s3755_s4 + $0x8] sm:$0xff]  ;;  %v2487_v4 = vmov 0.0   ;;  %vm82_vm2 = vcmask 146448   ;;  %s2320_s18 = sld [smem:[#allocation6 + $0x1]]  ;;  %s2488_s19 = smov 127   ;;  %vm221_vm3 = vcmask 1046528  }
  0x1e   :  { %59 = vst.msk [vmem:[#allocation2 + $0x18] sm:$0xff] %vm54_vm0, %v2487_v4  ;;  %60 = vst.msk [vmem:[#allocation2 + $0x20] sm:$0xff] %vm54_vm0, %v2487_v4  ;;  %s2321_s4 = sld [smem:[#allocation6 + $0x2]]  ;;  %s2489_s21 = smov 126   ;;  %vm414_vm4 = vcmask 1045504   ;;  %vm607_vm5 = vcmask 1044480  }
  0x1f   :  { %55 = vst.msk [vmem:[#allocation2] sm:$0xff] %vm54_vm0, %v2487_v4  ;;  %56 = vst.msk [vmem:[#allocation2 + $0x8] sm:$0xff] %vm54_vm0, %v2487_v4  ;;  %s2322_s20 = sld [smem:[#allocation6 + $0x3]]  ;;  %s2490_s24 = smov 125   ;;  %vm800_vm6 = vcmask 1043456   ;;  %vm1944_vm13 = vcmask 1041409  }
  0x20   :  { %61 = vst.msk [vmem:[#allocation2 + $0x28] sm:$0xf] %vm57_vm1, %v2487_v4  ;;  %58 = vst.msk [vmem:[#allocation2 + $0x10] sm:$0xf] %vm57_vm1, %v2487_v4  ;;  %s2323_s22 = sld [smem:[#allocation6 + $0x4]]  ;;  %s2491_s26 = smov 124  }
  0x21   :  { %76 = vrot.lane.b32.xlu0 %v65_v2, %s2486_s13  ;;  %72 = vrot.lane.b32.xlu1 %v63_v3, %s2486_s13  ;;  %s2325_s23 = sld [smem:[#allocation6 + $0x6]]  ;;  %vm1946_vm15 = vcmask 1043459   ;;  %vm1948_vm0 = vcmask 1045509   ;;  %vm1950_vm1 = vcmask 1047559  }
  0x22   :  { %s2326_s25 = sld [smem:[#allocation6 + $0x7]] }
  0x23   :  { %v104_v9 = vstv %s2320_s18  ;;  %s2327_s27 = sld [smem:[#allocation6 + $0x8]] }
  0x24   :  { %v130_v17 = vstv %s2321_s4  ;;  %s2328_s28 = sld [smem:[#allocation6 + $0x9]] }
  0x25   :  { %v156_v22 = vstv %s2322_s20  ;;  %s2330_s29 = sld [smem:[#allocation6 + $0xb]] }
  0x26   :  { %v182_v27 = vstv %s2323_s22  ;;  %s2331_s30 = sld [smem:[#allocation6 + $0xc]] }
  0x27   :  { %v241_v30 = vstv %s2325_s23  ;;  %s2332_s8 = sld [smem:[#allocation6 + $0xd]] }
  0x28   :  { %v281_v45 = vstv %s2326_s25  ;;  %s2333_s9 = sld [smem:[#allocation6 + $0xe]] }
  0x29   :  { %v321_v62 = vstv %s2327_s27  ;;  %s2335_s0 = sld [smem:[#allocation6 + $0x10]] }
  0x2a   :  { %s2336_s2 = sld [smem:[#allocation6 + $0x11]] }
  0x2b   :  { %s2337_s10 = sld [smem:[#allocation6 + $0x12]] }
  0x2c   :  { %s2338_s11 = sld [smem:[#allocation6 + $0x13]] }
  0x2d   :  { %s2340_s12 = sld [smem:[#allocation6 + $0x15]] }
  0x2e   :  { %s2341_s14 = sld [smem:[#allocation6 + $0x16]] }
  0x2f   :  { %s2342_s15 = sld [smem:[#allocation6 + $0x17]] }
  0x30   :  { %s2343_s16 = sld [smem:[#allocation6 + $0x18]] }
  0x31   :  { %s93_s17 = sld [smem:[#allocation6]] }
  0x32   :  { %s2324_s18 = sld [smem:[#allocation6 + $0x5]] }
  0x33   :  { %s2329_s4 = sld [smem:[#allocation6 + $0xa]] }
  0x34   :  { %s2334_s20 = sld [smem:[#allocation6 + $0xf]] }
  0x35   :  { %s2339_s22 = sld [smem:[#allocation6 + $0x14]] }
  0x36   :  { %s2345_s27 = sld [smem:[#allocation9 + $0x2]] }
  0x37   :  { %s3316_s23 = sld [smem:[#allocation9 + $0x18]] }
  0x8f   :  { %v75_v5 = vpop.permute.xlu0 %74  ;;  %v71_v6 = vpop.permute.xlu1 %70 }
  0x90   :  { %85 = vst.msk [vmem:[#allocation2 + $0x1a] sm:$0xff] %vm82_vm2, %v75_v5  ;;  %83 = vst.msk [vmem:[#allocation2 + $0x2] sm:$0xff] %vm82_vm2, %v71_v6 }
  0x93   :  { %v77_v7 = vpop.permute.xlu0 %76  ;;  %v73_v8 = vpop.permute.xlu1 %72 }
  0x94   :  { %86 = vst.msk [vmem:[#allocation2 + $0x22] sm:$0xff] %vm82_vm2, %v77_v7  ;;  %84 = vst.msk [vmem:[#allocation2 + $0xa] sm:$0xff] %vm82_vm2, %v73_v8 }
  0x97   :  { %v2567_v10 = vld [vmem:[#allocation2 + $0x18] sm:$0xff]  ;;  %v2569_v11 = vld [vmem:[#allocation2] sm:$0xff] }
  0x98   :  { %v107_v12 = vmul.f32 %v104_v9, %v2567_v10  ;;  %v105_v13 = vmul.f32 %v104_v9, %v2569_v11  ;;  %v133_v19 = vmul.f32 %v130_v17, %v2567_v10  ;;  %v131_v21 = vmul.f32 %v130_v17, %v2569_v11 }
  0x99   :  { %v159_v24 = vmul.f32 %v156_v22, %v2567_v10  ;;  %v157_v26 = vmul.f32 %v156_v22, %v2569_v11  ;;  %v185_v29 = vmul.f32 %v182_v27, %v2567_v10  ;;  %v245_v33 = vmul.f32 %v241_v30, %v2567_v10 }
  0x9a   :  { %117 = vrot.lane.b32.xlu0 %v107_v12, %s2488_s19  ;;  %v183_v35 = vmul.f32 %v182_v27, %v2569_v11  ;;  %v242_v36 = vmul.f32 %v241_v30, %v2569_v11  ;;  %v285_v50 = vmul.f32 %v281_v45, %v2567_v10  ;;  %v282_v53 = vmul.f32 %v281_v45, %v2569_v11 }
  0x9b   :  { %v2574_v14 = vld [vmem:[#allocation2 + $0x20] sm:$0xff]  ;;  %v2577_v16 = vld [vmem:[#allocation2 + $0x8] sm:$0xff]  ;;  %v2608_v37 = vld [vmem:[#allocation2 + $0x10] sm:$0xf]  ;;  %v259_v41 = vrot.slane %v245_v33, 1  ;;  %v325_v3 = vmul.f32 %v321_v62, %v2567_v10  ;;  %v322_v6 = vmul.f32 %v321_v62, %v2569_v11 }
  0x9c   :  { %v108_v15 = vmul.f32 %v104_v9, %v2574_v14  ;;  %v106_v18 = vmul.f32 %v104_v9, %v2577_v16  ;;  %v134_v20 = vmul.f32 %v130_v17, %v2574_v14  ;;  %v132_v23 = vmul.f32 %v130_v17, %v2577_v16  ;;  %v2600_v32 = vld [vmem:[#allocation2 + $0x28] sm:$0xf] }
  0x9d   :  { %v160_v25 = vmul.f32 %v156_v22, %v2574_v14  ;;  %v158_v28 = vmul.f32 %v156_v22, %v2577_v16  ;;  %v246_v31 = vmul.f32 %v241_v30, %v2574_v14  ;;  %v186_v34 = vmul.f32 %v182_v27, %v2574_v14 }
  0x9e   :  { %119 = vrot.lane.b32.xlu1 %v108_v15, %s2488_s19  ;;  %113 = vrot.lane.b32.xlu0 %v105_v13, %s2488_s19  ;;  %v247_v39 = vmul.f32 %v241_v30, %v2600_v32  ;;  %v243_v40 = vmul.f32 %v241_v30, %v2577_v16  ;;  %v184_v42 = vmul.f32 %v182_v27, %v2577_v16  ;;  %v254_v43 = vrot.slane %v242_v36, 1 }
  0x9f   :  { %v260_v38 = vrot.slane %v246_v31, 1  ;;  %v244_v44 = vmul.f32 %v241_v30, %v2608_v37  ;;  %v286_v49 = vmul.f32 %v281_v45, %v2574_v14  ;;  %v287_v52 = vmul.f32 %v281_v45, %v2600_v32 }
  0xa0   :  { %v262_v47 = vrot.slane %v247_v39, 1  ;;  %v255_v48 = vrot.slane %v243_v40, 1  ;;  %v283_v57 = vmul.f32 %v281_v45, %v2577_v16  ;;  %v299_v58 = vrot.slane %v285_v50, 1 }
  0xa1   :  { %v261_v46 = vsel %vm221_vm3, %v259_v41, %v260_v38  ;;  %v257_v51 = vrot.slane %v244_v44, 1  ;;  %v300_v56 = vrot.slane %v286_v49, 1  ;;  %v302_v60 = vrot.slane %v287_v52, 1 }
  0xa2   :  { %115 = vrot.lane.b32.xlu1 %v106_v18, %s2488_s19  ;;  %143 = vrot.lane.b32.xlu0 %v133_v19, %s2489_s21  ;;  %v263_v54 = vsel %vm221_vm3, %v260_v38, %v262_v47  ;;  %v256_v55 = vsel %vm221_vm3, %v254_v43, %v255_v48  ;;  %v294_v61 = vrot.slane %v282_v53, 1  ;;  %v295_v0 = vrot.slane %v283_v57, 1 }
  0xa3   :  { %v258_v59 = vsel %vm221_vm3, %v255_v48, %v257_v51  ;;  %v301_v63 = vsel %vm221_vm3, %v299_v58, %v300_v56  ;;  %v284_v1 = vmul.f32 %v281_v45, %v2608_v37  ;;  %v326_v2 = vmul.f32 %v321_v62, %v2574_v14 }
  0xa4   :  { %v303_v4 = vsel %vm221_vm3, %v300_v56, %v302_v60  ;;  %v327_v5 = vmul.f32 %v321_v62, %v2600_v32  ;;  %v296_v7 = vsel %vm221_vm3, %v294_v61, %v295_v0  ;;  %v323_v12 = vmul.f32 %v321_v62, %v2577_v16 }
  0xa5   :  { %v297_v8 = vrot.slane %v284_v1, 1  ;;  %v340_v9 = vrot.slane %v326_v2, 1  ;;  %v339_v13 = vrot.slane %v325_v3, 1  ;;  %v334_v17 = vrot.slane %v322_v6, 1 }
  0xa6   :  { %145 = vrot.lane.b32.xlu1 %v134_v20, %s2489_s21  ;;  %139 = vrot.lane.b32.xlu0 %v131_v21, %s2489_s21  ;;  %v342_v15 = vrot.slane %v327_v5, 1  ;;  %v324_v18 = vmul.f32 %v321_v62, %v2608_v37  ;;  %v361_v19 = vstv %s2328_s28  ;;  %v335_v22 = vrot.slane %v323_v12, 1  ;;  %s2347_s28 = sld [smem:[#allocation9 + $0x4]] }
  0xa7   :  { %v298_v20 = vsel %vm221_vm3, %v295_v0, %v297_v8  ;;  %v341_v21 = vsel %vm221_vm3, %v339_v13, %v340_v9  ;;  %v362_v27 = vmul.f32 %v361_v19, %v2569_v11  ;;  %v363_v31 = vmul.f32 %v361_v19, %v2577_v16 }
  0xa8   :  { %v364_v36 = vmul.f32 %v361_v19, %v2608_v37  ;;  %v434_v38 = vstv %s2330_s29  ;;  %v514_v8 = vstv %s2332_s8  ;;  %s2349_s29 = sld [smem:[#allocation9 + $0x6]] }
  0xa9   :  { %v375_v41 = vrot.slane %v363_v31, 1  ;;  %v438_v43 = vmul.f32 %v434_v38, %v2567_v10  ;;  %v435_v49 = vmul.f32 %v434_v38, %v2569_v11  ;;  %v436_v50 = vmul.f32 %v434_v38, %v2577_v16  ;;  %s2351_s8 = sld [smem:[#allocation9 + $0x8]] }
  0xaa   :  { %141 = vrot.lane.b32.xlu1 %v132_v23, %s2489_s21  ;;  %169 = vrot.lane.b32.xlu0 %v159_v24, %s2490_s24  ;;  %v366_v23 = vmul.f32 %v361_v19, %v2574_v14  ;;  %v365_v24 = vmul.f32 %v361_v19, %v2567_v10  ;;  %v377_v45 = vrot.slane %v364_v36, 1 }
  0xab   :  { %v452_v51 = vrot.slane %v438_v43, 2  ;;  %v447_v57 = vrot.slane %v435_v49, 2  ;;  %v448_v58 = vrot.slane %v436_v50, 2 }
  0xac   :  { %v380_v30 = vrot.slane %v366_v23, 1  ;;  %v379_v33 = vrot.slane %v365_v24, 1  ;;  %v378_v52 = vsel %vm221_vm3, %v375_v41, %v377_v45  ;;  %v515_v23 = vmul.f32 %v514_v8, %v2569_v11 }
  0xad   :  { %v449_v0 = vsel %vm414_vm4, %v447_v57, %v448_v58  ;;  %v516_v24 = vmul.f32 %v514_v8, %v2577_v16 }
  0xae   :  { %171 = vrot.lane.b32.xlu1 %v160_v25, %s2490_s24  ;;  %165 = vrot.lane.b32.xlu0 %v157_v26, %s2490_s24  ;;  %v343_v25 = vsel %vm221_vm3, %v340_v9, %v342_v15  ;;  %v367_v26 = vmul.f32 %v361_v19, %v2600_v32  ;;  %v381_v40 = vsel %vm221_vm3, %v379_v33, %v380_v30  ;;  %v527_v31 = vrot.slane %v515_v23, 2 }
  0xaf   :  { %v519_v15 = vmul.f32 %v514_v8, %v2574_v14  ;;  %v528_v33 = vrot.slane %v516_v24, 2 }
  0xb2   :  { %167 = vrot.lane.b32.xlu1 %v158_v28, %s2490_s24  ;;  %195 = vrot.lane.b32.xlu0 %v185_v29, %s2491_s26  ;;  %v336_v28 = vsel %vm221_vm3, %v334_v17, %v335_v22  ;;  %v337_v29 = vrot.slane %v324_v18, 1  ;;  %v518_v17 = vmul.f32 %v514_v8, %v2567_v10 }
  0xb4   :  { %v338_v39 = vsel %vm221_vm3, %v335_v22, %v337_v29  ;;  %v533_v22 = vrot.slane %v519_v15, 2  ;;  %v554_v29 = vstv %s2333_s9  ;;  %s2352_s9 = sld [smem:[#allocation9 + $0x9]] }
  0xb5   :  { %v556_v43 = vmul.f32 %v554_v29, %v2577_v16 }
  0xb6   :  { %197 = vrot.lane.b32.xlu1 %v186_v34, %s2491_s26  ;;  %191 = vrot.lane.b32.xlu0 %v183_v35, %s2491_s26  ;;  %v382_v34 = vrot.slane %v367_v26, 1  ;;  %v374_v35 = vrot.slane %v362_v27, 1 }
  0xb8   :  { %v383_v44 = vsel %vm221_vm3, %v380_v30, %v382_v34  ;;  %v376_v47 = vsel %vm221_vm3, %v374_v35, %v375_v41  ;;  %v559_v34 = vmul.f32 %v554_v29, %v2574_v14  ;;  %v558_v35 = vmul.f32 %v554_v29, %v2567_v10 }
  0xba   :  { %193 = vrot.lane.b32.xlu1 %v184_v42, %s2491_s26  ;;  %268 = vrot.lane.b32.xlu0 %v261_v46, %s2488_s19  ;;  %v439_v42 = vmul.f32 %v434_v38, %v2574_v14  ;;  %v440_v46 = vmul.f32 %v434_v38, %v2600_v32  ;;  %v573_v41 = vrot.slane %v559_v34, 2 }
  0xbc   :  { %v453_v48 = vrot.slane %v439_v42, 2  ;;  %v455_v53 = vrot.slane %v440_v46, 2  ;;  %v555_v42 = vmul.f32 %v554_v29, %v2569_v11 }
  0xbe   :  { %270 = vrot.lane.b32.xlu1 %v263_v54, %s2488_s19  ;;  %264 = vrot.lane.b32.xlu0 %v256_v55, %s2488_s19  ;;  %v437_v54 = vmul.f32 %v434_v38, %v2608_v37  ;;  %v474_v55 = vstv %s2331_s30  ;;  %v454_v56 = vsel %vm414_vm4, %v452_v51, %v453_v48  ;;  %v456_v61 = vsel %vm414_vm4, %v453_v48, %v455_v53  ;;  %s2350_s30 = sld [smem:[#allocation9 + $0x7]] }
  0xbf   :  { %v478_v60 = vmul.f32 %v474_v55, %v2567_v10  ;;  %v475_v2 = vmul.f32 %v474_v55, %v2569_v11  ;;  %v476_v3 = vmul.f32 %v474_v55, %v2577_v16  ;;  %v627_v48 = vstv %s2335_s0  ;;  %s2354_s0 = sld [smem:[#allocation9 + $0xb]] }
  0xc0   :  { %v450_v62 = vrot.slane %v437_v54, 2  ;;  %v567_v50 = vrot.slane %v555_v42, 2  ;;  %v568_v51 = vrot.slane %v556_v43, 2  ;;  %v631_v53 = vmul.f32 %v627_v48, %v2567_v10 }
  0xc1   :  { %v487_v12 = vrot.slane %v475_v2, 2  ;;  %v488_v13 = vrot.slane %v476_v3, 2 }
  0xc2   :  { %266 = vrot.lane.b32.xlu1 %v258_v59, %s2488_s19  ;;  %308 = vrot.lane.b32.xlu0 %v301_v63, %s2489_s21  ;;  %v479_v59 = vmul.f32 %v474_v55, %v2574_v14  ;;  %v480_v63 = vmul.f32 %v474_v55, %v2600_v32  ;;  %v451_v5 = vsel %vm414_vm4, %v448_v58, %v450_v62 }
  0xc3   :  { %v569_v57 = vsel %vm414_vm4, %v567_v50, %v568_v51 }
  0xc4   :  { %v493_v1 = vrot.slane %v479_v59, 2  ;;  %v495_v6 = vrot.slane %v480_v63, 2  ;;  %v628_v59 = vmul.f32 %v627_v48, %v2569_v11 }
  0xc6   :  { %310 = vrot.lane.b32.xlu1 %v303_v4, %s2489_s21  ;;  %304 = vrot.lane.b32.xlu0 %v296_v7, %s2489_s21  ;;  %v492_v4 = vrot.slane %v478_v60, 2  ;;  %v477_v7 = vmul.f32 %v474_v55, %v2608_v37  ;;  %v496_v18 = vsel %vm414_vm4, %v493_v1, %v495_v6  ;;  %v629_v60 = vmul.f32 %v627_v48, %v2577_v16 }
  0xc7   :  { %v640_v3 = vrot.slane %v628_v59, 3 }
  0xc8   :  { %v494_v9 = vsel %vm414_vm4, %v492_v4, %v493_v1  ;;  %v490_v19 = vrot.slane %v477_v7, 2  ;;  %v667_v1 = vstv %s2336_s2  ;;  %v641_v4 = vrot.slane %v629_v60, 3  ;;  %s2355_s2 = sld [smem:[#allocation9 + $0xc]] }
  0xc9   :  { %v671_v6 = vmul.f32 %v667_v1, %v2567_v10  ;;  %v668_v15 = vmul.f32 %v667_v1, %v2569_v11 }
  0xca   :  { %306 = vrot.lane.b32.xlu1 %v298_v20, %s2489_s21  ;;  %348 = vrot.lane.b32.xlu0 %v341_v21, %s2490_s24  ;;  %v520_v20 = vmul.f32 %v514_v8, %v2600_v32  ;;  %v489_v21 = vsel %vm414_vm4, %v487_v12, %v488_v13  ;;  %v491_v26 = vsel %vm414_vm4, %v488_v13, %v490_v19 }
  0xcb   :  { %v642_v12 = vsel %vm607_vm5, %v640_v3, %v641_v4  ;;  %v680_v24 = vrot.slane %v668_v15, 3 }
  0xcc   :  { %v535_v27 = vrot.slane %v520_v20, 2 }
  0xce   :  { %350 = vrot.lane.b32.xlu1 %v343_v25, %s2490_s24  ;;  %344 = vrot.lane.b32.xlu0 %v336_v28, %s2490_s24  ;;  %v532_v25 = vrot.slane %v518_v17, 2  ;;  %v517_v28 = vmul.f32 %v514_v8, %v2608_v37  ;;  %v536_v36 = vsel %vm414_vm4, %v533_v22, %v535_v27  ;;  %v669_v17 = vmul.f32 %v667_v1, %v2577_v16 }
  0xd0   :  { %v534_v30 = vsel %vm414_vm4, %v532_v25, %v533_v22  ;;  %v530_v38 = vrot.slane %v517_v28, 2  ;;  %v707_v22 = vstv %s2337_s10  ;;  %v681_v25 = vrot.slane %v669_v17, 3  ;;  %s2356_s10 = sld [smem:[#allocation9 + $0xd]] }
  0xd1   :  { %v711_v27 = vmul.f32 %v707_v22, %v2567_v10  ;;  %v708_v34 = vmul.f32 %v707_v22, %v2569_v11 }
  0xd2   :  { %346 = vrot.lane.b32.xlu1 %v338_v39, %s2490_s24  ;;  %388 = vrot.lane.b32.xlu0 %v381_v40, %s2491_s26  ;;  %v560_v39 = vmul.f32 %v554_v29, %v2600_v32  ;;  %v529_v40 = vsel %vm414_vm4, %v527_v31, %v528_v33  ;;  %v531_v45 = vsel %vm414_vm4, %v528_v33, %v530_v38 }
  0xd3   :  { %v682_v31 = vsel %vm607_vm5, %v680_v24, %v681_v25  ;;  %v720_v43 = vrot.slane %v708_v34, 3 }
  0xd4   :  { %v575_v46 = vrot.slane %v560_v39, 2 }
  0xd6   :  { %390 = vrot.lane.b32.xlu1 %v383_v44, %s2491_s26  ;;  %384 = vrot.lane.b32.xlu0 %v376_v47, %s2491_s26  ;;  %v572_v44 = vrot.slane %v558_v35, 2  ;;  %v557_v47 = vmul.f32 %v554_v29, %v2608_v37  ;;  %v576_v54 = vsel %vm414_vm4, %v573_v41, %v575_v46  ;;  %v709_v35 = vmul.f32 %v707_v22, %v2577_v16 }
  0xd8   :  { %v574_v49 = vsel %vm414_vm4, %v572_v44, %v573_v41  ;;  %v570_v55 = vrot.slane %v557_v47, 2  ;;  %v747_v41 = vstv %s2338_s11  ;;  %v721_v44 = vrot.slane %v709_v35, 3  ;;  %s2357_s11 = sld [smem:[#allocation9 + $0xe]] }
  0xd9   :  { %v751_v46 = vmul.f32 %v747_v41, %v2567_v10  ;;  %v753_v50 = vmul.f32 %v747_v41, %v2600_v32  ;;  %v750_v60 = vmul.f32 %v747_v41, %v2608_v37 }
  0xda   :  { %386 = vrot.lane.b32.xlu1 %v378_v52, %s2491_s26  ;;  %461 = vrot.lane.b32.xlu0 %v454_v56, %s2488_s19  ;;  %v632_v52 = vmul.f32 %v627_v48, %v2574_v14  ;;  %v633_v56 = vmul.f32 %v627_v48, %v2600_v32  ;;  %v571_v62 = vsel %vm414_vm4, %v568_v51, %v570_v55 }
  0xdb   :  { %v722_v51 = vsel %vm607_vm5, %v720_v43, %v721_v44  ;;  %v765_v55 = vrot.slane %v751_v46, 3  ;;  %v768_v59 = vrot.slane %v753_v50, 3 }
  0xdc   :  { %v646_v58 = vrot.slane %v632_v52, 3  ;;  %v648_v63 = vrot.slane %v633_v56, 3 }
  0xde   :  { %463 = vrot.lane.b32.xlu1 %v456_v61, %s2488_s19  ;;  %457 = vrot.lane.b32.xlu0 %v449_v0, %s2488_s19  ;;  %v645_v61 = vrot.slane %v631_v53, 3  ;;  %v630_v0 = vmul.f32 %v627_v48, %v2608_v37  ;;  %v649_v7 = vsel %vm607_vm5, %v646_v58, %v648_v63  ;;  %v748_v53 = vmul.f32 %v747_v41, %v2569_v11 }
  0xe0   :  { %v647_v2 = vsel %vm607_vm5, %v645_v61, %v646_v58  ;;  %v643_v8 = vrot.slane %v630_v0, 3  ;;  %v820_v61 = vstv %s2340_s12  ;;  %v760_v63 = vrot.slane %v748_v53, 3  ;;  %s2359_s12 = sld [smem:[#allocation9 + $0x10]] }
  0xe2   :  { %459 = vrot.lane.b32.xlu1 %v451_v5, %s2488_s19  ;;  %501 = vrot.lane.b32.xlu0 %v494_v9, %s2489_s21  ;;  %v672_v5 = vmul.f32 %v667_v1, %v2574_v14  ;;  %v673_v9 = vmul.f32 %v667_v1, %v2600_v32  ;;  %v644_v19 = vsel %vm607_vm5, %v641_v4, %v643_v8 }
  0xe4   :  { %v686_v13 = vrot.slane %v672_v5, 3  ;;  %v688_v20 = vrot.slane %v673_v9, 3 }
  0xe6   :  { %503 = vrot.lane.b32.xlu1 %v496_v18, %s2489_s21  ;;  %497 = vrot.lane.b32.xlu0 %v489_v21, %s2489_s21  ;;  %v685_v18 = vrot.slane %v671_v6, 3  ;;  %v670_v21 = vmul.f32 %v667_v1, %v2608_v37  ;;  %v689_v28 = vsel %vm607_vm5, %v686_v13, %v688_v20  ;;  %v825_v1 = vmul.f32 %v820_v61, %v2574_v14 }
  0xe7   :  { %v763_v6 = vrot.slane %v750_v60, 3 }
  0xe8   :  { %v687_v23 = vsel %vm607_vm5, %v685_v18, %v686_v13  ;;  %v683_v29 = vrot.slane %v670_v21, 3  ;;  %v839_v9 = vrot.slane %v825_v1, 4  ;;  %v822_v13 = vmul.f32 %v820_v61, %v2577_v16 }
  0xe9   :  { %v823_v21 = vmul.f32 %v820_v61, %v2608_v37 }
  0xea   :  { %499 = vrot.lane.b32.xlu1 %v491_v26, %s2489_s21  ;;  %541 = vrot.lane.b32.xlu0 %v534_v30, %s2490_s24  ;;  %v712_v26 = vmul.f32 %v707_v22, %v2574_v14  ;;  %v713_v30 = vmul.f32 %v707_v22, %v2600_v32  ;;  %v684_v38 = vsel %vm607_vm5, %v681_v25, %v683_v29  ;;  %v834_v25 = vrot.slane %v822_v13, 4 }
  0xec   :  { %v726_v33 = vrot.slane %v712_v26, 3  ;;  %v728_v39 = vrot.slane %v713_v30, 3  ;;  %v836_v30 = vrot.slane %v823_v21, 4 }
  0xee   :  { %543 = vrot.lane.b32.xlu1 %v536_v36, %s2490_s24  ;;  %537 = vrot.lane.b32.xlu0 %v529_v40, %s2490_s24  ;;  %v725_v36 = vrot.slane %v711_v27, 3  ;;  %v710_v40 = vmul.f32 %v707_v22, %v2608_v37  ;;  %v729_v48 = vsel %vm607_vm5, %v726_v33, %v728_v39  ;;  %v860_v22 = vstv %s2341_s14  ;;  %s2360_s14 = sld [smem:[#allocation9 + $0x11]] }
  0xef   :  { %v865_v26 = vmul.f32 %v860_v22, %v2574_v14  ;;  %v864_v27 = vmul.f32 %v860_v22, %v2567_v10 }
  0xf0   :  { %v727_v42 = vsel %vm607_vm5, %v725_v36, %v726_v33  ;;  %v861_v33 = vmul.f32 %v860_v22, %v2569_v11 }
  0xf1   :  { %v879_v36 = vrot.slane %v865_v26, 4  ;;  %v878_v39 = vrot.slane %v864_v27, 4 }
  0xf2   :  { %539 = vrot.lane.b32.xlu1 %v531_v45, %s2490_s24  ;;  %581 = vrot.lane.b32.xlu0 %v574_v49, %s2491_s26  ;;  %v752_v45 = vmul.f32 %v747_v41, %v2574_v14  ;;  %v723_v49 = vrot.slane %v710_v40, 3 }
  0xf3   :  { %v880_v46 = vsel %vm800_vm6, %v878_v39, %v879_v36 }
  0xf4   :  { %v766_v52 = vrot.slane %v752_v45, 3  ;;  %v724_v58 = vsel %vm607_vm5, %v721_v44, %v723_v49  ;;  %v873_v44 = vrot.slane %v861_v33, 4  ;;  %v900_v45 = vstv %s2342_s15  ;;  %s2361_s15 = sld [smem:[#allocation9 + $0x12]] }
  0xf5   :  { %v863_v49 = vmul.f32 %v860_v22, %v2608_v37  ;;  %v905_v50 = vmul.f32 %v900_v45, %v2574_v14 }
  0xf6   :  { %583 = vrot.lane.b32.xlu1 %v576_v54, %s2491_s26  ;;  %577 = vrot.lane.b32.xlu0 %v569_v57, %s2491_s26  ;;  %v749_v54 = vmul.f32 %v747_v41, %v2577_v16  ;;  %v769_v5 = vsel %vm607_vm5, %v766_v52, %v768_v59 }
  0xf8   :  { %v761_v0 = vrot.slane %v749_v54, 3  ;;  %v906_v54 = vmul.f32 %v900_v45, %v2600_v32 }
  0xfa   :  { %579 = vrot.lane.b32.xlu1 %v571_v62, %s2491_s26  ;;  %654 = vrot.lane.b32.xlu0 %v647_v2, %s2488_s19  ;;  %v767_v62 = vsel %vm607_vm5, %v765_v55, %v766_v52  ;;  %v824_v2 = vmul.f32 %v820_v61, %v2567_v10  ;;  %v762_v8 = vsel %vm607_vm5, %v760_v63, %v761_v0 }
  0xfb   :  { %v901_v55 = vmul.f32 %v900_v45, %v2569_v11 }
  0xfc   :  { %v838_v15 = vrot.slane %v824_v2, 4 }
  0xfe   :  { %656 = vrot.lane.b32.xlu1 %v649_v7, %s2488_s19  ;;  %650 = vrot.lane.b32.xlu0 %v642_v12, %s2488_s19  ;;  %v826_v7 = vmul.f32 %v820_v61, %v2600_v32  ;;  %v821_v12 = vmul.f32 %v820_v61, %v2569_v11  ;;  %v876_v61 = vrot.slane %v863_v49, 4 }
 0x100   :  { %v841_v20 = vrot.slane %v826_v7, 4  ;;  %v833_v24 = vrot.slane %v821_v12, 4 }
 0x102   :  { %652 = vrot.lane.b32.xlu1 %v644_v19, %s2488_s19  ;;  %694 = vrot.lane.b32.xlu0 %v687_v23, %s2489_s21  ;;  %v764_v19 = vsel %vm607_vm5, %v761_v0, %v763_v6  ;;  %v840_v23 = vsel %vm800_vm6, %v838_v15, %v839_v9  ;;  %v842_v34 = vsel %vm800_vm6, %v839_v9, %v841_v20  ;;  %v940_v0 = vstv %s2343_s16  ;;  %s2362_s16 = sld [smem:[#allocation9 + $0x13]] }
 0x103   :  { %v835_v35 = vsel %vm800_vm6, %v833_v24, %v834_v25  ;;  %v913_v6 = vrot.slane %v901_v55, 4  ;;  %v945_v13 = vmul.f32 %v940_v0, %v2574_v14  ;;  %v944_v15 = vmul.f32 %v940_v0, %v2567_v10 }
 0x104   :  { %v941_v26 = vmul.f32 %v940_v0, %v2569_v11  ;;  %v942_v27 = vmul.f32 %v940_v0, %v2577_v16 }
 0x105   :  { %v959_v24 = vrot.slane %v945_v13, 4 }
 0x106   :  { %696 = vrot.lane.b32.xlu1 %v689_v28, %s2489_s21  ;;  %690 = vrot.lane.b32.xlu0 %v682_v31, %s2489_s21  ;;  %v866_v31 = vmul.f32 %v860_v22, %v2600_v32  ;;  %v953_v39 = vrot.slane %v941_v26, 4 }
 0x108   :  { %v881_v43 = vrot.slane %v866_v31, 4 }
 0x10a   :  { %692 = vrot.lane.b32.xlu1 %v684_v38, %s2489_s21  ;;  %734 = vrot.lane.b32.xlu0 %v727_v42, %s2490_s24  ;;  %v862_v38 = vmul.f32 %v860_v22, %v2577_v16  ;;  %v837_v42 = vsel %vm800_vm6, %v834_v25, %v836_v30  ;;  %v882_v59 = vsel %vm800_vm6, %v879_v36, %v881_v43  ;;  %v958_v30 = vrot.slane %v944_v15, 4 }
 0x10b   :  { %v946_v25 = vmul.f32 %v940_v0, %v2600_v32 }
 0x10c   :  { %v2761_v47 = vpop.permute.xlu0 %117  ;;  %v960_v36 = vsel %vm800_vm6, %v958_v30, %v959_v24  ;;  %v94_v30 = vstv %s93_s17  ;;  %s1023_s17 = sld [smem:[#allocation9]] }
 0x10e   :  { %736 = vrot.lane.b32.xlu1 %v729_v48, %s2490_s24  ;;  %730 = vrot.lane.b32.xlu0 %v722_v51, %s2490_s24  ;;  %v874_v48 = vrot.slane %v862_v38, 4  ;;  %v904_v51 = vmul.f32 %v900_v45, %v2567_v10  ;;  %v961_v38 = vrot.slane %v946_v25, 4 }
 0x110   :  { %v2770_v56 = vpop.permute.xlu1 %119  ;;  %v2772_v57 = vpop.permute.xlu0 %113  ;;  %v875_v60 = vsel %vm800_vm6, %v873_v44, %v874_v48  ;;  %v918_v63 = vrot.slane %v904_v51, 4  ;;  %v877_v9 = vsel %vm800_vm6, %v874_v48, %v876_v61 }
 0x112   :  { %732 = vrot.lane.b32.xlu1 %v724_v58, %s2490_s24  ;;  %774 = vrot.lane.b32.xlu0 %v767_v62, %s2491_s26  ;;  %v902_v58 = vmul.f32 %v900_v45, %v2577_v16  ;;  %v919_v62 = vrot.slane %v905_v50, 4 }
 0x114   :  { %v2781_v3 = vpop.permute.xlu1 %115  ;;  %v2783_v4 = vpop.permute.xlu0 %143  ;;  %v914_v7 = vrot.slane %v902_v58, 4  ;;  %v920_v12 = vsel %vm800_vm6, %v918_v63, %v919_v62 }
 0x116   :  { %776 = vrot.lane.b32.xlu1 %v769_v5, %s2491_s26  ;;  %770 = vrot.lane.b32.xlu0 %v762_v8, %s2491_s26  ;;  %v921_v5 = vrot.slane %v906_v54, 4  ;;  %v903_v8 = vmul.f32 %v900_v45, %v2608_v37  ;;  %v915_v22 = vsel %vm800_vm6, %v913_v6, %v914_v7  ;;  %v962_v45 = vsel %vm800_vm6, %v959_v24, %v961_v38 }
 0x117   :  { %v208_v38 = vstv %s2324_s18  ;;  %s2364_s18 = sld [smem:[#allocation9 + $0x15]] }
 0x118   :  { %v2792_v17 = vpop.permute.xlu1 %145  ;;  %v2794_v18 = vpop.permute.xlu0 %139  ;;  %v922_v21 = vsel %vm800_vm6, %v919_v62, %v921_v5 }
 0x11a   :  { %772 = vrot.lane.b32.xlu1 %v764_v19, %s2491_s26  ;;  %847 = vrot.lane.b32.xlu0 %v840_v23, %s2488_s19  ;;  %v916_v23 = vrot.slane %v903_v8, 4 }
 0x11c   :  { %v2803_v28 = vpop.permute.xlu1 %141  ;;  %v2805_v29 = vpop.permute.xlu0 %169 }
 0x11e   :  { %849 = vrot.lane.b32.xlu1 %v842_v34, %s2488_s19  ;;  %843 = vrot.lane.b32.xlu0 %v835_v35, %s2488_s19  ;;  %v917_v34 = vsel %vm800_vm6, %v914_v7, %v916_v23  ;;  %v943_v35 = vmul.f32 %v940_v0, %v2608_v37 }
 0x120   :  { %v2814_v40 = vpop.permute.xlu1 %171  ;;  %v2816_v41 = vpop.permute.xlu0 %165  ;;  %v956_v48 = vrot.slane %v943_v35, 4 }
 0x122   :  { %845 = vrot.lane.b32.xlu1 %v837_v42, %s2488_s19  ;;  %887 = vrot.lane.b32.xlu0 %v880_v46, %s2489_s21  ;;  %v954_v42 = vrot.slane %v942_v27, 4 }
 0x124   :  { %v2825_v52 = vpop.permute.xlu1 %167  ;;  %v2827_v53 = vpop.permute.xlu0 %195  ;;  %v955_v46 = vsel %vm800_vm6, %v953_v39, %v954_v42  ;;  %v957_v51 = vsel %vm800_vm6, %v954_v42, %v956_v48  ;;  %v213_v42 = vmul.f32 %v208_v38, %v2574_v14  ;;  %v98_v48 = vmul.f32 %v94_v30, %v2574_v14 }
 0x126   :  { %889 = vrot.lane.b32.xlu1 %v882_v59, %s2489_s21  ;;  %883 = vrot.lane.b32.xlu0 %v875_v60, %s2489_s21 }
 0x128   :  { %v2836_v1 = vpop.permute.xlu1 %197  ;;  %v2838_v2 = vpop.permute.xlu0 %191 }
 0x12a   :  { %885 = vrot.lane.b32.xlu1 %v877_v9, %s2489_s21  ;;  %927 = vrot.lane.b32.xlu0 %v920_v12, %s2490_s24 }
 0x12c   :  { %v2847_v19 = vpop.permute.xlu1 %193  ;;  %v2849_v20 = vpop.permute.xlu0 %268 }
 0x12e   :  { %929 = vrot.lane.b32.xlu1 %v922_v21, %s2490_s24  ;;  %923 = vrot.lane.b32.xlu0 %v915_v22, %s2490_s24 }
 0x130   :  { %v2858_v31 = vpop.permute.xlu1 %270  ;;  %v2860_v33 = vpop.permute.xlu0 %264 }
 0x132   :  { %925 = vrot.lane.b32.xlu1 %v917_v34, %s2490_s24  ;;  %967 = vrot.lane.b32.xlu0 %v960_v36, %s2491_s26  ;;  %v97_v36 = vmul.f32 %v94_v30, %v2567_v10 }
 0x134   :  { %v2867_v43 = vpop.permute.xlu1 %266  ;;  %v2869_v44 = vpop.permute.xlu0 %308  ;;  %v127_v39 = vadd.f32 %v2761_v47, %v97_v36  ;;  %v228_v36 = vrot.slane %v213_v42, 1 }
 0x136   :  { %969 = vrot.lane.b32.xlu1 %v962_v45, %s2491_s26  ;;  %963 = vrot.lane.b32.xlu0 %v955_v46, %s2491_s26 }
 0x138   :  { %v2875_v49 = vpop.permute.xlu1 %310  ;;  %v2877_v50 = vpop.permute.xlu0 %304 }
 0x13a   :  { %965 = vrot.lane.b32.xlu1 %v957_v51, %s2491_s26  ;;  %v95_v51 = vmul.f32 %v94_v30, %v2569_v11 }
 0x13c   :  { %v2881_v54 = vpop.permute.xlu1 %306  ;;  %v2883_v55 = vpop.permute.xlu0 %348 }
 0x140   :  { %v2885_v58 = vpop.permute.xlu1 %350  ;;  %v2887_v59 = vpop.permute.xlu0 %344 }
 0x144   :  { %v2889_v60 = vpop.permute.xlu1 %346  ;;  %v2891_v61 = vpop.permute.xlu0 %388 }
 0x148   :  { %v2893_v62 = vpop.permute.xlu1 %390  ;;  %v2895_v63 = vpop.permute.xlu0 %384 }
 0x14c   :  { %v2897_v0 = vpop.permute.xlu1 %386  ;;  %v2899_v5 = vpop.permute.xlu0 %461 }
 0x150   :  { %v2901_v6 = vpop.permute.xlu1 %463  ;;  %v2903_v7 = vpop.permute.xlu0 %457 }
 0x154   :  { %v2905_v8 = vpop.permute.xlu1 %459  ;;  %v2907_v9 = vpop.permute.xlu0 %501 }
 0x158   :  { %v2909_v12 = vpop.permute.xlu1 %503  ;;  %v2911_v13 = vpop.permute.xlu0 %497 }
 0x15c   :  { %v2913_v15 = vpop.permute.xlu1 %499  ;;  %v2915_v21 = vpop.permute.xlu0 %541 }
 0x15d   :  { %3759 = vst [vmem:[#allocation15_spill] sm:$0xff] %v2913_v15  ;;  %v210_v15 = vmul.f32 %v208_v38, %v2577_v16 }
 0x160   :  { %v2917_v22 = vpop.permute.xlu1 %543  ;;  %v2919_v23 = vpop.permute.xlu0 %537 }
 0x161   :  { %3760 = vst [vmem:[#allocation16_spill] sm:$0xff] %v2919_v23 }
 0x164   :  { %v2921_v24 = vpop.permute.xlu1 %539  ;;  %v2923_v25 = vpop.permute.xlu0 %581 }
 0x165   :  { %3761 = vst [vmem:[#allocation17_spill] sm:$0xff] %v2921_v24  ;;  %v153_v24 = vadd.f32 %v2783_v4, %v127_v39 }
 0x167   :  { %v179_v47 = vadd.f32 %v2805_v29, %v153_v24 }
 0x168   :  { %v2925_v26 = vpop.permute.xlu1 %583  ;;  %v2927_v27 = vpop.permute.xlu0 %577 }
 0x169   :  { %3762 = vst [vmem:[#allocation18_spill] sm:$0xff] %v2925_v26  ;;  %3763 = vst [vmem:[#allocation19_spill] sm:$0xff] %v2927_v27  ;;  %v125_v27 = vadd.f32 %v2772_v57, %v95_v51  ;;  %v209_v26 = vmul.f32 %v208_v38, %v2569_v11  ;;  %v205_v29 = vadd.f32 %v2827_v53, %v179_v47 }
 0x16b   :  { %v151_v57 = vadd.f32 %v2794_v18, %v125_v27 }
 0x16c   :  { %v2929_v34 = vpop.permute.xlu1 %579  ;;  %v2931_v35 = vpop.permute.xlu0 %654 }
 0x16d   :  { %3764 = vst [vmem:[#allocation20_spill] sm:$0xff] %v2929_v34  ;;  %3765 = vst [vmem:[#allocation21_spill] sm:$0xff] %v2931_v35  ;;  %v212_v34 = vmul.f32 %v208_v38, %v2567_v10  ;;  %v128_v35 = vadd.f32 %v2770_v56, %v98_v48  ;;  %v177_v11 = vadd.f32 %v2816_v41, %v151_v57 }
 0x16f   :  { %v154_v56 = vadd.f32 %v2792_v17, %v128_v35  ;;  %v227_v24 = vrot.slane %v212_v34, 1  ;;  %v223_v17 = vrot.slane %v210_v15, 1 }
 0x170   :  { %v2936_v45 = vpop.permute.xlu1 %656  ;;  %v2938_v46 = vpop.permute.xlu0 %650 }
 0x171   :  { %3766 = vst [vmem:[#allocation22_spill] sm:$0xff] %v2936_v45  ;;  %3767 = vst [vmem:[#allocation23_spill] sm:$0xff] %v2938_v46  ;;  %v96_v45 = vmul.f32 %v94_v30, %v2577_v16  ;;  %v214_v46 = vmul.f32 %v208_v38, %v2600_v32  ;;  %v211_v30 = vmul.f32 %v208_v38, %v2608_v37  ;;  %v401_v38 = vstv %s2329_s4  ;;  %s3278_s4 = sld [smem:[#allocation9 + $0x16]] }
 0x172   :  { %v180_v42 = vadd.f32 %v2814_v40, %v154_v56  ;;  %v229_v48 = vsel %vm221_vm3, %v227_v24, %v228_v36 }
 0x173   :  { %v126_v39 = vadd.f32 %v2781_v3, %v96_v45  ;;  %v203_v3 = vadd.f32 %v2838_v2, %v177_v11  ;;  %v238_v27 = vadd.f32 %v229_v48, %v205_v29  ;;  %v225_v34 = vrot.slane %v211_v30, 1  ;;  %v2987_v29 = vld [vmem:[#allocation2] sm:$0xff] }
 0x174   :  { %v2951_v23 = vpop.permute.xlu1 %652  ;;  %v2953_v4 = vpop.permute.xlu0 %694  ;;  %v206_v53 = vadd.f32 %v2836_v1, %v180_v42  ;;  %v406_v45 = vmul.f32 %v401_v38, %v2574_v14  ;;  %v407_v14 = vmul.f32 %v401_v38, %v2600_v32  ;;  %v402_v24 = vmul.f32 %v2987_v29, %v401_v38 }
 0x175   :  { %3768 = vst [vmem:[#allocation24_spill] sm:$0xff] %v2951_v23  ;;  %3769 = vst [vmem:[#allocation25_spill] sm:$0xff] %v2953_v4  ;;  %v152_v51 = vadd.f32 %v2803_v28, %v126_v39  ;;  %v230_v23 = vrot.slane %v214_v46, 1  ;;  %v222_v4 = vrot.slane %v209_v26, 1  ;;  %v278_v41 = vadd.f32 %v2849_v20, %v238_v27 }
 0x176   :  { %v226_v56 = vsel %vm221_vm3, %v223_v17, %v225_v34  ;;  %v405_v20 = vmul.f32 %v401_v38, %v2567_v10  ;;  %v421_v57 = vrot.slane %v406_v45, 2  ;;  %v594_v34 = vstv %s2334_s20  ;;  %s3298_s20 = sld [smem:[#allocation9 + $0x17]] }
 0x177   :  { %v178_v40 = vadd.f32 %v2825_v52, %v152_v51  ;;  %v231_v26 = vsel %vm221_vm3, %v228_v36, %v230_v23  ;;  %v224_v15 = vsel %vm221_vm3, %v222_v4, %v223_v17  ;;  %v318_v52 = vadd.f32 %v2869_v44, %v278_v41 }
 0x178   :  { %v2964_v35 = vpop.permute.xlu1 %696  ;;  %v2966_v18 = vpop.permute.xlu0 %690  ;;  %v239_v2 = vadd.f32 %v231_v26, %v206_v53  ;;  %v236_v47 = vadd.f32 %v224_v15, %v203_v3  ;;  %v403_v44 = vmul.f32 %v401_v38, %v2577_v16  ;;  %v420_v42 = vrot.slane %v405_v20, 2 }
 0x179   :  { %v204_v28 = vadd.f32 %v2847_v19, %v178_v40  ;;  %v358_v36 = vadd.f32 %v2883_v55, %v318_v52  ;;  %v423_v51 = vrot.slane %v407_v14, 2  ;;  %v404_v16 = vmul.f32 %v401_v38, %v2608_v37  ;;  %v2425_v14 = vld [vmem:[#allocation2 + $0x8] sm:$0xff] }
 0x17a   :  { %v279_v19 = vadd.f32 %v2858_v31, %v239_v2  ;;  %v276_v23 = vadd.f32 %v2860_v33, %v236_v47  ;;  %v422_v53 = vsel %vm414_vm4, %v420_v42, %v421_v57  ;;  %v415_v3 = vrot.slane %v402_v24, 2  ;;  %v2424_v2 = vld [vmem:[#allocation2 + $0x18] sm:$0xff] }
 0x17b   :  { %v237_v4 = vadd.f32 %v226_v56, %v204_v28  ;;  %v398_v55 = vadd.f32 %v2891_v61, %v358_v36  ;;  %v418_v37 = vrot.slane %v404_v16, 2  ;;  %v424_v41 = vsel %vm414_vm4, %v421_v57, %v423_v51  ;;  %v2423_v28 = vld [vmem:[#allocation2 + $0x20] sm:$0xff] }
 0x17c   :  { %v2976_v46 = vpop.permute.xlu1 %692  ;;  %v2978_v1 = vpop.permute.xlu0 %734  ;;  %v319_v31 = vadd.f32 %v2875_v49, %v279_v19  ;;  %v316_v33 = vadd.f32 %v2877_v50, %v276_v23  ;;  %v416_v49 = vrot.slane %v403_v44, 2  ;;  %v599_v26 = vmul.f32 %v2423_v28, %v594_v34 }
 0x17d   :  { %v277_v30 = vadd.f32 %v2867_v43, %v237_v4  ;;  %v600_v47 = vmul.f32 %v594_v34, %v2600_v32  ;;  %v595_v36 = vmul.f32 %v2987_v29, %v594_v34  ;;  %v596_v4 = vmul.f32 %v2425_v14, %v594_v34 }
 0x17e   :  { %v359_v11 = vadd.f32 %v2885_v58, %v319_v31  ;;  %v356_v48 = vadd.f32 %v2887_v59, %v316_v33  ;;  %v431_v58 = vadd.f32 %v422_v53, %v398_v55  ;;  %v417_v38 = vsel %vm414_vm4, %v415_v3, %v416_v49  ;;  %v3770_v31 = vld [vmem:[#allocation16_spill] sm:$0xff]  ;;  %v3772_v53 = vld [vmem:[#allocation18_spill] sm:$0xff]  ;;  %v3773_v3 = vld [vmem:[#allocation19_spill] sm:$0xff] }
 0x17f   :  { %v317_v17 = vadd.f32 %v2881_v54, %v277_v30  ;;  %v419_v56 = vsel %vm414_vm4, %v416_v49, %v418_v37  ;;  %v614_v23 = vrot.slane %v599_v26, 3  ;;  %v616_v55 = vrot.slane %v600_v47, 3  ;;  %v2426_v30 = vld [vmem:[#allocation2 + $0x10] sm:$0xf]  ;;  %v3776_v37 = vld [vmem:[#allocation20_spill] sm:$0xff] }
 0x180   :  { %v2991_v39 = vpop.permute.xlu1 %736  ;;  %v2993_v10 = vpop.permute.xlu0 %730  ;;  %v399_v43 = vadd.f32 %v2893_v62, %v359_v11  ;;  %v396_v61 = vadd.f32 %v2895_v63, %v356_v48  ;;  %v471_v40 = vadd.f32 %v2899_v5, %v431_v58  ;;  %v598_v5 = vmul.f32 %v2424_v2, %v594_v34  ;;  %v3771_v11 = vld [vmem:[#allocation15_spill] sm:$0xff] }
 0x181   :  { %v357_v59 = vadd.f32 %v2889_v60, %v317_v17  ;;  %v597_v42 = vmul.f32 %v2426_v30, %v594_v34  ;;  %v608_v16 = vrot.slane %v595_v36, 3  ;;  %v3779_v36 = vld [vmem:[#allocation23_spill] sm:$0xff] }
 0x182   :  { %v432_v63 = vadd.f32 %v424_v41, %v399_v43  ;;  %v429_v45 = vadd.f32 %v417_v38, %v396_v61  ;;  %v511_v60 = vadd.f32 %v2907_v9, %v471_v40  ;;  %v3774_v43 = vld [vmem:[#allocation17_spill] sm:$0xff]  ;;  %v787_v40 = vstv %s2339_s22  ;;  %s3302_s22 = sld [smem:[#allocation9 + $0x5]] }
 0x183   :  { %v397_v54 = vadd.f32 %v2897_v0, %v357_v59  ;;  %v3775_v61 = vld [vmem:[#allocation21_spill] sm:$0xff]  ;;  %v611_v59 = vrot.slane %v597_v42, 3  ;;  %v792_v38 = vmul.f32 %v2423_v28, %v787_v40  ;;  %v788_v28 = vmul.f32 %v2987_v29, %v787_v40 }
 0x184   :  { %v3004_v27 = vpop.permute.xlu1 %732  ;;  %v3006_v50 = vpop.permute.xlu0 %774  ;;  %v472_v0 = vadd.f32 %v2901_v6, %v432_v63  ;;  %v469_v52 = vadd.f32 %v2903_v7, %v429_v45  ;;  %v551_v20 = vadd.f32 %v2915_v21, %v511_v60  ;;  %v613_v21 = vrot.slane %v598_v5, 3  ;;  %v3777_v5 = vld [vmem:[#allocation25_spill] sm:$0xff] }
 0x185   :  { %v430_v19 = vadd.f32 %v419_v56, %v397_v54  ;;  %v617_v54 = vsel %vm607_vm5, %v614_v23, %v616_v55  ;;  %v3780_v55 = vld [vmem:[#allocation24_spill] sm:$0xff] }
 0x186   :  { %v512_v32 = vadd.f32 %v2909_v12, %v472_v0  ;;  %v509_v6 = vadd.f32 %v2911_v13, %v469_v52  ;;  %v591_v7 = vadd.f32 %v2923_v25, %v551_v20  ;;  %v615_v51 = vsel %vm607_vm5, %v613_v21, %v614_v23  ;;  %v2427_v52 = vld [vmem:[#allocation2 + $0x28] sm:$0xf]  ;;  %v3778_v20 = vld [vmem:[#allocation22_spill] sm:$0xff] }
 0x187   :  { %v470_v24 = vadd.f32 %v2905_v8, %v430_v19  ;;  %v609_v12 = vrot.slane %v596_v4, 3  ;;  %v791_v0 = vmul.f32 %v2424_v2, %v787_v40  ;;  %v793_v56 = vmul.f32 %v2427_v52, %v787_v40 }
 0x188   :  { %v3015_v15 = vpop.permute.xlu1 %776  ;;  %v3017_v62 = vpop.permute.xlu0 %770  ;;  %v552_v44 = vadd.f32 %v2917_v22, %v512_v32  ;;  %v549_v33 = vadd.f32 %v3770_v31, %v509_v6  ;;  %v624_v49 = vadd.f32 %v615_v51, %v591_v7  ;;  %v807_v7 = vrot.slane %v792_v38, 4 }
 0x189   :  { %v510_v48 = vadd.f32 %v3771_v11, %v470_v24  ;;  %v610_v41 = vsel %vm607_vm5, %v608_v16, %v609_v12  ;;  %v612_v32 = vsel %vm607_vm5, %v609_v12, %v611_v59  ;;  %v789_v24 = vmul.f32 %v2425_v14, %v787_v40 }
 0x18a   :  { %v592_v25 = vadd.f32 %v3772_v53, %v552_v44  ;;  %v589_v8 = vadd.f32 %v3773_v3, %v549_v33  ;;  %v664_v58 = vadd.f32 %v3775_v61, %v624_v49  ;;  %v806_v11 = vrot.slane %v791_v0, 4 }
 0x18b   :  { %v550_v22 = vadd.f32 %v3774_v43, %v510_v48  ;;  %v809_v51 = vrot.slane %v793_v56, 4  ;;  %v790_v16 = vmul.f32 %v2426_v30, %v787_v40  ;;  %v801_v12 = vrot.slane %v788_v28, 4 }
 0x18c   :  { %v3026_v9 = vpop.permute.xlu1 %772  ;;  %v3028_v57 = vpop.permute.xlu0 %847  ;;  %v625_v45 = vadd.f32 %v617_v54, %v592_v25  ;;  %v622_v60 = vadd.f32 %v610_v41, %v589_v8  ;;  %v704_v47 = vadd.f32 %v3777_v5, %v664_v58  ;;  %v808_v14 = vsel %vm800_vm6, %v806_v11, %v807_v7 }
 0x18d   :  { %v590_v34 = vadd.f32 %v3776_v37, %v550_v22  ;;  %v802_v53 = vrot.slane %v789_v24, 4 }
 0x18e   :  { %v665_v19 = vadd.f32 %v3778_v20, %v625_v45  ;;  %v662_v4 = vadd.f32 %v3779_v36, %v622_v60  ;;  %v744_v23 = vadd.f32 %v2978_v1, %v704_v47 }
 0x18f   :  { %v623_v6 = vadd.f32 %v612_v32, %v590_v34  ;;  %v803_v49 = vsel %vm800_vm6, %v801_v12, %v802_v53 }
 0x190   :  { %v850_v17 = vpop.permute.xlu1 %849  ;;  %v844_v13 = vpop.permute.xlu0 %843  ;;  %v705_v31 = vadd.f32 %v2964_v35, %v665_v19  ;;  %v702_v2 = vadd.f32 %v2966_v18, %v662_v4  ;;  %v784_v33 = vadd.f32 %v3006_v50, %v744_v23 }
 0x191   :  { %v663_v42 = vadd.f32 %v3780_v55, %v623_v6 }
 0x192   :  { %v745_v48 = vadd.f32 %v2991_v39, %v705_v31  ;;  %v742_v1 = vadd.f32 %v2993_v10, %v702_v2  ;;  %v817_v3 = vadd.f32 %v808_v14, %v784_v33  ;;  %v804_v10 = vrot.slane %v790_v16, 4 }
 0x193   :  { %v703_v29 = vadd.f32 %v2976_v46, %v663_v42  ;;  %v810_v46 = vsel %vm800_vm6, %v807_v7, %v809_v51  ;;  %v1060_v14 = vstv %s2345_s27  ;;  %s2495_s27 = smov 48  }
 0x194   :  { %v846_v26 = vpop.permute.xlu1 %845  ;;  %v888_v63 = vpop.permute.xlu0 %887  ;;  %v785_v18 = vadd.f32 %v3015_v15, %v745_v48  ;;  %v782_v50 = vadd.f32 %v3017_v62, %v742_v1  ;;  %v857_v39 = vadd.f32 %v3028_v57, %v817_v3  ;;  %v805_v62 = vsel %vm800_vm6, %v802_v53, %v804_v10 }
 0x195   :  { %v743_v8 = vadd.f32 %v3004_v27, %v703_v29 }
 0x196   :  { %v818_v61 = vadd.f32 %v810_v46, %v785_v18  ;;  %v815_v58 = vadd.f32 %v803_v49, %v782_v50  ;;  %v897_v59 = vadd.f32 %v888_v63, %v857_v39 }
 0x197   :  { %v783_v30 = vadd.f32 %v3026_v9, %v743_v8  ;;  %v980_v9 = vstv %s3752_s1  ;;  %s2344_s1 = sld [smem:[#allocation9 + $0x1]] }
 0x198   :  { %v890_v21 = vpop.permute.xlu1 %889  ;;  %v884_v44 = vpop.permute.xlu0 %883  ;;  %v858_v15 = vadd.f32 %v850_v17, %v818_v61  ;;  %v855_v40 = vadd.f32 %v844_v13, %v815_v58 }
 0x199   :  { %v816_v27 = vadd.f32 %v805_v62, %v783_v30  ;;  %v1112_v30 = vstv %s2347_s28 }
 0x19a   :  { %v898_v54 = vadd.f32 %v890_v21, %v858_v15  ;;  %v895_v41 = vadd.f32 %v884_v44, %v855_v40 }
 0x19b   :  { %v856_v45 = vadd.f32 %v846_v26, %v816_v27 }
 0x19c   :  { %v886_v35 = vpop.permute.xlu1 %885  ;;  %v928_v25 = vpop.permute.xlu0 %927 }
 0x19d   :  { %v937_v37 = vadd.f32 %v928_v25, %v897_v59  ;;  %v896_v63 = vadd.f32 %v886_v35, %v856_v45  ;;  %v1034_v55 = vstv %s2344_s1 }
 0x1a0   :  { %v930_v43 = vpop.permute.xlu1 %929  ;;  %v924_v22 = vpop.permute.xlu0 %923 }
 0x1a1   :  { %v938_v60 = vadd.f32 %v930_v43, %v898_v54  ;;  %v935_v5 = vadd.f32 %v924_v22, %v895_v41  ;;  %v1170_v43 = vstv %s2349_s29 }
 0x1a4   :  { %v926_v34 = vpop.permute.xlu1 %925  ;;  %v968_v57 = vpop.permute.xlu0 %967 }
 0x1a5   :  { %v977_v38 = vadd.f32 %v968_v57, %v937_v37  ;;  %v936_v20 = vadd.f32 %v926_v34, %v896_v63 }
 0x1a7   :  { %v983_v47 = vadd.f32 %v980_v9, %v977_v38  ;;  %v1210_v38 = vstv %s2350_s30  ;;  %s2499_s30 = smov 112  }
 0x1a8   :  { %v970_v17 = vpop.permute.xlu1 %969  ;;  %v964_v13 = vpop.permute.xlu0 %963 }
 0x1a9   :  { %v978_v0 = vadd.f32 %v970_v17, %v938_v60  ;;  %v975_v52 = vadd.f32 %v964_v13, %v935_v5  ;;  %vm987_vm7 = vcmp.gt.f32.partialorder %v983_v47, 0.0  ;;  %v991_v56 = vmul.f32 0.01, %v983_v47 }
 0x1ab   :  { %v984_v19 = vadd.f32 %v980_v9, %v978_v0  ;;  %v981_v36 = vadd.f32 %v980_v9, %v975_v52  ;;  %v995_v4 = vsel %vm987_vm7, %v983_v47, %v991_v56  ;;  %vm2019_vm7 = vcmask 648704  }
 0x1ac   :  { %v966_v32 = vpop.permute.xlu1 %965  ;;  %1005 = vrot.lane.b32.xlu0 %v995_v4, %s2486_s13 }
 0x1ad   :  { %v976_v23 = vadd.f32 %v966_v32, %v936_v20  ;;  %vm988_vm8 = vcmp.gt.f32.partialorder %v984_v19, 0.0  ;;  %v992_v26 = vmul.f32 0.01, %v984_v19  ;;  %vm985_vm9 = vcmp.gt.f32.partialorder %v981_v36, 0.0 }
 0x1ae   :  { %v989_v6 = vmul.f32 0.01, %v981_v36 }
 0x1af   :  { %v982_v7 = vadd.f32 %v980_v9, %v976_v23  ;;  %v996_v28 = vsel %vm988_vm8, %v984_v19, %v992_v26  ;;  %v1250_v26 = vstv %s2351_s8  ;;  %s2496_s8 = smov 64   ;;  %vm2031_vm8 = vcmask 779904  }
 0x1b0   :  { %1007 = vrot.lane.b32.xlu1 %v996_v28, %s2486_s13  ;;  %v993_v24 = vsel %vm985_vm9, %v981_v36, %v989_v6  ;;  %vm2045_vm9 = vcmask 911104  }
 0x1b1   :  { %1001 = vrot.lane.b32.xlu0 %v993_v24, %s2486_s13  ;;  %vm986_vm10 = vcmp.gt.f32.partialorder %v982_v7, 0.0  ;;  %v990_v21 = vmul.f32 0.01, %v982_v7 }
 0x1b3   :  { %v994_v44 = vsel %vm986_vm10, %v982_v7, %v990_v21  ;;  %vm2057_vm10 = vcmask 1042304  }
 0x1b4   :  { %1003 = vrot.lane.b32.xlu1 %v994_v44, %s2486_s13  ;;  %s2346_s13 = sld [smem:[#allocation9 + $0x3]] }
 0x1ba   :  { %v1086_v50 = vstv %s2346_s13 }
 0x21e   :  { %v1006_v31 = vpop.permute.xlu0 %1005 }
 0x21f   :  { %1015 = vst.msk [vmem:[#allocation2 + $0x1a] sm:$0xff] %vm82_vm2, %v1006_v31 }
 0x222   :  { %v1008_v2 = vpop.permute.xlu1 %1007 }
 0x223   :  { %1016 = vst.msk [vmem:[#allocation2 + $0x22] sm:$0xff] %vm82_vm2, %v1008_v2  ;;  %v1002_v33 = vpop.permute.xlu0 %1001 }
 0x224   :  { %1013 = vst.msk [vmem:[#allocation2 + $0x2] sm:$0xff] %vm82_vm2, %v1002_v33 }
 0x226   :  { %v3077_v42 = vld [vmem:[#allocation2 + $0x18] sm:$0xff]  ;;  %v1004_v11 = vpop.permute.xlu1 %1003 }
 0x227   :  { %1014 = vst.msk [vmem:[#allocation2 + $0xa] sm:$0xff] %vm82_vm2, %v1004_v11  ;;  %v1037_v48 = vmul.f32 %v1034_v55, %v3077_v42  ;;  %v1063_v35 = vmul.f32 %v1060_v14, %v3077_v42  ;;  %v1089_v8 = vmul.f32 %v1086_v50, %v3077_v42  ;;  %v1115_v49 = vmul.f32 %v1112_v30, %v3077_v42 }
 0x228   :  { %v1174_v59 = vmul.f32 %v1170_v43, %v3077_v42  ;;  %v1214_v63 = vmul.f32 %v1210_v38, %v3077_v42  ;;  %v1254_v21 = vmul.f32 %v1250_v26, %v3077_v42 }
 0x229   :  { %1047 = vrot.lane.b32.xlu0 %v1037_v48, %s2488_s19 }
 0x22a   :  { %v3082_v1 = vld [vmem:[#allocation2 + $0x20] sm:$0xff]  ;;  %v3110_v22 = vld [vmem:[#allocation2 + $0x28] sm:$0xf]  ;;  %v1188_v9 = vrot.slane %v1174_v59, 1  ;;  %v1228_v19 = vrot.slane %v1214_v63, 1  ;;  %v1268_v48 = vrot.slane %v1254_v21, 1 }
 0x22b   :  { %v3084_v51 = vld [vmem:[#allocation2] sm:$0xff]  ;;  %v1038_v16 = vmul.f32 %v1034_v55, %v3082_v1  ;;  %v1064_v25 = vmul.f32 %v1060_v14, %v3082_v1  ;;  %v1090_v39 = vmul.f32 %v1086_v50, %v3082_v1  ;;  %v1175_v61 = vmul.f32 %v1170_v43, %v3082_v1 }
 0x22c   :  { %v1035_v29 = vmul.f32 %v1034_v55, %v3084_v51  ;;  %v1061_v18 = vmul.f32 %v1060_v14, %v3084_v51  ;;  %v1087_v10 = vmul.f32 %v1086_v50, %v3084_v51  ;;  %v1116_v58 = vmul.f32 %v1112_v30, %v3082_v1 }
 0x22d   :  { %1049 = vrot.lane.b32.xlu1 %v1038_v16, %s2488_s19  ;;  %v1113_v15 = vmul.f32 %v1112_v30, %v3084_v51  ;;  %v1176_v40 = vmul.f32 %v1170_v43, %v3110_v22  ;;  %v1189_v37 = vrot.slane %v1175_v61, 1  ;;  %v1171_v57 = vmul.f32 %v1170_v43, %v3084_v51 }
 0x22e   :  { %v3089_v12 = vld [vmem:[#allocation2 + $0x8] sm:$0xff]  ;;  %1043 = vrot.lane.b32.xlu0 %v1035_v29, %s2488_s19  ;;  %v3119_v62 = vld [vmem:[#allocation2 + $0x10] sm:$0xf]  ;;  %v1215_v5 = vmul.f32 %v1210_v38, %v3082_v1  ;;  %v1216_v0 = vmul.f32 %v1210_v38, %v3110_v22  ;;  %v1211_v36 = vmul.f32 %v1210_v38, %v3084_v51  ;;  %v1255_v28 = vmul.f32 %v1250_v26, %v3082_v1 }
 0x22f   :  { %v1036_v53 = vmul.f32 %v1034_v55, %v3089_v12  ;;  %v1062_v3 = vmul.f32 %v1060_v14, %v3089_v12  ;;  %v1088_v46 = vmul.f32 %v1086_v50, %v3089_v12  ;;  %v1172_v27 = vmul.f32 %v1170_v43, %v3089_v12 }
 0x230   :  { %v1114_v34 = vmul.f32 %v1112_v30, %v3089_v12  ;;  %v1191_v54 = vrot.slane %v1176_v40, 1  ;;  %v1173_v41 = vmul.f32 %v1170_v43, %v3119_v62  ;;  %v1190_v45 = vsel %vm221_vm3, %v1188_v9, %v1189_v37 }
 0x231   :  { %1045 = vrot.lane.b32.xlu1 %v1036_v53, %s2488_s19  ;;  %v1184_v60 = vrot.slane %v1172_v27, 1  ;;  %v1183_v47 = vrot.slane %v1171_v57, 1  ;;  %v1229_v56 = vrot.slane %v1215_v5, 1  ;;  %v1212_v20 = vmul.f32 %v1210_v38, %v3089_v12 }
 0x232   :  { %1073 = vrot.lane.b32.xlu0 %v1063_v35, %s2489_s21  ;;  %v1192_v17 = vsel %vm221_vm3, %v1189_v37, %v1191_v54  ;;  %v1186_v13 = vrot.slane %v1173_v41, 1  ;;  %v1231_v32 = vrot.slane %v1216_v0, 1  ;;  %v1213_v23 = vmul.f32 %v1210_v38, %v3119_v62 }
 0x233   :  { %v1185_v52 = vsel %vm221_vm3, %v1183_v47, %v1184_v60  ;;  %v1230_v6 = vsel %vm221_vm3, %v1228_v19, %v1229_v56  ;;  %v1224_v7 = vrot.slane %v1212_v20, 1  ;;  %v1223_v24 = vrot.slane %v1211_v36, 1 }
 0x234   :  { %v1187_v4 = vsel %vm221_vm3, %v1184_v60, %v1186_v13  ;;  %v1232_v44 = vsel %vm221_vm3, %v1229_v56, %v1231_v32  ;;  %v1226_v31 = vrot.slane %v1213_v23, 1  ;;  %v1256_v2 = vmul.f32 %v1250_v26, %v3110_v22 }
 0x235   :  { %1075 = vrot.lane.b32.xlu1 %v1064_v25, %s2489_s21  ;;  %v1225_v33 = vsel %vm221_vm3, %v1223_v24, %v1224_v7  ;;  %v1269_v55 = vrot.slane %v1255_v28, 1  ;;  %v1252_v11 = vmul.f32 %v1250_v26, %v3089_v12  ;;  %v1251_v16 = vmul.f32 %v1250_v26, %v3084_v51 }
 0x236   :  { %1069 = vrot.lane.b32.xlu0 %v1061_v18, %s2489_s21  ;;  %v1227_v29 = vsel %vm221_vm3, %v1224_v7, %v1226_v31  ;;  %v1271_v14 = vrot.slane %v1256_v2, 1  ;;  %v1253_v53 = vmul.f32 %v1250_v26, %v3119_v62  ;;  %v1290_v35 = vstv %s2352_s9 }
 0x237   :  { %v1270_v25 = vsel %vm221_vm3, %v1268_v48, %v1269_v55  ;;  %v1264_v18 = vrot.slane %v1252_v11, 1  ;;  %v1295_v50 = vmul.f32 %v1290_v35, %v3082_v1  ;;  %v1296_v30 = vmul.f32 %v1290_v35, %v3110_v22 }
 0x238   :  { %v1292_v43 = vmul.f32 %v1290_v35, %v3089_v12  ;;  %v1293_v40 = vmul.f32 %v1290_v35, %v3119_v62  ;;  %v1362_v37 = vstv %s2354_s0  ;;  %v1402_v56 = vstv %s2355_s2 }
 0x239   :  { %1071 = vrot.lane.b32.xlu1 %v1062_v3, %s2489_s21  ;;  %v1263_v3 = vrot.slane %v1251_v16, 1  ;;  %v1367_v9 = vmul.f32 %v1362_v37, %v3082_v1  ;;  %v1366_v54 = vmul.f32 %v1362_v37, %v3077_v42  ;;  %v1364_v47 = vmul.f32 %v1362_v37, %v3089_v12 }
 0x23a   :  { %1099 = vrot.lane.b32.xlu0 %v1089_v8, %s2490_s24  ;;  %v1294_v8 = vmul.f32 %v1290_v35, %v3077_v42  ;;  %v1306_v38 = vrot.slane %v1293_v40, 1  ;;  %v1407_v36 = vmul.f32 %v1402_v56, %v3082_v1  ;;  %v1406_v32 = vmul.f32 %v1402_v56, %v3077_v42 }
 0x23b   :  { %v1381_v5 = vrot.slane %v1367_v9, 2  ;;  %v1380_v63 = vrot.slane %v1366_v54, 2  ;;  %v1376_v19 = vrot.slane %v1364_v47, 2  ;;  %v1404_v24 = vmul.f32 %v1402_v56, %v3089_v12 }
 0x23c   :  { %v1308_v61 = vrot.slane %v1294_v8, 1  ;;  %v1421_v28 = vrot.slane %v1407_v36, 2  ;;  %v1420_v21 = vrot.slane %v1406_v32, 2 }
 0x23d   :  { %1101 = vrot.lane.b32.xlu1 %v1090_v39, %s2490_s24  ;;  %v1272_v39 = vsel %vm221_vm3, %v1269_v55, %v1271_v14  ;;  %v1382_v20 = vsel %vm414_vm4, %v1380_v63, %v1381_v5  ;;  %v1442_v55 = vstv %s2356_s10  ;;  %v1416_v48 = vrot.slane %v1404_v24, 2 }
 0x23e   :  { %1095 = vrot.lane.b32.xlu0 %v1087_v10, %s2490_s24  ;;  %v1266_v10 = vrot.slane %v1253_v53, 1  ;;  %v1422_v11 = vsel %vm414_vm4, %v1420_v21, %v1421_v28  ;;  %v1447_v16 = vmul.f32 %v1442_v55, %v3082_v1  ;;  %v1446_v14 = vmul.f32 %v1442_v55, %v3077_v42 }
 0x240   :  { %v1267_v59 = vsel %vm221_vm3, %v1264_v18, %v1266_v10  ;;  %v1460_v8 = vrot.slane %v1446_v14, 2 }
 0x241   :  { %1097 = vrot.lane.b32.xlu1 %v1088_v46, %s2490_s24  ;;  %v1265_v46 = vsel %vm221_vm3, %v1263_v3, %v1264_v18  ;;  %v1444_v3 = vmul.f32 %v1442_v55, %v3089_v12 }
 0x242   :  { %1125 = vrot.lane.b32.xlu0 %v1115_v49, %s2491_s26  ;;  %v1309_v49 = vrot.slane %v1295_v50, 1  ;;  %v1461_v50 = vrot.slane %v1447_v16, 2 }
 0x244   :  { %v1310_v27 = vsel %vm221_vm3, %v1308_v61, %v1309_v49  ;;  %v1456_v61 = vrot.slane %v1444_v3, 2 }
 0x245   :  { %1127 = vrot.lane.b32.xlu1 %v1116_v58, %s2491_s26  ;;  %v1291_v58 = vmul.f32 %v1290_v35, %v3084_v51 }
 0x246   :  { %1121 = vrot.lane.b32.xlu0 %v1113_v15, %s2491_s26  ;;  %v1311_v15 = vrot.slane %v1296_v30, 1 }
 0x247   :  { %v1303_v57 = vrot.slane %v1291_v58, 1 }
 0x248   :  { %v1312_v41 = vsel %vm221_vm3, %v1309_v49, %v1311_v15  ;;  %v1482_v49 = vstv %s2357_s11 }
 0x249   :  { %1123 = vrot.lane.b32.xlu1 %v1114_v34, %s2491_s26  ;;  %v1304_v34 = vrot.slane %v1292_v43, 1  ;;  %v1462_v43 = vsel %vm414_vm4, %v1460_v8, %v1461_v50  ;;  %v1487_v58 = vmul.f32 %v1482_v49, %v3082_v1  ;;  %v1486_v15 = vmul.f32 %v1482_v49, %v3077_v42 }
 0x24a   :  { %1197 = vrot.lane.b32.xlu0 %v1190_v45, %s2488_s19  ;;  %v1368_v45 = vmul.f32 %v1362_v37, %v3110_v22 }
 0x24b   :  { %v1305_v60 = vsel %vm221_vm3, %v1303_v57, %v1304_v34  ;;  %v1307_v13 = vsel %vm221_vm3, %v1304_v34, %v1306_v38  ;;  %v1501_v9 = vrot.slane %v1487_v58, 2  ;;  %v1484_v57 = vmul.f32 %v1482_v49, %v3089_v12 }
 0x24c   :  { %v1383_v0 = vrot.slane %v1368_v45, 2  ;;  %v1500_v54 = vrot.slane %v1486_v15, 2 }
 0x24d   :  { %1199 = vrot.lane.b32.xlu1 %v1192_v17, %s2488_s19  ;;  %v1363_v17 = vmul.f32 %v1362_v37, %v3084_v51  ;;  %v1496_v63 = vrot.slane %v1484_v57, 2 }
 0x24e   :  { %1193 = vrot.lane.b32.xlu0 %v1185_v52, %s2488_s19  ;;  %v1365_v52 = vmul.f32 %v1362_v37, %v3119_v62  ;;  %v1384_v23 = vsel %vm414_vm4, %v1381_v5, %v1383_v0  ;;  %v1554_v5 = vstv %s2359_s12  ;;  %v1502_v47 = vsel %vm414_vm4, %v1500_v54, %v1501_v9 }
 0x24f   :  { %v1558_v0 = vmul.f32 %v1554_v5, %v3077_v42 }
 0x250   :  { %v1378_v26 = vrot.slane %v1365_v52, 2 }
 0x251   :  { %1195 = vrot.lane.b32.xlu1 %v1187_v4, %s2488_s19  ;;  %v1375_v4 = vrot.slane %v1363_v17, 2  ;;  %v1559_v17 = vmul.f32 %v1554_v5, %v3082_v1  ;;  %v1572_v32 = vrot.slane %v1558_v0, 3 }
 0x252   :  { %1237 = vrot.lane.b32.xlu0 %v1230_v6, %s2489_s21  ;;  %v1408_v6 = vmul.f32 %v1402_v56, %v3110_v22  ;;  %v1379_v31 = vsel %vm414_vm4, %v1376_v19, %v1378_v26 }
 0x253   :  { %v1377_v7 = vsel %vm414_vm4, %v1375_v4, %v1376_v19  ;;  %v1573_v36 = vrot.slane %v1559_v17, 3  ;;  %v1556_v4 = vmul.f32 %v1554_v5, %v3089_v12 }
 0x254   :  { %v1423_v2 = vrot.slane %v1408_v6, 2 }
 0x255   :  { %1239 = vrot.lane.b32.xlu1 %v1232_v44, %s2489_s21  ;;  %v1403_v44 = vmul.f32 %v1402_v56, %v3084_v51  ;;  %v1574_v24 = vsel %vm607_vm5, %v1572_v32, %v1573_v36  ;;  %v1568_v21 = vrot.slane %v1556_v4, 3 }
 0x256   :  { %1233 = vrot.lane.b32.xlu0 %v1225_v33, %s2489_s21  ;;  %v1405_v33 = vmul.f32 %v1402_v56, %v3119_v62  ;;  %v1424_v53 = vsel %vm414_vm4, %v1421_v28, %v1423_v2  ;;  %v1594_v28 = vstv %s2360_s14 }
 0x257   :  { %v1598_v2 = vmul.f32 %v1594_v28, %v3077_v42 }
 0x258   :  { %v1418_v35 = vrot.slane %v1405_v33, 2 }
 0x259   :  { %1235 = vrot.lane.b32.xlu1 %v1227_v29, %s2489_s21  ;;  %v1415_v29 = vrot.slane %v1403_v44, 2  ;;  %v1599_v44 = vmul.f32 %v1594_v28, %v3082_v1  ;;  %v1612_v14 = vrot.slane %v1598_v2, 3 }
 0x25a   :  { %1277 = vrot.lane.b32.xlu0 %v1270_v25, %s2490_s24  ;;  %v1448_v25 = vmul.f32 %v1442_v55, %v3110_v22  ;;  %v1419_v10 = vsel %vm414_vm4, %v1416_v48, %v1418_v35 }
 0x25b   :  { %v1417_v18 = vsel %vm414_vm4, %v1415_v29, %v1416_v48  ;;  %v1613_v16 = vrot.slane %v1599_v44, 3  ;;  %v1596_v29 = vmul.f32 %v1594_v28, %v3089_v12 }
 0x25c   :  { %v1463_v30 = vrot.slane %v1448_v25, 2 }
 0x25d   :  { %1279 = vrot.lane.b32.xlu1 %v1272_v39, %s2490_s24  ;;  %v1443_v39 = vmul.f32 %v1442_v55, %v3084_v51  ;;  %v1614_v3 = vsel %vm607_vm5, %v1612_v14, %v1613_v16  ;;  %v1608_v8 = vrot.slane %v1596_v29, 3 }
 0x25e   :  { %1273 = vrot.lane.b32.xlu0 %v1265_v46, %s2490_s24  ;;  %v1445_v46 = vmul.f32 %v1442_v55, %v3119_v62  ;;  %v1464_v40 = vsel %vm414_vm4, %v1461_v50, %v1463_v30  ;;  %v1634_v50 = vstv %s2361_s15 }
 0x25f   :  { %v1638_v30 = vmul.f32 %v1634_v50, %v3077_v42 }
 0x260   :  { %v1458_v37 = vrot.slane %v1445_v46, 2 }
 0x261   :  { %1275 = vrot.lane.b32.xlu1 %v1267_v59, %s2490_s24  ;;  %v1455_v59 = vrot.slane %v1443_v39, 2  ;;  %v1639_v39 = vmul.f32 %v1634_v50, %v3082_v1  ;;  %v1652_v15 = vrot.slane %v1638_v30, 3 }
 0x262   :  { %1317 = vrot.lane.b32.xlu0 %v1310_v27, %s2491_s26  ;;  %v1488_v27 = vmul.f32 %v1482_v49, %v3110_v22  ;;  %v1459_v38 = vsel %vm414_vm4, %v1456_v61, %v1458_v37 }
 0x263   :  { %v1457_v34 = vsel %vm414_vm4, %v1455_v59, %v1456_v61  ;;  %v1653_v58 = vrot.slane %v1639_v39, 3  ;;  %v1636_v59 = vmul.f32 %v1634_v50, %v3089_v12 }
 0x264   :  { %v1503_v45 = vrot.slane %v1488_v27, 2 }
 0x265   :  { %1319 = vrot.lane.b32.xlu1 %v1312_v41, %s2491_s26  ;;  %v1483_v41 = vmul.f32 %v1482_v49, %v3084_v51  ;;  %v1654_v57 = vsel %vm607_vm5, %v1652_v15, %v1653_v58  ;;  %v1648_v54 = vrot.slane %v1636_v59, 3 }
 0x266   :  { %1313 = vrot.lane.b32.xlu0 %v1305_v60, %s2491_s26  ;;  %v1485_v60 = vmul.f32 %v1482_v49, %v3119_v62  ;;  %v1504_v52 = vsel %vm414_vm4, %v1501_v9, %v1503_v45  ;;  %v1674_v9 = vstv %s2362_s16  ;;  %s2493_s16 = smov 16  }
 0x267   :  { %v1676_v0 = vmul.f32 %v1674_v9, %v3089_v12 }
 0x268   :  { %v1498_v56 = vrot.slane %v1485_v60, 2  ;;  %v1678_v60 = vmul.f32 %v1674_v9, %v3077_v42 }
 0x269   :  { %1315 = vrot.lane.b32.xlu1 %v1307_v13, %s2491_s26  ;;  %v1495_v13 = vrot.slane %v1483_v41, 2  ;;  %v1679_v41 = vmul.f32 %v1674_v9, %v3082_v1 }
 0x26a   :  { %1389 = vrot.lane.b32.xlu0 %v1382_v20, %s2488_s19  ;;  %v1560_v20 = vmul.f32 %v1554_v5, %v3110_v22  ;;  %v1499_v26 = vsel %vm414_vm4, %v1496_v63, %v1498_v56 }
 0x26b   :  { %v1497_v19 = vsel %vm414_vm4, %v1495_v13, %v1496_v63  ;;  %v1680_v63 = vmul.f32 %v1674_v9, %v3110_v22  ;;  %v1693_v13 = vrot.slane %v1679_v41, 3 }
 0x26c   :  { %v1575_v6 = vrot.slane %v1560_v20, 3  ;;  %v1692_v20 = vrot.slane %v1678_v60, 3 }
 0x26d   :  { %1391 = vrot.lane.b32.xlu1 %v1384_v23, %s2488_s19  ;;  %v1555_v23 = vmul.f32 %v1554_v5, %v3084_v51  ;;  %v1695_v32 = vrot.slane %v1680_v63, 3 }
 0x26e   :  { %1385 = vrot.lane.b32.xlu0 %v1377_v7, %s2488_s19  ;;  %v1557_v7 = vmul.f32 %v1554_v5, %v3119_v62  ;;  %v1576_v33 = vsel %vm607_vm5, %v1573_v36, %v1575_v6 }
 0x270   :  { %v1570_v55 = vrot.slane %v1557_v7, 3  ;;  %v1694_v7 = vsel %vm607_vm5, %v1692_v20, %v1693_v13 }
 0x271   :  { %1387 = vrot.lane.b32.xlu1 %v1379_v31, %s2488_s19  ;;  %v1567_v31 = vrot.slane %v1555_v23, 3  ;;  %v1677_v23 = vmul.f32 %v1674_v9, %v3119_v62 }
 0x272   :  { %1429 = vrot.lane.b32.xlu0 %v1422_v11, %s2489_s21  ;;  %v1600_v11 = vmul.f32 %v1594_v28, %v3110_v22  ;;  %v1571_v35 = vsel %vm607_vm5, %v1568_v21, %v1570_v55 }
 0x273   :  { %v1569_v48 = vsel %vm607_vm5, %v1567_v31, %v1568_v21 }
 0x274   :  { %v1615_v25 = vrot.slane %v1600_v11, 3 }
 0x275   :  { %1431 = vrot.lane.b32.xlu1 %v1424_v53, %s2489_s21  ;;  %v1595_v53 = vmul.f32 %v1594_v28, %v3084_v51 }
 0x276   :  { %1425 = vrot.lane.b32.xlu0 %v1417_v18, %s2489_s21  ;;  %v1597_v18 = vmul.f32 %v1594_v28, %v3119_v62  ;;  %v1616_v46 = vsel %vm607_vm5, %v1613_v16, %v1615_v25  ;;  %v1688_v28 = vrot.slane %v1676_v0, 3  ;;  %v1690_v16 = vrot.slane %v1677_v23, 3 }
 0x278   :  { %v1610_v49 = vrot.slane %v1597_v18, 3 }
 0x279   :  { %1427 = vrot.lane.b32.xlu1 %v1419_v10, %s2489_s21  ;;  %v1607_v10 = vrot.slane %v1595_v53, 3 }
 0x27a   :  { %1469 = vrot.lane.b32.xlu0 %v1462_v43, %s2490_s24  ;;  %v1640_v43 = vmul.f32 %v1634_v50, %v3110_v22  ;;  %v1611_v37 = vsel %vm607_vm5, %v1608_v8, %v1610_v49 }
 0x27b   :  { %v1609_v61 = vsel %vm607_vm5, %v1607_v10, %v1608_v8 }
 0x27c   :  { %v1655_v27 = vrot.slane %v1640_v43, 3  ;;  %v1691_v43 = vsel %vm607_vm5, %v1688_v28, %v1690_v16 }
 0x27d   :  { %1471 = vrot.lane.b32.xlu1 %v1464_v40, %s2490_s24  ;;  %v1635_v40 = vmul.f32 %v1634_v50, %v3084_v51 }
 0x27e   :  { %1465 = vrot.lane.b32.xlu0 %v1457_v34, %s2490_s24  ;;  %v1637_v34 = vmul.f32 %v1634_v50, %v3119_v62  ;;  %v1656_v5 = vsel %vm607_vm5, %v1653_v58, %v1655_v27  ;;  %v1786_v50 = vstv %s3278_s4 }
 0x27f   :  { %v1647_v45 = vrot.slane %v1635_v40, 3  ;;  %v1792_v60 = vmul.f32 %v1786_v50, %v3110_v22  ;;  %v1789_v20 = vmul.f32 %v1786_v50, %v3119_v62 }
 0x281   :  { %1467 = vrot.lane.b32.xlu1 %v1459_v38, %s2490_s24  ;;  %v1649_v17 = vsel %vm607_vm5, %v1647_v45, %v1648_v54  ;;  %v1807_v23 = vrot.slane %v1792_v60, 4 }
 0x282   :  { %1509 = vrot.lane.b32.xlu0 %v1502_v47, %s2491_s26  ;;  %v1650_v47 = vrot.slane %v1637_v34, 3 }
 0x284   :  { %v1651_v4 = vsel %vm607_vm5, %v1648_v54, %v1650_v47 }
 0x285   :  { %1511 = vrot.lane.b32.xlu1 %v1504_v52, %s2491_s26  ;;  %v1024_v52 = vstv %s1023_s17 }
 0x286   :  { %1505 = vrot.lane.b32.xlu0 %v1497_v19, %s2491_s26  ;;  %v1675_v19 = vmul.f32 %v1674_v9, %v3084_v51  ;;  %v1027_v6 = vmul.f32 %v1024_v52, %v3077_v42  ;;  %v1028_v44 = vmul.f32 %v1024_v52, %v3082_v1  ;;  %v1025_v55 = vmul.f32 %v1024_v52, %v3084_v51 }
 0x287   :  { %v1026_v8 = vmul.f32 %v1024_v52, %v3089_v12 }
 0x288   :  { %v1687_v2 = vrot.slane %v1675_v19, 3  ;;  %v1138_v19 = vstv %s3302_s22  ;;  %s2494_s22 = smov 32  }
 0x289   :  { %1507 = vrot.lane.b32.xlu1 %v1499_v26, %s2491_s26  ;;  %v1746_v26 = vstv %s2364_s18 }
 0x28a   :  { %1581 = vrot.lane.b32.xlu0 %v1574_v24, %s2488_s19  ;;  %v1751_v24 = vmul.f32 %v1746_v26, %v3082_v1  ;;  %v1752_v29 = vmul.f32 %v1746_v26, %v3110_v22  ;;  %v1689_v53 = vsel %vm607_vm5, %v1687_v2, %v1688_v28  ;;  %v1748_v25 = vmul.f32 %v1746_v26, %v3089_v12 }
 0x28b   :  { %v1747_v30 = vmul.f32 %v1746_v26, %v3084_v51  ;;  %v1749_v58 = vmul.f32 %v1746_v26, %v3119_v62 }
 0x28c   :  { %v1760_v40 = vrot.slane %v1748_v25, 4 }
 0x28d   :  { %1583 = vrot.lane.b32.xlu1 %v1576_v33, %s2488_s19  ;;  %v1750_v33 = vmul.f32 %v1746_v26, %v3077_v42  ;;  %v1759_v9 = vrot.slane %v1747_v30, 4  ;;  %v1762_v45 = vrot.slane %v1749_v58, 4 }
 0x28e   :  { %1577 = vrot.lane.b32.xlu0 %v1569_v48, %s2488_s19  ;;  %v1696_v48 = vsel %vm607_vm5, %v1693_v13, %v1695_v32  ;;  %v1826_v13 = vstv %s3298_s20 }
 0x28f   :  { %v1764_v10 = vrot.slane %v1750_v33, 4  ;;  %v1761_v47 = vsel %vm800_vm6, %v1759_v9, %v1760_v40  ;;  %v1763_v32 = vsel %vm800_vm6, %v1760_v40, %v1762_v45  ;;  %v1831_v26 = vmul.f32 %v1826_v13, %v3082_v1 }
 0x290   :  { %v1802_v33 = vrot.slane %v1789_v20, 4 }
 0x291   :  { %1579 = vrot.lane.b32.xlu1 %v1571_v35, %s2488_s19  ;;  %v1765_v35 = vrot.slane %v1751_v24, 4  ;;  %v1830_v24 = vmul.f32 %v1826_v13, %v3077_v42 }
 0x292   :  { %1621 = vrot.lane.b32.xlu0 %v1614_v3, %s2489_s21 }
 0x293   :  { %v1766_v15 = vsel %vm800_vm6, %v1764_v10, %v1765_v35  ;;  %v1140_v10 = vmul.f32 %v1138_v19, %v3089_v12 }
 0x295   :  { %1623 = vrot.lane.b32.xlu1 %v1616_v46, %s2489_s21 }
 0x296   :  { %1617 = vrot.lane.b32.xlu0 %v1609_v61, %s2489_s21  ;;  %v1767_v61 = vrot.slane %v1752_v29, 4 }
 0x299   :  { %1619 = vrot.lane.b32.xlu1 %v1611_v37, %s2489_s21  ;;  %v1791_v37 = vmul.f32 %v1786_v50, %v3082_v1 }
 0x29a   :  { %1661 = vrot.lane.b32.xlu0 %v1654_v57, %s2490_s24  ;;  %v1790_v57 = vmul.f32 %v1786_v50, %v3077_v42 }
 0x29b   :  { %v1048_v38 = vpop.permute.xlu0 %1047  ;;  %v1805_v63 = vrot.slane %v1791_v37, 4  ;;  %v1829_v37 = vmul.f32 %v1826_v13, %v3119_v62 }
 0x29c   :  { %v1057_v21 = vadd.f32 %v1048_v38, %v1027_v6  ;;  %v1768_v38 = vsel %vm800_vm6, %v1765_v35, %v1767_v61  ;;  %v1804_v52 = vrot.slane %v1790_v57, 4  ;;  %v1139_v61 = vmul.f32 %v1138_v19, %v3084_v51 }
 0x29d   :  { %1663 = vrot.lane.b32.xlu1 %v1656_v5, %s2490_s24  ;;  %v1808_v29 = vsel %vm800_vm6, %v1805_v63, %v1807_v23  ;;  %v1141_v57 = vmul.f32 %v1138_v19, %v3119_v62 }
 0x29e   :  { %1657 = vrot.lane.b32.xlu0 %v1649_v17, %s2490_s24  ;;  %v1788_v17 = vmul.f32 %v1786_v50, %v3089_v12 }
 0x29f   :  { %v1050_v56 = vpop.permute.xlu1 %1049 }
 0x2a0   :  { %v1044_v36 = vpop.permute.xlu0 %1043  ;;  %v1058_v18 = vadd.f32 %v1050_v56, %v1028_v44  ;;  %v1787_v56 = vmul.f32 %v1786_v50, %v3084_v51  ;;  %v1800_v28 = vrot.slane %v1788_v17, 4  ;;  %v1832_v44 = vmul.f32 %v1826_v13, %v3110_v22 }
 0x2a1   :  { %1659 = vrot.lane.b32.xlu1 %v1651_v4, %s2490_s24  ;;  %v1055_v3 = vadd.f32 %v1044_v36, %v1025_v55  ;;  %v1142_v55 = vmul.f32 %v1138_v19, %v3077_v42  ;;  %v1866_v50 = vstv %s3316_s23 }
 0x2a2   :  { %1701 = vrot.lane.b32.xlu0 %v1694_v7, %s2491_s26  ;;  %v1806_v7 = vsel %vm800_vm6, %v1804_v52, %v1805_v63  ;;  %v1799_v2 = vrot.slane %v1787_v56, 4  ;;  %v1871_v9 = vmul.f32 %v1866_v50, %v3082_v1  ;;  %v1870_v63 = vmul.f32 %v1866_v50, %v3077_v42 }
 0x2a3   :  { %v1046_v31 = vpop.permute.xlu1 %1045  ;;  %v1842_v52 = vrot.slane %v1829_v37, 4  ;;  %v1872_v56 = vmul.f32 %v1866_v50, %v3110_v22 }
 0x2a4   :  { %v1074_v11 = vpop.permute.xlu0 %1073  ;;  %v1056_v27 = vadd.f32 %v1046_v31, %v1026_v8  ;;  %v1801_v25 = vsel %vm800_vm6, %v1799_v2, %v1800_v28  ;;  %v1869_v2 = vmul.f32 %v1866_v50, %v3119_v62 }
 0x2a5   :  { %v1083_v14 = vadd.f32 %v1074_v11, %v1057_v21  ;;  %1703 = vrot.lane.b32.xlu1 %v1696_v48, %s2491_s26  ;;  %v1143_v21 = vmul.f32 %v1138_v19, %v3082_v1  ;;  %v1828_v11 = vmul.f32 %v1826_v13, %v3089_v12 }
 0x2a6   :  { %1697 = vrot.lane.b32.xlu0 %v1689_v53, %s2491_s26  ;;  %v1144_v53 = vmul.f32 %v1138_v19, %v3110_v22  ;;  %v1885_v19 = vrot.slane %v1871_v9, 4 }
 0x2a7   :  { %v1076_v39 = vpop.permute.xlu1 %1075  ;;  %v1157_v8 = vrot.slane %v1143_v21, 1 }
 0x2a8   :  { %v1084_v46 = vadd.f32 %v1076_v39, %v1058_v18  ;;  %v1070_v49 = vpop.permute.xlu0 %1069  ;;  %v1827_v18 = vmul.f32 %v1826_v13, %v3084_v51  ;;  %v1847_v39 = vrot.slane %v1832_v44, 4  ;;  %v1159_v40 = vrot.slane %v1144_v53, 1 }
 0x2a9   :  { %v1081_v59 = vadd.f32 %v1070_v49, %v1055_v3  ;;  %1699 = vrot.lane.b32.xlu1 %v1691_v43, %s2491_s26  ;;  %v1844_v3 = vrot.slane %v1830_v24, 4  ;;  %v1156_v49 = vrot.slane %v1142_v55, 1  ;;  %v1840_v43 = vrot.slane %v1828_v11, 4 }
 0x2aa   :  { %1773 = vrot.lane.b32.xlu0 %v1766_v15, %s2488_s19 }
 0x2ab   :  { %v1072_v34 = vpop.permute.xlu1 %1071  ;;  %v1843_v44 = vsel %vm800_vm6, %v1840_v43, %v1842_v52 }
 0x2ac   :  { %v1082_v54 = vadd.f32 %v1072_v34, %v1056_v27  ;;  %v1100_v41 = vpop.permute.xlu0 %1099  ;;  %v1839_v34 = vrot.slane %v1827_v18, 4 }
 0x2ad   :  { %v1109_v5 = vadd.f32 %v1100_v41, %v1083_v14  ;;  %1775 = vrot.lane.b32.xlu1 %v1768_v38, %s2488_s19  ;;  %v1845_v14 = vrot.slane %v1831_v26, 4  ;;  %v1152_v38 = vrot.slane %v1140_v10, 1 }
 0x2ae   :  { %1769 = vrot.lane.b32.xlu0 %v1761_v47, %s2488_s19  ;;  %v1151_v47 = vrot.slane %v1139_v61, 1 }
 0x2af   :  { %v1102_v0 = vpop.permute.xlu1 %1101  ;;  %v1846_v15 = vsel %vm800_vm6, %v1844_v3, %v1845_v14  ;;  %v1848_v41 = vsel %vm800_vm6, %v1845_v14, %v1847_v39 }
 0x2b0   :  { %v1110_v36 = vadd.f32 %v1102_v0, %v1084_v46  ;;  %v1096_v4 = vpop.permute.xlu0 %1095  ;;  %v1803_v46 = vsel %vm800_vm6, %v1800_v28, %v1802_v33  ;;  %v1160_v0 = vsel %vm221_vm3, %v1157_v8, %v1159_v40  ;;  %v1153_v23 = vsel %vm221_vm3, %v1151_v47, %v1152_v38 }
 0x2b1   :  { %v1107_v6 = vadd.f32 %v1096_v4, %v1081_v59  ;;  %1771 = vrot.lane.b32.xlu1 %v1763_v32, %s2488_s19  ;;  %v1868_v4 = vmul.f32 %v1866_v50, %v3089_v12  ;;  %v1867_v28 = vmul.f32 %v1866_v50, %v3084_v51  ;;  %s2353_s19 = sld [smem:[#allocation9 + $0xa]] }
 0x2b2   :  { %1813 = vrot.lane.b32.xlu0 %v1806_v7, %s2489_s21  ;;  %v1884_v7 = vrot.slane %v1870_v63, 4 }
 0x2b3   :  { %v1098_v31 = vpop.permute.xlu1 %1097  ;;  %v1880_v11 = vrot.slane %v1868_v4, 4  ;;  %v1879_v51 = vrot.slane %v1867_v28, 4 }
 0x2b4   :  { %v1108_v48 = vadd.f32 %v1098_v31, %v1082_v54  ;;  %v1126_v16 = vpop.permute.xlu0 %1125  ;;  %v1158_v54 = vsel %vm221_vm3, %v1156_v49, %v1157_v8  ;;  %v1887_v31 = vrot.slane %v1872_v56, 4  ;;  %v1886_v12 = vsel %vm800_vm6, %v1884_v7, %v1885_v19 }
 0x2b5   :  { %v1135_v35 = vadd.f32 %v1126_v16, %v1109_v5  ;;  %1815 = vrot.lane.b32.xlu1 %v1808_v29, %s2489_s21  ;;  %v1841_v5 = vsel %vm800_vm6, %v1839_v34, %v1840_v43  ;;  %v1881_v18 = vsel %vm800_vm6, %v1879_v51, %v1880_v11 }
 0x2b6   :  { %1809 = vrot.lane.b32.xlu0 %v1801_v25, %s2489_s21  ;;  %v1888_v53 = vsel %vm800_vm6, %v1885_v19, %v1887_v31 }
 0x2b7   :  { %v1128_v30 = vpop.permute.xlu1 %1127  ;;  %v1167_v60 = vadd.f32 %v1158_v54, %v1135_v35  ;;  %v1882_v35 = vrot.slane %v1869_v2, 4  ;;  %v1330_v40 = vstv %s2353_s19 }
 0x2b8   :  { %v1136_v58 = vadd.f32 %v1128_v30, %v1110_v36  ;;  %v1122_v59 = vpop.permute.xlu0 %1121  ;;  %v1154_v36 = vrot.slane %v1141_v57, 1  ;;  %v1335_v37 = vmul.f32 %v1330_v40, %v3082_v1  ;;  %v1334_v57 = vmul.f32 %v1330_v40, %v3077_v42 }
 0x2b9   :  { %v1133_v27 = vadd.f32 %v1122_v59, %v1107_v6  ;;  %1811 = vrot.lane.b32.xlu1 %v1803_v46, %s2489_s21  ;;  %v1883_v39 = vsel %vm800_vm6, %v1880_v11, %v1882_v35  ;;  %s2358_s21 = sld [smem:[#allocation9 + $0xf]] }
 0x2ba   :  { %1853 = vrot.lane.b32.xlu0 %v1846_v15, %s2490_s24  ;;  %v1168_v32 = vadd.f32 %v1160_v0, %v1136_v58  ;;  %v1155_v55 = vsel %vm221_vm3, %v1152_v38, %v1154_v36  ;;  %v1349_v38 = vrot.slane %v1335_v37, 2  ;;  %v1348_v47 = vrot.slane %v1334_v57, 2 }
 0x2bb   :  { %v1124_v45 = vpop.permute.xlu1 %1123  ;;  %v1165_v6 = vadd.f32 %v1153_v23, %v1133_v27  ;;  %vm1953_vm3 = vcmask 123904  }
 0x2bc   :  { %v1134_v17 = vadd.f32 %v1124_v45, %v1108_v48  ;;  %v1198_v13 = vpop.permute.xlu0 %1197 }
 0x2bd   :  { %v1207_v20 = vadd.f32 %v1198_v13, %v1167_v60  ;;  %1855 = vrot.lane.b32.xlu1 %v1848_v41, %s2490_s24  ;;  %v1336_v41 = vmul.f32 %v1330_v40, %v3110_v22  ;;  %v1350_v13 = vsel %vm414_vm4, %v1348_v47, %v1349_v38 }
 0x2be   :  { %1849 = vrot.lane.b32.xlu0 %v1841_v5, %s2490_s24  ;;  %v1166_v48 = vadd.f32 %v1155_v55, %v1134_v17 }
 0x2bf   :  { %v1200_v26 = vpop.permute.xlu1 %1199  ;;  %v1351_v17 = vrot.slane %v1336_v41, 2  ;;  %v2431_v41 = vld [vmem:[#allocation2 + $0x18] sm:$0xff] }
 0x2c0   :  { %v1208_v24 = vadd.f32 %v1200_v26, %v1168_v32  ;;  %v1194_v21 = vpop.permute.xlu0 %1193 }
 0x2c1   :  { %v1205_v33 = vadd.f32 %v1194_v21, %v1165_v6  ;;  %1851 = vrot.lane.b32.xlu1 %v1843_v44, %s2490_s24  ;;  %v1352_v42 = vsel %vm414_vm4, %v1349_v38, %v1351_v17  ;;  %s2363_s24 = sld [smem:[#allocation9 + $0x14]] }
 0x2c2   :  { %1893 = vrot.lane.b32.xlu0 %v1886_v12, %s2491_s26 }
 0x2c3   :  { %v1196_v16 = vpop.permute.xlu1 %1195 }
 0x2c4   :  { %v1206_v29 = vadd.f32 %v1196_v16, %v1166_v48  ;;  %v1238_v14 = vpop.permute.xlu0 %1237 }
 0x2c5   :  { %v1247_v25 = vadd.f32 %v1238_v14, %v1207_v20  ;;  %1895 = vrot.lane.b32.xlu1 %v1888_v53, %s2491_s26 }
 0x2c6   :  { %1889 = vrot.lane.b32.xlu0 %v1881_v18, %s2491_s26 }
 0x2c7   :  { %v1240_v50 = vpop.permute.xlu1 %1239 }
 0x2c8   :  { %v1248_v3 = vadd.f32 %v1240_v50, %v1208_v24  ;;  %v1234_v8 = vpop.permute.xlu0 %1233  ;;  %v3405_v50 = vld [vmem:[#allocation2 + $0x8] sm:$0xff] }
 0x2c9   :  { %v1245_v10 = vadd.f32 %v1234_v8, %v1205_v33  ;;  %1891 = vrot.lane.b32.xlu1 %v1883_v39, %s2491_s26  ;;  %v3410_v39 = vld [vmem:[#allocation2] sm:$0xff] }
 0x2cb   :  { %v1236_v30 = vpop.permute.xlu1 %1235 }
 0x2cc   :  { %v1246_v46 = vadd.f32 %v1236_v30, %v1206_v29  ;;  %v1278_v49 = vpop.permute.xlu0 %1277 }
 0x2cd   :  { %v1287_v43 = vadd.f32 %v1278_v49, %v1247_v25  ;;  %v1333_v49 = vmul.f32 %v1330_v40, %v3119_v62 }
 0x2cf   :  { %v1280_v61 = vpop.permute.xlu1 %1279  ;;  %v1346_v37 = vrot.slane %v1333_v49, 2 }
 0x2d0   :  { %v1288_v58 = vadd.f32 %v1280_v61, %v1248_v3  ;;  %v1274_v59 = vpop.permute.xlu0 %1273  ;;  %v1332_v3 = vmul.f32 %v3405_v50, %v1330_v40 }
 0x2d1   :  { %v1285_v15 = vadd.f32 %v1274_v59, %v1245_v10  ;;  %v1331_v10 = vmul.f32 %v3410_v39, %v1330_v40 }
 0x2d3   :  { %v1276_v27 = vpop.permute.xlu1 %1275  ;;  %v1343_v61 = vrot.slane %v1331_v10, 2 }
 0x2d4   :  { %v1286_v34 = vadd.f32 %v1276_v27, %v1246_v46  ;;  %v1318_v9 = vpop.permute.xlu0 %1317  ;;  %v1344_v46 = vrot.slane %v1332_v3, 2  ;;  %v2430_v27 = vld [vmem:[#allocation2 + $0x20] sm:$0xff]  ;;  %v2432_v3 = vld [vmem:[#allocation2 + $0x10] sm:$0xf] }
 0x2d5   :  { %v1327_v54 = vadd.f32 %v1318_v9, %v1287_v43 }
 0x2d7   :  { %v1320_v45 = vpop.permute.xlu1 %1319  ;;  %v1359_v52 = vadd.f32 %v1350_v13, %v1327_v54 }
 0x2d8   :  { %v1328_v60 = vadd.f32 %v1320_v45, %v1288_v58  ;;  %v1314_v5 = vpop.permute.xlu0 %1313  ;;  %v1522_v58 = vstv %s2358_s21 }
 0x2d9   :  { %v1325_v63 = vadd.f32 %v1314_v5, %v1285_v15  ;;  %v1345_v15 = vsel %vm414_vm4, %v1343_v61, %v1344_v46  ;;  %v1526_v38 = vmul.f32 %v2431_v41, %v1522_v58  ;;  %v1528_v62 = vmul.f32 %v1522_v58, %v3110_v22 }
 0x2da   :  { %v1360_v19 = vadd.f32 %v1352_v42, %v1328_v60  ;;  %v1347_v5 = vsel %vm414_vm4, %v1344_v46, %v1346_v37  ;;  %v1524_v13 = vmul.f32 %v3405_v50, %v1522_v58  ;;  %v1525_v10 = vmul.f32 %v2432_v3, %v1522_v58 }
 0x2db   :  { %v1316_v0 = vpop.permute.xlu1 %1315  ;;  %v1357_v57 = vadd.f32 %v1345_v15, %v1325_v63  ;;  %v1540_v42 = vrot.slane %v1526_v38, 3  ;;  %v1714_v61 = vstv %s2363_s24  ;;  %s2498_s24 = smov 96   ;;  %vm1965_vm4 = vcmask 255104  }
 0x2dc   :  { %v3376_v1 = vadd.f32 %v1316_v0, %v1286_v34  ;;  %v1390_v56 = vpop.permute.xlu0 %1389  ;;  %v1527_v34 = vmul.f32 %v2430_v27, %v1522_v58  ;;  %v1718_v38 = vmul.f32 %v2431_v41, %v1714_v61 }
 0x2dd   :  { %v1399_v20 = vadd.f32 %v1390_v56, %v1359_v52 }
 0x2de   :  { %v1541_v17 = vrot.slane %v1527_v34, 3  ;;  %v1358_v63 = vadd.f32 %v1347_v5, %v3376_v1  ;;  %v1719_v34 = vmul.f32 %v2430_v27, %v1714_v61  ;;  %v1732_v41 = vrot.slane %v1718_v38, 4 }
 0x2df   :  { %v1392_v36 = vpop.permute.xlu1 %1391 }
 0x2e0   :  { %v1400_v4 = vadd.f32 %v1392_v36, %v1360_v19  ;;  %v1386_v32 = vpop.permute.xlu0 %1385  ;;  %v1523_v19 = vmul.f32 %v3410_v39, %v1522_v58  ;;  %v1538_v58 = vrot.slane %v1525_v10, 3  ;;  %v2492_v10 = vmov 1983009808  }
 0x2e1   :  { %v1397_v45 = vadd.f32 %v1386_v32, %v1357_v57  ;;  %v1543_v32 = vrot.slane %v1528_v62, 3 }
 0x2e3   :  { %v1388_v23 = vpop.permute.xlu1 %1387 }
 0x2e4   :  { %v1430_v26 = vpop.permute.xlu0 %1429  ;;  %v1398_v22 = vadd.f32 %v1388_v23, %v1358_v63 }
 0x2e5   :  { %v1439_v54 = vadd.f32 %v1430_v26, %v1399_v20 }
 0x2e7   :  { %v1432_v6 = vpop.permute.xlu1 %1431 }
 0x2e8   :  { %v1426_v7 = vpop.permute.xlu0 %1425  ;;  %v1440_v47 = vadd.f32 %v1432_v6, %v1400_v4  ;;  %v1542_v4 = vsel %vm607_vm5, %v1540_v42, %v1541_v17  ;;  %v1536_v6 = vrot.slane %v1524_v13, 3 }
 0x2e9   :  { %v1437_v52 = vadd.f32 %v1426_v7, %v1397_v45 }
 0x2eb   :  { %v3379_v28 = vpop.permute.xlu1 %1427 }
 0x2ec   :  { %v1470_v24 = vpop.permute.xlu0 %1469  ;;  %v1438_v1 = vadd.f32 %v3379_v28, %v1398_v22 }
 0x2ed   :  { %v1479_v60 = vadd.f32 %v1470_v24, %v1439_v54 }
 0x2ef   :  { %v1472_v21 = vpop.permute.xlu1 %1471 }
 0x2f0   :  { %v1466_v44 = vpop.permute.xlu0 %1465  ;;  %v1480_v20 = vadd.f32 %v1472_v21, %v1440_v47  ;;  %v1539_v47 = vsel %vm607_vm5, %v1536_v6, %v1538_v58 }
 0x2f1   :  { %v1477_v36 = vadd.f32 %v1466_v44, %v1437_v52  ;;  %v1544_v44 = vsel %vm607_vm5, %v1541_v17, %v1543_v32  ;;  %v1733_v17 = vrot.slane %v1719_v34, 4 }
 0x2f3   :  { %v3381_v31 = vpop.permute.xlu1 %1467 }
 0x2f4   :  { %v1510_v2 = vpop.permute.xlu0 %1509  ;;  %v1478_v49 = vadd.f32 %v3381_v31, %v1438_v1  ;;  %v1926_v1 = vunpack.c.l.s4 %v2492_v10 }
 0x2f5   :  { %v1519_v56 = vadd.f32 %v1510_v2, %v1479_v60  ;;  %v1535_v2 = vrot.slane %v1523_v19, 3  ;;  %v2433_v60 = vld [vmem:[#allocation2 + $0x28] sm:$0xf]  ;;  %v1734_v19 = vsel %vm800_vm6, %v1732_v41, %v1733_v17 }
 0x2f6   :  { %v1720_v62 = vmul.f32 %v2433_v60, %v1714_v61 }
 0x2f7   :  { %v1512_v33 = vpop.permute.xlu1 %1511  ;;  %v1551_v21 = vadd.f32 %v1542_v4, %v1519_v56  ;;  %v1537_v37 = vsel %vm607_vm5, %v1535_v2, %v1536_v6  ;;  %vm1979_vm5 = vcmask 386304  }
 0x2f8   :  { %v1506_v12 = vpop.permute.xlu0 %1505  ;;  %v1520_v24 = vadd.f32 %v1512_v33, %v1480_v20  ;;  %v1735_v20 = vrot.slane %v1720_v62, 4 }
 0x2f9   :  { %v1517_v7 = vadd.f32 %v1506_v12, %v1477_v36 }
 0x2fa   :  { %v1552_v15 = vadd.f32 %v1544_v44, %v1520_v24 }
 0x2fb   :  { %v3383_v55 = vpop.permute.xlu1 %1507  ;;  %v1549_v12 = vadd.f32 %v1537_v37, %v1517_v7  ;;  %v1928_v7 = vlaneseq }
 0x2fc   :  { %v3385_v11 = vpop.permute.xlu0 %1581  ;;  %v1518_v28 = vadd.f32 %v3383_v55, %v1478_v49  ;;  %v1716_v55 = vmul.f32 %v3405_v50, %v1714_v61 }
 0x2fd   :  { %v1591_v23 = vadd.f32 %v3385_v11, %v1551_v21  ;;  %v1929_v37 = vshrl.u32 %v1928_v7, 7 }
 0x2fe   :  { %v1550_v63 = vadd.f32 %v1539_v47, %v1518_v28  ;;  %v1728_v22 = vrot.slane %v1716_v55, 4 }
 0x2ff   :  { %v3387_v48 = vpop.permute.xlu1 %1583 }
 0x300   :  { %v3389_v16 = vpop.permute.xlu0 %1577  ;;  %v1592_v31 = vadd.f32 %v3387_v48, %v1552_v15  ;;  %v1927_v15 = vunpack.c.0.s8 %v1926_v1 }
 0x301   :  { %v1589_v11 = vadd.f32 %v3389_v16, %v1549_v12 }
 0x303   :  { %v3391_v51 = vpop.permute.xlu1 %1579 }
 0x304   :  { %v3393_v29 = vpop.permute.xlu0 %1621  ;;  %v1590_v52 = vadd.f32 %v3391_v51, %v1550_v63 }
 0x305   :  { %v1631_v54 = vadd.f32 %v3393_v29, %v1591_v23 }
 0x307   :  { %v3395_v14 = vpop.permute.xlu1 %1623 }
 0x308   :  { %v3397_v53 = vpop.permute.xlu0 %1617  ;;  %v1632_v27 = vadd.f32 %v3395_v14, %v1592_v31  ;;  %v1717_v14 = vmul.f32 %v2432_v3, %v1714_v61  ;;  %v3474_v31 = vsub.s32 %v1927_v15, %v1929_v37 }
 0x309   :  { %v1629_v29 = vadd.f32 %v3397_v53, %v1589_v11 }
 0x30a   :  { %v1730_v24 = vrot.slane %v1717_v14, 4 }
 0x30b   :  { %v3399_v35 = vpop.permute.xlu1 %1619 }
 0x30c   :  { %v3401_v25 = vpop.permute.xlu0 %1661 }
 0x30d   :  { %v1671_v45 = vadd.f32 %v3401_v25, %v1631_v54  ;;  %v1715_v25 = vmul.f32 %v3410_v39, %v1714_v61  ;;  %v1906_v61 = vstv %s3754_s3 }
 0x30f   :  { %v3403_v18 = vpop.permute.xlu1 %1663  ;;  %v1727_v32 = vrot.slane %v1715_v25, 4 }
 0x310   :  { %v3408_v8 = vpop.permute.xlu0 %1657  ;;  %v1672_v16 = vadd.f32 %v3403_v18, %v1632_v27 }
 0x311   :  { %v1669_v56 = vadd.f32 %v3408_v8, %v1629_v29  ;;  %v1736_v8 = vsel %vm800_vm6, %v1733_v17, %v1735_v20 }
 0x313   :  { %v3413_v30 = vpop.permute.xlu1 %1659 }
 0x314   :  { %v3416_v43 = vpop.permute.xlu0 %1701 }
 0x315   :  { %v1711_v48 = vadd.f32 %v3416_v43, %v1671_v45  ;;  %v1630_v43 = vadd.f32 %v3399_v35, %v1590_v52 }
 0x317   :  { %v3418_v59 = vpop.permute.xlu1 %1703  ;;  %v1743_v36 = vadd.f32 %v1734_v19, %v1711_v48  ;;  %v1670_v39 = vadd.f32 %v3413_v30, %v1630_v43  ;;  %v2213_v43 = vld [vmem:[%s3756_s5 + $0xf8] sm:$0xff] }
 0x318   :  { %v3421_v9 = vpop.permute.xlu0 %1697  ;;  %v1712_v50 = vadd.f32 %v3418_v59, %v1672_v16  ;;  %v1729_v59 = vsel %vm800_vm6, %v1727_v32, %v1728_v22  ;;  %2370 = vmatprep.subr.mxu0 %v2213_v43 }
 0x319   :  { %v1709_v18 = vadd.f32 %v3421_v9, %v1669_v56 }
 0x31a   :  { %v1744_v6 = vadd.f32 %v1736_v8, %v1712_v50 }
 0x31b   :  { %v3424_v40 = vpop.permute.xlu1 %1699  ;;  %v1741_v9 = vadd.f32 %v1729_v59, %v1709_v18 }
 0x31c   :  { %v3428_v0 = vpop.permute.xlu0 %1773  ;;  %v1710_v35 = vadd.f32 %v3424_v40, %v1670_v39 }
 0x31d   :  { %v1783_v51 = vadd.f32 %v3428_v0, %v1743_v36  ;;  %v1731_v0 = vsel %vm800_vm6, %v1728_v22, %v1730_v24  ;;  %vm1991_vm6 = vcmask 517504  }
 0x31e   :  { %v1742_v34 = vadd.f32 %v1731_v0, %v1710_v35 }
 0x31f   :  { %v3432_v26 = vpop.permute.xlu1 %1775 }
 0x320   :  { %v3435_v46 = vpop.permute.xlu0 %1769  ;;  %v1784_v2 = vadd.f32 %v3432_v26, %v1744_v6 }
 0x321   :  { %v1781_v30 = vadd.f32 %v3435_v46, %v1741_v9  ;;  %v2197_v9 = vld [vmem:[%s3756_s5 + $0x78] sm:$0xff] }
 0x322   :  { %2371 = vmatpush3.msra.mxu0 %v2197_v9 }
 0x323   :  { %v3441_v33 = vpop.permute.xlu1 %1771 }
 0x324   :  { %v1814_v57 = vpop.permute.xlu0 %1813  ;;  %v1782_v26 = vadd.f32 %v3441_v33, %v1742_v34 }
 0x325   :  { %v1823_v21 = vadd.f32 %v1814_v57, %v1783_v51 }
 0x327   :  { %v1816_v5 = vpop.permute.xlu1 %1815 }
 0x328   :  { %v1810_v13 = vpop.permute.xlu0 %1809  ;;  %v1824_v44 = vadd.f32 %v1816_v5, %v1784_v2  ;;  %v2196_v2 = vld [vmem:[%s3756_s5 + $0x70] sm:$0xff] }
 0x329   :  { %v1821_v40 = vadd.f32 %v1810_v13, %v1781_v30 }
 0x32b   :  { %v1812_v42 = vpop.permute.xlu1 %1811 }
 0x32c   :  { %v1854_v53 = vpop.permute.xlu0 %1853  ;;  %v1822_v45 = vadd.f32 %v1812_v42, %v1782_v26 }
 0x32d   :  { %v1863_v49 = vadd.f32 %v1854_v53, %v1823_v21  ;;  %v2212_v21 = vld [vmem:[%s3756_s5 + $0xf0] sm:$0xff] }
 0x32e   :  { %2372 = vmatprep.subr.mxu0 %v2212_v21  ;;  %v2207_v21 = vld [vmem:[%s3756_s5 + $0xc8] sm:$0xff] }
 0x32f   :  { %v1856_v4 = vpop.permute.xlu1 %1855  ;;  %2373 = vmatpush3.msra.mxu0 %v2196_v2 }
 0x330   :  { %v1850_v3 = vpop.permute.xlu0 %1849  ;;  %v1864_v57 = vadd.f32 %v1856_v4, %v1824_v44  ;;  %v2211_v44 = vld [vmem:[%s3756_s5 + $0xe8] sm:$0xff] }
 0x331   :  { %v1861_v12 = vadd.f32 %v1850_v3, %v1821_v40  ;;  %2374 = vmatprep.subr.mxu0 %v2211_v44 }
 0x333   :  { %v1852_v23 = vpop.permute.xlu1 %1851 }
 0x334   :  { %v1894_v58 = vpop.permute.xlu0 %1893  ;;  %v1862_v47 = vadd.f32 %v1852_v23, %v1822_v45 }
 0x335   :  { %v1903_v28 = vadd.f32 %v1894_v58, %v1863_v49 }
 0x337   :  { %v1909_v46 = vadd.f32 %v1906_v61, %v1903_v28  ;;  %v1896_v54 = vpop.permute.xlu1 %1895 }
 0x338   :  { %v1904_v38 = vadd.f32 %v1896_v54, %v1864_v57  ;;  %v1890_v11 = vpop.permute.xlu0 %1889 }
 0x339   :  { %vm1913_vm11 = vcmp.gt.f32.partialorder %v1909_v46, 0.0  ;;  %v1917_v60 = vmul.f32 0.01, %v1909_v46  ;;  %v1901_v62 = vadd.f32 %v1890_v11, %v1861_v12  ;;  %v2194_v11 = vld [vmem:[%s3756_s5 + $0x60] sm:$0xff] }
 0x33a   :  { %v1910_v5 = vadd.f32 %v1906_v61, %v1904_v38  ;;  %v2210_v38 = vld [vmem:[%s3756_s5 + $0xe0] sm:$0xff] }
 0x33b   :  { %v1921_v27 = vsel %vm1913_vm11, %v1909_v46, %v1917_v60  ;;  %v1907_v17 = vadd.f32 %v1906_v61, %v1901_v62  ;;  %v1892_v55 = vpop.permute.xlu1 %1891  ;;  %vm2302_vm11 = vcmask 58368  }
 0x33c   :  { %v1938_v13 = vrot.slane %v1921_v27, %v3474_v31  ;;  %v2001_v63 = vcombine.high %v1921_v27, %v1921_v27  ;;  %vm1914_vm12 = vcmp.gt.f32.partialorder %v1910_v5, 0.0  ;;  %v1918_v33 = vmul.f32 0.01, %v1910_v5 }
 0x33d   :  { %vm1911_vm14 = vcmp.gt.f32.partialorder %v1907_v17, 0.0  ;;  %v1915_v29 = vmul.f32 0.01, %v1907_v17  ;;  %v1902_v48 = vadd.f32 %v1892_v55, %v1862_v47 }
 0x33e   :  { %v3478_v16 = vrot.slane %v2001_v63, %v3474_v31  ;;  %v1922_v41 = vsel %vm1914_vm12, %v1910_v5, %v1918_v33  ;;  %v3480_v25 = vcombine.high %v1938_v13, %v1938_v13  ;;  %v3482_v52 = vrot.slane %v1938_v13, 7 }
 0x33f   :  { %v3485_v56 = vrot.slane %v1922_v41, %v3474_v31  ;;  %v2127_v20 = vcombine.high %v1922_v41, %v1922_v41  ;;  %v1919_v14 = vsel %vm1911_vm14, %v1907_v17, %v1915_v29  ;;  %v1908_v42 = vadd.f32 %v1906_v61, %v1902_v48  ;;  %v2209_v48 = vld [vmem:[%s3756_s5 + $0xd8] sm:$0xff] }
 0x340   :  { %v3488_v50 = vrot.slane %v1919_v14, %v3474_v31  ;;  %v1993_v19 = vcombine.high %v1919_v14, %v1919_v14  ;;  %v1971_v22 = vrot.slane %v3480_v25, 7  ;;  %v3492_v53 = vrot.slane %v3478_v16, 7 }
 0x341   :  { %v3498_v18 = vrot.slane %v2127_v20, %v3474_v31  ;;  %vm1912_vm2 = vcmp.gt.f32.partialorder %v1908_v42, 0.0  ;;  %v1916_v36 = vmul.f32 0.01, %v1908_v42  ;;  %v3502_v32 = vcombine.high %v3485_v56, %v3485_v56 }
 0x342   :  { %v1955_v39 = vrot.slane %v3488_v50, 1  ;;  %v1967_v51 = vcombine.high %v3488_v50, %v3488_v50  ;;  %v3508_v8 = vrot.slane %v1993_v19, %v3474_v31  ;;  %v3512_v24 = vcombine.high %v3478_v16, %v3478_v16  ;;  %v2193_v19 = vld [vmem:[%s3756_s5 + $0x58] sm:$0xff] }
 0x343   :  { %v1920_v4 = vsel %vm1912_vm2, %v1908_v42, %v1916_v36  ;;  %v2099_v6 = vrot.slane %v3502_v32, 7  ;;  %v3516_v59 = vrot.slane %v3498_v18, 7  ;;  %v3520_v3 = vcombine.high %v3498_v18, %v3498_v18 }
 0x344   :  { %v1981_v10 = vrot.slane %v1967_v51, 1  ;;  %v2021_v1 = vrot.slane %v3508_v8, 1  ;;  %v3525_v7 = vcombine.high %v3508_v8, %v3508_v8  ;;  %v3528_v35 = vrot.slane %v1920_v4, %v3474_v31 }
 0x345   :  { %v2119_v30 = vcombine.high %v1920_v4, %v1920_v4  ;;  %v1958_v0 = vsel %vm1944_vm13, %v1938_v13, %v1955_v39  ;;  %v1972_v49 = vsel %vm1944_vm13, %v1971_v22, %v1967_v51  ;;  %v2012_v23 = vsel %vm1944_vm13, %v3492_v53, %v3508_v8  ;;  %v2208_v39 = vld [vmem:[%s3756_s5 + $0xd0] sm:$0xff] }
 0x346   :  { %v2084_v61 = vrot.slane %v3528_v35, 1  ;;  %v2095_v15 = vcombine.high %v3528_v35, %v3528_v35  ;;  %v1959_v37 = vsel %vm1946_vm15, %v1938_v13, %v1958_v0  ;;  %v1973_v58 = vsel %vm1946_vm15, %v1971_v22, %v1972_v49 }
 0x347   :  { %v2126_v34 = vrot.slane %v2119_v30, %v3474_v31  ;;  %v1960_v40 = vsel %vm1948_vm0, %v1938_v13, %v1959_v37  ;;  %v1974_v28 = vsel %vm1948_vm0, %v1971_v22, %v1973_v58  ;;  %v1984_v57 = vsel %vm1944_vm13, %v3480_v25, %v1981_v10  ;;  %v2195_v31 = vld [vmem:[%s3756_s5 + $0x68] sm:$0xff] }
 0x348   :  { %v2108_v26 = vrot.slane %v2095_v15, 1  ;;  %v1961_v12 = vsel %vm1950_vm1, %v1938_v13, %v1960_v40  ;;  %v2087_v46 = vsel %vm1944_vm13, %v3485_v56, %v2084_v61  ;;  %v1975_v54 = vsel %vm1950_vm1, %v1971_v22, %v1974_v28  ;;  %2375 = vmatpush3.msra.mxu0 %v2195_v31 }
 0x349   :  { %v2146_v45 = vrot.slane %v2126_v34, 1  ;;  %v3570_v60 = vcombine.high %v2126_v34, %v2126_v34  ;;  %1962 = vrot.lane.b32.xlu0 %v1961_v12, %s2493_s16  ;;  %v2088_v62 = vsel %vm1946_vm15, %v3485_v56, %v2087_v46  ;;  %v2100_v5 = vsel %vm1944_vm13, %v2099_v6, %v2095_v15  ;;  %2376 = vmatprep.subr.mxu0 %v2210_v38  ;;  %v2190_v46 = vld [vmem:[%s3756_s5 + $0x40] sm:$0xff] }
 0x34a   :  { %v2089_v47 = vsel %vm1948_vm0, %v3485_v56, %v2088_v62  ;;  %v2101_v27 = vsel %vm1946_vm15, %v2099_v6, %v2100_v5  ;;  %v1985_v17 = vsel %vm1946_vm15, %v3480_v25, %v1984_v57  ;;  %v2111_v55 = vsel %vm1944_vm13, %v3502_v32, %v2108_v26  ;;  %2377 = vmatpush3.msra.mxu0 %v2194_v11  ;;  %v2206_v57 = vld [vmem:[%s3756_s5 + $0xc0] sm:$0xff] }
 0x34b   :  { %v2090_v13 = vsel %vm1950_vm1, %v3485_v56, %v2089_v47  ;;  %v2102_v63 = vsel %vm1948_vm0, %v2099_v6, %v2101_v27  ;;  %v1986_v33 = vsel %vm1948_vm0, %v3480_v25, %v1985_v17  ;;  %v2112_v29 = vsel %vm1946_vm15, %v3502_v32, %v2111_v55  ;;  %2378 = vmatprep.subr.mxu0 %v2209_v48  ;;  %v2189_v27 = vld [vmem:[%s3756_s5 + $0x38] sm:$0xff] }
 0x34c   :  { %2091 = vrot.lane.b32.xlu1 %v2090_v13, %s2493_s16  ;;  %v2103_v41 = vsel %vm1950_vm1, %v2099_v6, %v2102_v63  ;;  %v1987_v20 = vsel %vm1950_vm1, %v3480_v25, %v1986_v33  ;;  %v2113_v14 = vsel %vm1948_vm0, %v3502_v32, %v2112_v29  ;;  %v2013_v42 = vsel %vm1946_vm15, %v3492_v53, %v2012_v23  ;;  %v2192_v6 = vld [vmem:[%s3756_s5 + $0x50] sm:$0xff]  ;;  %v2191_v23 = vld [vmem:[%s3756_s5 + $0x48] sm:$0xff]  ;;  %s2497_s16 = smov 80   ;;  %v2202_v33 = vld [vmem:[%s3756_s5 + $0xa0] sm:$0xff] }
 0x34d   :  { %1976 = vrot.lane.b32.xlu0 %v1975_v54, %s2494_s22  ;;  %v2114_v22 = vsel %vm1950_vm1, %v3502_v32, %v2113_v14  ;;  %v2014_v43 = vsel %vm1948_vm0, %v3492_v53, %v2013_v42  ;;  %v2138_v25 = vsel %vm1944_vm13, %v3516_v59, %v2126_v34  ;;  %v2024_v36 = vsel %vm1944_vm13, %v3478_v16, %v2021_v1  ;;  %v2203_v13 = vld [vmem:[%s3756_s5 + $0xa8] sm:$0xff]  ;;  %v2186_v29 = vld [vmem:[%s3756_s5 + $0x20] sm:$0xff]  ;;  %v2201_v48 = vld [vmem:[%s3756_s5 + $0x98] sm:$0xff] }
 0x34e   :  { %v2015_v51 = vsel %vm1950_vm1, %v3492_v53, %v2014_v43  ;;  %v2139_v32 = vsel %vm1946_vm15, %v3516_v59, %v2138_v25  ;;  %v2025_v8 = vsel %vm1946_vm15, %v3478_v16, %v2024_v36  ;;  %v2149_v4 = vsel %vm1944_vm13, %v3498_v18, %v2146_v45  ;;  %2379 = vmatpush3.msra.mxu0 %v2193_v19  ;;  %v2205_v45 = vld [vmem:[%s3756_s5 + $0xb8] sm:$0xff]  ;;  %v2187_v63 = vld [vmem:[%s3756_s5 + $0x28] sm:$0xff]  ;;  %v2184_v14 = vld [vmem:[%s3756_s5 + $0x10] sm:$0xff] }
 0x34f   :  { %v2140_v10 = vsel %vm1948_vm0, %v3516_v59, %v2139_v32  ;;  %v2026_v53 = vsel %vm1948_vm0, %v3478_v16, %v2025_v8  ;;  %v2150_v1 = vsel %vm1946_vm15, %v3498_v18, %v2149_v4  ;;  %v2037_v9 = vrot.slane %v3512_v24, 7  ;;  %2380 = vmatprep.subr.mxu0 %v2208_v39  ;;  %v2199_v42 = vld [vmem:[%s3756_s5 + $0x88] sm:$0xff]  ;;  %v2182_v43 = vld [vmem:[%s3756_s5] sm:$0xff] }
 0x350   :  { %2104 = vrot.lane.b32.xlu1 %v2103_v41, %s2494_s22  ;;  %v2141_v2 = vsel %vm1950_vm1, %v3516_v59, %v2140_v10  ;;  %v2027_v30 = vsel %vm1950_vm1, %v3478_v16, %v2026_v53  ;;  %v2151_v0 = vsel %vm1948_vm0, %v3498_v18, %v2150_v1  ;;  %v2161_v49 = vrot.slane %v3520_v3, 7  ;;  %2381 = vmatpush3.msra.mxu0 %v2192_v6  ;;  %v2185_v41 = vld [vmem:[%s3756_s5 + $0x18] sm:$0xff]  ;;  %v2183_v19 = vld [vmem:[%s3756_s5 + $0x8] sm:$0xff] }
 0x351   :  { %1988 = vrot.lane.b32.xlu0 %v1987_v20, %s2495_s27  ;;  %v2152_v44 = vsel %vm1950_vm1, %v3498_v18, %v2151_v0  ;;  %v2038_v59 = vsel %vm1944_vm13, %v2037_v9, %v3525_v7  ;;  %v2047_v16 = vrot.slane %v3525_v7, 1  ;;  %v2170_v61 = vrot.slane %v3570_v60, 1  ;;  %2382 = vmatprep.subr.mxu0 %v2207_v21  ;;  %v2200_v20 = vld [vmem:[%s3756_s5 + $0x90] sm:$0xff] }
 0x352   :  { %v2039_v15 = vsel %vm1946_vm15, %v2037_v9, %v2038_v59  ;;  %v2162_v37 = vsel %vm1944_vm13, %v2161_v49, %v3570_v60  ;;  %v1945_v58 = vsel %vm1944_vm13, %v3482_v52, %v3488_v50  ;;  %v2077_v34 = vrot.slane %v3485_v56, 7  ;;  %2383 = vmatpush3.msra.mxu0 %v2191_v23 }
 0x353   :  { %v2040_v18 = vsel %vm1948_vm0, %v2037_v9, %v2039_v15  ;;  %v2163_v40 = vsel %vm1946_vm15, %v2161_v49, %v2162_v37  ;;  %v2050_v7 = vsel %vm1944_vm13, %v3512_v24, %v2047_v16  ;;  %v2173_v28 = vsel %vm1944_vm13, %v3520_v3, %v2170_v61  ;;  %2384 = vmatprep.subr.mxu0 %v2206_v57 }
 0x354   :  { %2115 = vrot.lane.b32.xlu1 %v2114_v22, %s2495_s27  ;;  %v2041_v50 = vsel %vm1950_vm1, %v2037_v9, %v2040_v18  ;;  %v2164_v56 = vsel %vm1948_vm0, %v2161_v49, %v2163_v40  ;;  %v2051_v26 = vsel %vm1946_vm15, %v3512_v24, %v2050_v7  ;;  %v2174_v12 = vsel %vm1946_vm15, %v3520_v3, %v2173_v28  ;;  %v2198_v22 = vld [vmem:[%s3756_s5 + $0x80] sm:$0xff] }
 0x355   :  { %2016 = vrot.lane.b32.xlu0 %v2015_v51, %s2496_s8  ;;  %v2165_v54 = vsel %vm1950_vm1, %v2161_v49, %v2164_v56  ;;  %v2052_v31 = vsel %vm1948_vm0, %v3512_v24, %v2051_v26  ;;  %v2175_v38 = vsel %vm1948_vm0, %v3520_v3, %v2174_v12  ;;  %v1947_v11 = vsel %vm1946_vm15, %v3482_v52, %v1945_v58 }
 0x356   :  { %v2053_v60 = vsel %vm1950_vm1, %v3512_v24, %v2052_v31  ;;  %v2176_v62 = vsel %vm1950_vm1, %v3520_v3, %v2175_v38  ;;  %v1949_v5 = vsel %vm1948_vm0, %v3482_v52, %v1947_v11  ;;  %v2078_v47 = vsel %vm1944_vm13, %v2077_v34, %v3528_v35  ;;  %2385 = vmatpush3.msra.mxu0 %v2190_v46  ;;  %v2204_v24 = vld [vmem:[%s3756_s5 + $0xb0] sm:$0xff] }
 0x357   :  { %v1951_v17 = vsel %vm1950_vm1, %v3482_v52, %v1949_v5  ;;  %v2079_v55 = vsel %vm1946_vm15, %v2077_v34, %v2078_v47  ;;  %2386 = vmatprep.subr.mxu0 %v2205_v45  ;;  %v2188_v35 = vld [vmem:[%s3756_s5 + $0x30] sm:$0xff] }
 0x358   :  { %2142 = vrot.lane.b32.xlu1 %v2141_v2, %s2496_s8  ;;  %1954 = vst.msk [vmem:[#allocation3] sm:$0x3] %vm1953_vm3, %v1951_v17  ;;  %v2080_v3 = vsel %vm1948_vm0, %v2077_v34, %v2079_v55  ;;  %2387 = vmatpush3.msra.mxu0 %v2189_v27 }
 0x359   :  { %2028 = vrot.lane.b32.xlu0 %v2027_v30, %s2497_s16  ;;  %v2081_v52 = vsel %vm1950_vm1, %v2077_v34, %v2080_v3  ;;  %2388 = vmatprep.subr.mxu0 %v2204_v24 }
 0x35a   :  { %2083 = vst.msk [vmem:[#allocation3 + $0x2] sm:$0x3] %vm1953_vm3, %v2081_v52  ;;  %2389 = vmatpush3.msra.mxu0 %v2188_v35 }
 0x35b   :  { %2390 = vmatprep.subr.mxu0 %v2203_v13 }
 0x35c   :  { %2153 = vrot.lane.b32.xlu1 %v2152_v44, %s2497_s16  ;;  %2391 = vmatpush3.msra.mxu0 %v2187_v63  ;;  %v2368_v44 = vld [vmem:[%s3757_s6] ss:$0 sm:$0xff]  ;;  %s2500_s16 = smov [#allocation11]  }
 0x35d   :  { %2042 = vrot.lane.b32.xlu0 %v2041_v50, %s2498_s24  ;;  %2392 = vmatprep.subr.mxu0 %v2202_v33  ;;  %s2310_s17 = sshll.u32 %s2500_s16, 4  ;;  %s2311_s17 = int_to_ptr.vmem [resolvable:$true] %s2310_s17 }
 0x35e   :  { %2393 = vmatpush3.msra.mxu0 %v2186_v29  ;;  %s2458_s18 = scalar_lea.vmem %s2311_s17, 32  ;;  %p2463_p11 = scmp.lt.s32.totalorder %s2311_s17, %s2311_s17 }
 0x35f   :  { %2394 = vmatprep.subr.mxu0 %v2201_v48  ;;  %p2459_p10 = scmp.ne.s32.totalorder %s2311_s17, %s2458_s18  ;;  %p2464_p12 = scmp.lt.s32.totalorder %s2458_s18, %s2458_s18 }
 0x360   :  { %2166 = vrot.lane.b32.xlu1 %v2165_v54, %s2498_s24  ;;  %2395 = vmatpush3.msra.mxu0 %v2185_v41 }
 0x361   :  { %2054 = vrot.lane.b32.xlu0 %v2053_v60, %s2499_s30  ;;  %2396 = vmatprep.subr.mxu0 %v2200_v20  ;;  %p2465_p13 = por %p2464_p12, %p2463_p11 }
 0x362   :  { %2397 = vmatpush3.msra.mxu0 %v2184_v14 }
 0x363   :  { %2398 = vmatprep.subr.mxu0 %v2199_v42  ;;  %p2466_p0 = pnand %p2465_p13, %p2459_p10 }
 0x364   :  { %2177 = vrot.lane.b32.xlu1 %v2176_v62, %s2499_s30  ;;  %2399 = vmatpush3.msra.mxu0 %v2183_v19 }
 0x365   :  { %2400 = vmatprep.subr.mxu0 %v2198_v22 }
 0x366   :  { %2401 = vmatpush3.msra.mxu0 %v2182_v43 }
 0x3bb   :  { %v1963_v25 = vpop.permute.xlu0 %1962 }
 0x3bc   :  { %1966 = vst.msk [vmem:[#allocation3] sm:$0x3] %vm1965_vm4, %v1963_v25 }
 0x3be   :  { %v2092_v36 = vpop.permute.xlu1 %2091 }
 0x3bf   :  { %2094 = vst.msk [vmem:[#allocation3 + $0x2] sm:$0x3] %vm1965_vm4, %v2092_v36  ;;  %v1977_v39 = vpop.permute.xlu0 %1976 }
 0x3c0   :  { %1980 = vst.msk [vmem:[#allocation3] sm:$0x3] %vm1979_vm5, %v1977_v39 }
 0x3c2   :  { %v2105_v51 = vpop.permute.xlu1 %2104 }
 0x3c3   :  { %2107 = vst.msk [vmem:[#allocation3 + $0x2] sm:$0x3] %vm1979_vm5, %v2105_v51  ;;  %v1989_v32 = vpop.permute.xlu0 %1988 }
 0x3c4   :  { %1992 = vst.msk [vmem:[#allocation3] sm:$0x3] %vm1991_vm6, %v1989_v32 }
 0x3c6   :  { %v2116_v8 = vpop.permute.xlu1 %2115 }
 0x3c7   :  { %2118 = vst.msk [vmem:[#allocation3 + $0x2] sm:$0x3] %vm1991_vm6, %v2116_v8  ;;  %v2017_v4 = vpop.permute.xlu0 %2016 }
 0x3c8   :  { %2020 = vst.msk [vmem:[#allocation3] sm:$0x3] %vm2019_vm7, %v2017_v4 }
 0x3ca   :  { %v2143_v6 = vpop.permute.xlu1 %2142 }
 0x3cb   :  { %2145 = vst.msk [vmem:[#allocation3 + $0x2] sm:$0x3] %vm2019_vm7, %v2143_v6  ;;  %v2029_v10 = vpop.permute.xlu0 %2028 }
 0x3cc   :  { %2032 = vst.msk [vmem:[#allocation3] sm:$0x3] %vm2031_vm8, %v2029_v10 }
 0x3ce   :  { %v2154_v53 = vpop.permute.xlu1 %2153 }
 0x3cf   :  { %2156 = vst.msk [vmem:[#allocation3 + $0x2] sm:$0x3] %vm2031_vm8, %v2154_v53  ;;  %v2043_v1 = vpop.permute.xlu0 %2042 }
 0x3d0   :  { %2046 = vst.msk [vmem:[#allocation3] sm:$0x3] %vm2045_vm9, %v2043_v1 }
 0x3d2   :  { %v2167_v9 = vpop.permute.xlu1 %2166 }
 0x3d3   :  { %2169 = vst.msk [vmem:[#allocation3 + $0x2] sm:$0x3] %vm2045_vm9, %v2167_v9  ;;  %v2055_v21 = vpop.permute.xlu0 %2054 }
 0x3d4   :  { %2058 = vst.msk [vmem:[#allocation3] sm:$0x3] %vm2057_vm10, %v2055_v21 }
 0x3d6   :  { %v2178_v2 = vpop.permute.xlu1 %2177 }
 0x3d7   :  { %2180 = vst.msk [vmem:[#allocation3 + $0x2] sm:$0x3] %vm2057_vm10, %v2178_v2 }
 0x3de   :  { %v2369_v30 = vld.sshfl [vmem:[#allocation3] sm:$0x33 pattern:$0x76325410] }
 0x3df   :  { %v2229_v0 = vcombine.high %v2369_v30, %v2369_v30 }
 0x3e1   :  { %2296 = vmatprep.mubr.f32.mxu0 %v2229_v0 }
 0x3e2   :  { %2297 = vmatmul.mubr.f32.vlgmr.msra.gmra.mxu0 %v2369_v30 }
 0x4a2   :  { %v2402_v49 = vpop.f32.mrf.mxu0 }
 0x4a4   :  { %v2403_v23 = vpop.f32.mrf.mxu0 }
 0x4a5   :  { %v2404_v59 = vadd.f32 %v2403_v23, %v2402_v49 }
 0x4a7   :  { %v2299_v16 = vadd.f32 %v2404_v59, %v2368_v44 }
 0x4a9   :  { %2303 = vst.msk [vmem:[#allocation11] sm:$0x3] %vm2302_vm11, %v2299_v16 }
 0x4aa   :  { %2469 = shalt.err (!%p2466_p0)
}
 0x4ab   :  { %2313 = dma.vmem_to_hbm [thread:$0]  %s2311_s17, 32, %s3758_s7, [#allocation7]  }
 0x4ac   :  { %2482 = dma.done.wait [#allocation7], 32  }
 0x4ad   :  { %2483 = vsyncadd [#allocation7], 4294967264 }
 0x4ae   :  { %2317 = vsyncpa [#allocation7], 1 }
 0x4af   :  { %2318 = vsyncpa [#allocation8], 1 }
 0x4b0   :  { %2319 = vsyncpa [#allocation10], 1 }

</bundles_post_ra>
